<compile_context>
chip_gen: v5e
topology: v5e:2x2
jax: 0.10.0
libtpu: 0.0.40
codegen_flags: <defaults>
</compile_context>

<pallas_src>
import functools

import numpy as np
import jax
import jax.numpy as jnp
from jax.experimental import pallas as pl
from jax.experimental.pallas import tpu as pltpu


# ----------------------------------------------------------------------------
# constants lifted from the PyTorch module
# ----------------------------------------------------------------------------
SPATIAL_POS_25 = np.array([
    [0, 1, 3, 4, 3, 4, 5, 6, 3, 4, 5, 6, 1, 2, 3, 4, 1, 2, 3, 4, 2, 7, 7, 7, 7],
    [1, 0, 2, 3, 2, 3, 4, 5, 2, 3, 4, 5, 2, 3, 4, 5, 2, 3, 4, 5, 1, 6, 6, 6, 6],
    [3, 2, 0, 1, 2, 3, 4, 5, 2, 3, 4, 5, 4, 5, 6, 7, 4, 5, 6, 7, 1, 6, 6, 6, 6],
    [4, 3, 1, 0, 3, 4, 5, 6, 3, 4, 5, 6, 5, 6, 7, 8, 5, 6, 7, 8, 2, 7, 7, 7, 7],
    [3, 2, 2, 3, 0, 1, 2, 3, 2, 3, 4, 5, 4, 5, 6, 7, 4, 5, 6, 7, 1, 4, 4, 6, 6],
    [4, 3, 3, 4, 1, 0, 1, 2, 3, 4, 5, 6, 5, 6, 7, 8, 5, 6, 7, 8, 2, 3, 3, 7, 7],
    [5, 4, 4, 5, 2, 1, 0, 1, 4, 5, 6, 7, 6, 7, 8, 9, 6, 7, 8, 9, 3, 2, 2, 8, 8],
    [6, 5, 5, 6, 3, 2, 1, 0, 5, 6, 7, 8, 7, 8, 9, 10, 7, 8, 9, 10, 4, 1, 1, 9, 9],
    [3, 2, 2, 3, 2, 3, 4, 5, 0, 1, 2, 3, 4, 5, 6, 7, 4, 5, 6, 7, 1, 6, 6, 4, 4],
    [4, 3, 3, 4, 3, 4, 5, 6, 4, 0, 1, 2, 5, 6, 7, 8, 5, 6, 7, 8, 2, 7, 7, 3, 3],
    [5, 4, 4, 5, 4, 5, 6, 7, 2, 1, 0, 1, 6, 7, 8, 9, 6, 7, 8, 9, 3, 8, 8, 2, 2],
    [6, 5, 5, 6, 5, 6, 7, 8, 3, 2, 1, 0, 7, 8, 9, 10, 7, 8, 9, 10, 4, 9, 9, 1, 1],
    [1, 2, 4, 5, 4, 5, 6, 7, 4, 5, 6, 7, 0, 1, 2, 3, 2, 3, 4, 5, 3, 8, 8, 8, 8],
    [2, 3, 5, 6, 5, 6, 7, 8, 5, 6, 7, 8, 1, 0, 1, 2, 3, 4, 5, 6, 4, 9, 9, 9, 9],
    [3, 4, 6, 7, 6, 7, 8, 9, 6, 7, 8, 9, 2, 1, 0, 1, 4, 5, 6, 7, 5, 10, 10, 10, 10],
    [4, 5, 7, 8, 7, 8, 9, 10, 7, 8, 9, 10, 3, 2, 1, 0, 5, 6, 7, 8, 6, 11, 11, 11, 11],
    [1, 2, 4, 5, 4, 5, 6, 7, 4, 5, 6, 7, 2, 3, 4, 5, 0, 1, 2, 3, 3, 8, 8, 8, 8],
    [2, 3, 5, 6, 5, 6, 7, 8, 5, 6, 7, 8, 4, 5, 6, 1, 1, 0, 1, 2, 4, 9, 9, 9, 9],
    [3, 4, 6, 7, 6, 7, 8, 9, 6, 7, 8, 9, 4, 5, 6, 7, 2, 1, 0, 1, 5, 10, 10, 10, 10],
    [4, 5, 7, 8, 7, 8, 9, 10, 7, 8, 9, 10, 5, 6, 7, 8, 3, 2, 1, 0, 6, 11, 11, 11, 11],
    [2, 1, 1, 2, 1, 2, 3, 4, 1, 2, 3, 4, 3, 4, 5, 6, 3, 4, 5, 6, 0, 5, 5, 5, 5],
    [7, 6, 6, 7, 4, 3, 2, 1, 6, 7, 8, 9, 8, 9, 10, 11, 8, 9, 10, 11, 5, 0, 2, 10, 10],
    [7, 6, 6, 7, 4, 3, 2, 1, 6, 7, 8, 9, 8, 9, 10, 11, 8, 9, 10, 11, 5, 2, 0, 10, 10],
    [7, 6, 6, 7, 6, 7, 8, 9, 4, 3, 2, 1, 8, 9, 10, 11, 8, 9, 10, 11, 5, 10, 10, 0, 10],
    [7, 6, 6, 7, 6, 7, 8, 9, 4, 3, 2, 1, 8, 9, 10, 11, 8, 9, 10, 11, 5, 10, 10, 10, 0],
], dtype=np.int32)

ALL_DEGREE = np.array(
    [4, 3, 3, 2, 3, 3, 3, 3, 3, 3, 3, 3, 3, 3, 3, 2, 3, 3, 3, 2, 5, 2, 3, 2, 3],
    dtype=np.int32)


def build_spatial_pos(num_joints):
    sp = np.zeros((num_joints, num_joints), dtype=np.int32)
    for i in range(6):
        lo = i * 25
        sp[lo:lo + 25, lo:lo + 25] = SPATIAL_POS_25
    return sp


def make_pos_embed(channels, num_frames, num_joints):
    pos = np.tile(np.arange(num_joints), num_frames).astype(np.float32)[:, None]
    pe = np.zeros((num_frames * num_joints, channels), np.float32)
    div = np.exp(np.arange(0, channels, 2).astype(np.float32)
                 * -(np.log(10000.0) / channels))
    pe[:, 0::2] = np.sin(pos * div)
    pe[:, 1::2] = np.cos(pos * div)
    pe = pe.reshape(num_frames, num_joints, channels).transpose(2, 0, 1)[None]
    return jnp.asarray(pe)  # (1, C, num_frames, V)


# ----------------------------------------------------------------------------
# the fused Pallas kernel : one program = one batch element, everything in VMEM
# ----------------------------------------------------------------------------
def _sta_kernel(alpha_ref, x_ref, pos_ref, wq_ref, bq_ref, abias_ref, shifts_ref,
                wo_ref, b1_ref, wr_ref, br_ref, wf_ref, bf_ref, wt_ref, bt_ref,
                o_ref, *, heads, qkv_dim, t_len, pads, kv):
    f32 = jnp.float32
    x = x_ref[0]                                        # (C*T, V) raw input
    xs = x + pos_ref[...]                               # + positional & degree bias

    # qkv 1x1 conv (kron-expanded over T so t is preserved by the matmul)
    qkv = jnp.dot(wq_ref[...], xs, preferred_element_type=f32) + bq_ref[...]
    # ress residual branch (1x1 conv + folded BN) on the RAW input x
    x_ress = jnp.dot(wr_ref[...], x, preferred_element_type=f32) + br_ref[...]

    inv_scale = 1.0 / float(qkv_dim * t_len)
    dt = qkv_dim * t_len
    # out_nets accumulator starts with (folded bias) + residual
    y1 = b1_ref[...] + x_ress                           # (Cout*T, V)

    for h in range(heads):
        q_h = qkv[h * dt:(h + 1) * dt]                  # (D*T, V)
        k_h = qkv[(heads + h) * dt:(heads + h + 1) * dt]
        # s[u, v] = sum_{d,t} q[dt, u] * k[dt, v]
        s = jax.lax.dot_general(q_h, k_h, (((0,), (0,)), ((), ())),
                                preferred_element_type=f32)          # (V, V)
        attn = jnp.tanh(s * inv_scale) * alpha_ref[h] + abias_ref[h]
        xa = jnp.dot(x, attn, preferred_element_type=f32)            # (C*T, V)
        # out_nets (1, kv) conv: taps realized with constant (V,V) shift
        # matrices on the MXU, channel mixing via kron-expanded weights.
        for dvi in range(kv):
            xa_s = xa if dvi == pads else jnp.dot(
                xa, shifts_ref[dvi], preferred_element_type=f32)
            y1 = y1 + jnp.dot(wo_ref[h * kv + dvi], xa_s,
                              preferred_element_type=f32)

    xs1 = jnp.where(y1 >= 0, y1, 0.1 * y1)                           # LeakyReLU
    y2 = jnp.dot(wf_ref[...], xs1, preferred_element_type=f32) + bf_ref[...] + x_ress
    xs2 = jnp.where(y2 >= 0, y2, 0.1 * y2)
    # out_nett (kt,1) conv + rest (1x1) already fused into ONE weight/bias
    y3 = jnp.dot(wt_ref[...], xs2, preferred_element_type=f32) + bt_ref[...]
    o_ref[0] = jnp.where(y3 >= 0, y3, 0.1 * y3)


# ----------------------------------------------------------------------------
# parameter folding (BatchNorm folds, kron expansion over T, tap shift matrices)
# ----------------------------------------------------------------------------
def fold_params(p, heads, qkv_dim, len_parts, t):
    qkv_w = p['qkv_w'][:, :, 0, 0]                          # (2HD, C)
    in_c = qkv_w.shape[1]
    out_c = p['outs_w'].shape[0]
    kv = p['outs_w'].shape[3]
    kt = p['outt_w'].shape[2]
    v = p['spatial_pos'].shape[0]
    eye_t = jnp.eye(t, dtype=jnp.float32)
    pads = (kv - 1) // 2
    padt = (kt - 1) // 2

    # positional + degree bias, (C*T, V)
    pe = p['pe'][0, :, :t, :]                               # (C, T, V)
    deg = p['degree_table'][p['all_degree']]                # (25, C)
    deg_v = jnp.tile(deg.T, (1, len_parts))                 # (C, V)
    pos_bias = (pe + deg_v[:, None, :]).reshape(in_c * t, v)

    # attention bias (att0s + spatial embedding), (H, V, V)
    spa = p['spatial_table'][p['spatial_pos']]              # (V, V, H)
    attn_bias = p['att0s'][0] + jnp.transpose(spa, (2, 0, 1))

    # (V, V) shift matrices for the (1, kv) conv taps along V (zero padded)
    shifts = jnp.stack([jnp.eye(v, k=pads - dvi, dtype=jnp.float32)
                        for dvi in range(kv)], axis=0)      # (kv, V, V)

    # qkv projection (bias only, no BN)
    wq = jnp.kron(qkv_w, eye_t)                             # (2HD*T, C*T)
    bq = jnp.repeat(p['qkv_b'], t)[:, None]

    def bn_fold_1x1(w2d, b, scale, shift):
        w = jnp.kron(w2d * scale[:, None], eye_t)
        bb = jnp.repeat(b * scale + shift, t)[:, None]
        return w, bb

    # out_nets (1,kv) conv + BN folded, per (head, tap): (H*kv, Cout*T, Cin*T)
    scale_o, shift_o = p['outs_scale'], p['outs_shift']
    wo = jnp.stack(
        [jnp.kron(p['outs_w'][:, hh * in_c:(hh + 1) * in_c, 0, dvi]
                  * scale_o[:, None], eye_t)
         for hh in range(heads) for dvi in range(kv)], axis=0)
    b1 = jnp.repeat(p['outs_b'] * scale_o + shift_o, t)[:, None]

    wr, br = bn_fold_1x1(p['ress_w'][:, :, 0, 0], p['ress_b'],
                         p['ress_scale'], p['ress_shift'])
    wf, bf = bn_fold_1x1(p['ff_w'][:, :, 0, 0], p['ff_b'],
                         p['ff_scale'], p['ff_shift'])

    # out_nett (kt,1) temporal conv folded into the row/col (c,t) layout ...
    wt = sum(jnp.kron(p['outt_w'][:, :, dti, 0] * p['outt_scale'][:, None],
                      jnp.eye(t, k=dti - padt, dtype=jnp.float32))
             for dti in range(kt))
    # ... and the rest 1x1 conv summed straight into it (single tail matmul)
    wt = wt + jnp.kron(p['rest_w'][:, :, 0, 0] * p['rest_scale'][:, None], eye_t)
    bt = jnp.repeat(p['outt_b'] * p['outt_scale'] + p['outt_shift']
                    + p['rest_b'] * p['rest_scale'] + p['rest_shift'], t)[:, None]

    return dict(alphas=p['alphas'].reshape(-1).astype(jnp.float32),
                pos_bias=pos_bias, attn_bias=attn_bias, shifts=shifts,
                wq=wq, bq=bq, wo=wo, b1=b1, wr=wr, br=br, wf=wf, bf=bf,
                wt=wt, bt=bt,
                dims=dict(heads=heads, qkv_dim=qkv_dim, t=t, v=v, kv=kv,
                          pads=pads, in_c=in_c, out_c=out_c))


# ----------------------------------------------------------------------------
# forward wrapper : one pallas_call, grid = (N,)
# ----------------------------------------------------------------------------
def sta_block_forward(x, fp):
    d = fp['dims']
    n, c, t, v = x.shape
    ct = c * t
    ot = fp['wt'].shape[0]          # out_c * T
    qt = fp['wq'].shape[0]          # 2*H*D * T
    heads, qkv_dim, kv, pads = d['heads'], d['qkv_dim'], d['kv'], d['pads']

    x2 = x.reshape(n, ct, v)        # free reshape of NCHW (no transpose)

    kernel = functools.partial(_sta_kernel, heads=heads, qkv_dim=qkv_dim,
                               t_len=t, pads=pads, kv=kv)

    def _mmf(m, k, nn):
        return 2 * m * k * nn

    flops_per_n = (_mmf(qt, ct, v) + _mmf(ot, ct, v)
                   + heads * (_mmf(v, qkv_dim * t, v) + _mmf(ct, v, v)
                              + (kv - 1) * _mmf(ct, v, v)
                              + kv * _mmf(ot, ct, v))
                   + 2 * _mmf(ot, ot, v))
    weight_keys = ('pos_bias', 'wq', 'bq', 'attn_bias', 'shifts', 'wo', 'b1',
                   'wr', 'br', 'wf', 'bf', 'wt', 'bt', 'alphas')
    bytes_accessed = int(x2.nbytes + n * ot * v * 4
                         + sum(int(fp[k].nbytes) for k in weight_keys))
    cost = pl.CostEstimate(flops=int(n * flops_per_n),
                           transcendentals=int(n * heads * v * v),
                           bytes_accessed=bytes_accessed)

    out = pl.pallas_call(
        kernel,
        out_shape=jax.ShapeDtypeStruct((n, ot, v), jnp.float32),
        grid=(n,),
        in_specs=[
            pl.BlockSpec(memory_space=pltpu.MemorySpace.SMEM),      # alphas (H,)
            pl.BlockSpec((1, ct, v), lambda i: (i, 0, 0)),          # x
            pl.BlockSpec((ct, v), lambda i: (0, 0)),                # pos+deg bias
            pl.BlockSpec((qt, ct), lambda i: (0, 0)),               # wq
            pl.BlockSpec((qt, 1), lambda i: (0, 0)),                # bq
            pl.BlockSpec((heads, v, v), lambda i: (0, 0, 0)),       # attn bias
            pl.BlockSpec((kv, v, v), lambda i: (0, 0, 0)),          # tap shifts
            pl.BlockSpec((heads * kv, ot, ct), lambda i: (0, 0, 0)),  # wo
            pl.BlockSpec((ot, 1), lambda i: (0, 0)),                # b1
            pl.BlockSpec((ot, ct), lambda i: (0, 0)),               # wr (ress)
            pl.BlockSpec((ot, 1), lambda i: (0, 0)),                # br
            pl.BlockSpec((ot, ot), lambda i: (0, 0)),               # wf (ff)
            pl.BlockSpec((ot, 1), lambda i: (0, 0)),                # bf
            pl.BlockSpec((ot, ot), lambda i: (0, 0)),               # wt (outt+rest)
            pl.BlockSpec((ot, 1), lambda i: (0, 0)),                # bt
        ],
        out_specs=pl.BlockSpec((1, ot, v), lambda i: (i, 0, 0)),
        compiler_params=pltpu.CompilerParams(
            dimension_semantics=("parallel",)),
        cost_estimate=cost,
    )(fp['alphas'], x2, fp['pos_bias'], fp['wq'], fp['bq'], fp['attn_bias'],
      fp['shifts'], fp['wo'], fp['b1'], fp['wr'], fp['br'], fp['wf'], fp['bf'],
      fp['wt'], fp['bt'])

    return out.reshape(n, d['out_c'], t, v)


# ----------------------------------------------------------------------------
# parameters
# ----------------------------------------------------------------------------
def init_params(key, in_c, out_c, qkv_dim, heads, num_frames, num_joints, kt, kv):
    keys = iter(jax.random.split(key, 64))

    def nrm(shape, s=0.1):
        return s * jax.random.normal(next(keys), shape, jnp.float32)

    def bn_fold(c):
        gamma = 1.0 + nrm((c,))
        beta = nrm((c,))
        mean = nrm((c,))
        var = 1.0 + jnp.abs(nrm((c,)))
        scale = gamma / jnp.sqrt(var + 1e-5)
        shift = beta - mean * scale
        return scale, shift

    p = {}
    p['pe'] = make_pos_embed(in_c, num_frames, num_joints)
    p['degree_table'] = nrm((num_joints, in_c)).at[0].set(0.0)    # padding_idx=0
    p['spatial_table'] = nrm((num_joints, heads)).at[0].set(0.0)  # padding_idx=0
    p['qkv_w'] = nrm((2 * heads * qkv_dim, in_c, 1, 1))
    p['qkv_b'] = nrm((2 * heads * qkv_dim,), 0.05)
    p['alphas'] = jnp.ones((1, heads, 1, 1), jnp.float32)
    p['att0s'] = jnp.ones((1, heads, num_joints, num_joints), jnp.float32) / num_joints
    p['outs_w'] = nrm((out_c, in_c * heads, 1, kv)); p['outs_b'] = nrm((out_c,), 0.05)
    p['outs_scale'], p['outs_shift'] = bn_fold(out_c)
    p['ff_w'] = nrm((out_c, out_c, 1, 1)); p['ff_b'] = nrm((out_c,), 0.05)
    p['ff_scale'], p['ff_shift'] = bn_fold(out_c)
    p['outt_w'] = nrm((out_c, out_c, kt, 1)); p['outt_b'] = nrm((out_c,), 0.05)
    p['outt_scale'], p['outt_shift'] = bn_fold(out_c)
    p['ress_w'] = nrm((out_c, in_c, 1, 1)); p['ress_b'] = nrm((out_c,), 0.05)
    p['ress_scale'], p['ress_shift'] = bn_fold(out_c)
    p['rest_w'] = nrm((out_c, out_c, 1, 1)); p['rest_b'] = nrm((out_c,), 0.05)
    p['rest_scale'], p['rest_shift'] = bn_fold(out_c)
    p['all_degree'] = jnp.asarray(ALL_DEGREE)
    p['spatial_pos'] = jnp.asarray(build_spatial_pos(num_joints))
    return p


# ----------------------------------------------------------------------------
# pure-JAX reference of the PyTorch forward
# ----------------------------------------------------------------------------
def reference_forward(x, p, heads, qkv_dim, len_parts):
    hp = jax.lax.Precision.HIGHEST
    n, c, t, v = x.shape

    def conv(z, w, b):
        kt, kv = w.shape[2], w.shape[3]
        y = jax.lax.conv_general_dilated(
            z, w, (1, 1), [((kt - 1) // 2,) * 2, ((kv - 1) // 2,) * 2],
            dimension_numbers=('NCHW', 'OIHW', 'NCHW'), precision=hp)
        return y + b[None, :, None, None]

    def bn(y, s, sh):
        return y * s[None, :, None, None] + sh[None, :, None, None]

    def leaky(y):
        return jnp.where(y >= 0, y, 0.1 * y)

    xs = x + p['pe'][:, :, :t, :]
    deg = p['degree_table'][p['all_degree']]
    xs = xs + jnp.tile(deg.T[None, :, None, :], (n, 1, 1, len_parts))
    qkv = conv(xs, p['qkv_w'], p['qkv_b']).reshape(n, 2, heads, qkv_dim, t, v)
    q, k = qkv[:, 0], qkv[:, 1]
    att = jnp.tanh(jnp.einsum('nhctu,nhctv->nhuv', q, k, precision=hp)
                   / (qkv_dim * t)) * p['alphas']
    spa = p['spatial_table'][p['spatial_pos']].transpose(2, 0, 1)[None]
    att = att + p['att0s'] + spa
    x_a = jnp.einsum('nctu,nhuv->nhctv', x, att, precision=hp)
    x_a = x_a.reshape(n, heads * c, t, v)
    x_ress = bn(conv(x, p['ress_w'], p['ress_b']), p['ress_scale'], p['ress_shift'])
    xs1 = leaky(bn(conv(x_a, p['outs_w'], p['outs_b']),
                   p['outs_scale'], p['outs_shift']) + x_ress)
    xs2 = leaky(bn(conv(xs1, p['ff_w'], p['ff_b']),
                   p['ff_scale'], p['ff_shift']) + x_ress)
    x_rest = bn(conv(xs2, p['rest_w'], p['rest_b']), p['rest_scale'], p['rest_shift'])
    xt = leaky(bn(conv(xs2, p['outt_w'], p['outt_b']),
                  p['outt_scale'], p['outt_shift']) + x_rest)
    return xt


# ----------------------------------------------------------------------------
if __name__ == "__main__":
    # Small config consistent with the module: the Spatial_pos construction
    # requires num_joints = 6 * 25 = 150 and len_parts = 6.
    N, IN_C, OUT_C = 2, 8, 16
    QKV_DIM, HEADS = 4, 2
    LEN_PARTS = 6
    NUM_JOINTS = 25 * LEN_PARTS          # V = 150
    NUM_FRAMES = 4                       # T = 4
    KT, KV = 3, 3                        # kernel_size

    key = jax.random.PRNGKey(0)
    kp, kx = jax.random.split(key)
    params = init_params(kp, IN_C, OUT_C, QKV_DIM, HEADS, NUM_FRAMES,
                         NUM_JOINTS, KT, KV)
    x = jax.random.normal(kx, (N, IN_C, NUM_FRAMES, NUM_JOINTS), jnp.float32)

    folded = fold_params(params, HEADS, QKV_DIM, LEN_PARTS, NUM_FRAMES)
    out = jax.block_until_ready(sta_block_forward(x, folded))
    assert out.shape == (N, OUT_C, NUM_FRAMES, NUM_JOINTS)

    ref = reference_forward(x, params, HEADS, QKV_DIM, LEN_PARTS)
    np.testing.assert_allclose(np.asarray(out), np.asarray(ref),
                               rtol=2e-2, atol=2e-2)
    print("KERNEL_OK")
</pallas_src>

<mosaic_0001>
module attributes {stable_mosaic.version = 11 : i64} {
  func.func @_sta_kernel(%arg0: i32, %arg1: memref<2xf32, #tpu.memory_space<smem>>, %arg2: memref<1x32x150xf32, #tpu.memory_space<vmem>>, %arg3: memref<32x150xf32, #tpu.memory_space<vmem>>, %arg4: memref<64x32xf32, #tpu.memory_space<vmem>>, %arg5: memref<64x1xf32, #tpu.memory_space<vmem>>, %arg6: memref<2x150x150xf32, #tpu.memory_space<vmem>>, %arg7: memref<3x150x150xf32, #tpu.memory_space<vmem>>, %arg8: memref<6x64x32xf32, #tpu.memory_space<vmem>>, %arg9: memref<64x1xf32, #tpu.memory_space<vmem>>, %arg10: memref<64x32xf32, #tpu.memory_space<vmem>>, %arg11: memref<64x1xf32, #tpu.memory_space<vmem>>, %arg12: memref<64x64xf32, #tpu.memory_space<vmem>>, %arg13: memref<64x1xf32, #tpu.memory_space<vmem>>, %arg14: memref<64x64xf32, #tpu.memory_space<vmem>>, %arg15: memref<64x1xf32, #tpu.memory_space<vmem>>, %arg16: memref<1x64x150xf32, #tpu.memory_space<vmem>>) attributes {dimension_semantics = [#tpu.dimension_semantics<parallel>], iteration_bounds = array<i64: 2>, scalar_prefetch = 0 : i64, scratch_operands = 0 : i64, tpu.core_type = #tpu.core_type<tc>, window_params = [{transform_indices = @transform_0, window_bounds = array<i64: 2>}, {transform_indices = @transform_1, window_bounds = array<i64: 1, 32, 150>}, {pipeline_mode = #tpu.pipeline_mode<synchronous>, transform_indices = @transform_2, window_bounds = array<i64: 32, 150>}, {pipeline_mode = #tpu.pipeline_mode<synchronous>, transform_indices = @transform_3, window_bounds = array<i64: 64, 32>}, {pipeline_mode = #tpu.pipeline_mode<synchronous>, transform_indices = @transform_4, window_bounds = array<i64: 64, 1>}, {pipeline_mode = #tpu.pipeline_mode<synchronous>, transform_indices = @transform_5, window_bounds = array<i64: 2, 150, 150>}, {pipeline_mode = #tpu.pipeline_mode<synchronous>, transform_indices = @transform_6, window_bounds = array<i64: 3, 150, 150>}, {pipeline_mode = #tpu.pipeline_mode<synchronous>, transform_indices = @transform_7, window_bounds = array<i64: 6, 64, 32>}, {pipeline_mode = #tpu.pipeline_mode<synchronous>, transform_indices = @transform_8, window_bounds = array<i64: 64, 1>}, {pipeline_mode = #tpu.pipeline_mode<synchronous>, transform_indices = @transform_9, window_bounds = array<i64: 64, 32>}, {pipeline_mode = #tpu.pipeline_mode<synchronous>, transform_indices = @transform_10, window_bounds = array<i64: 64, 1>}, {pipeline_mode = #tpu.pipeline_mode<synchronous>, transform_indices = @transform_11, window_bounds = array<i64: 64, 64>}, {pipeline_mode = #tpu.pipeline_mode<synchronous>, transform_indices = @transform_12, window_bounds = array<i64: 64, 1>}, {pipeline_mode = #tpu.pipeline_mode<synchronous>, transform_indices = @transform_13, window_bounds = array<i64: 64, 64>}, {pipeline_mode = #tpu.pipeline_mode<synchronous>, transform_indices = @transform_14, window_bounds = array<i64: 64, 1>}, {transform_indices = @transform_15, window_bounds = array<i64: 1, 64, 150>}]} {
    %c0 = arith.constant 0 : index
    %c0_0 = arith.constant 0 : index
    %c0_1 = arith.constant 0 : index
    %0 = vector.load %arg2[%c0, %c0_0, %c0_1] : memref<1x32x150xf32, #tpu.memory_space<vmem>>, vector<1x32x150xf32>
    %1 = vector.shape_cast %0 : vector<1x32x150xf32> to vector<32x150xf32>
    %c0_2 = arith.constant 0 : index
    %c0_3 = arith.constant 0 : index
    %2 = vector.load %arg3[%c0_2, %c0_3] : memref<32x150xf32, #tpu.memory_space<vmem>>, vector<32x150xf32>
    %3 = arith.addf %1, %2 : vector<32x150xf32>
    %c0_4 = arith.constant 0 : index
    %c0_5 = arith.constant 0 : index
    %4 = vector.load %arg4[%c0_4, %c0_5] : memref<64x32xf32, #tpu.memory_space<vmem>>, vector<64x32xf32>
    %cst = arith.constant dense<0.000000e+00> : vector<64x150xf32>
    %5 = tpu.matmul %4, %3, %cst {dimension_numbers = #tpu.dot_dimension_numbers<[1], [0], [0], [1], [0, 0, 1, 1], [], []>} : vector<64x32xf32>, vector<32x150xf32>, vector<64x150xf32> -> vector<64x150xf32>
    %c0_6 = arith.constant 0 : index
    %c0_7 = arith.constant 0 : index
    %6 = vector.load %arg5[%c0_6, %c0_7] : memref<64x1xf32, #tpu.memory_space<vmem>>, vector<64x1xf32>
    %7 = vector.broadcast %6 : vector<64x1xf32> to vector<64x150xf32>
    %8 = arith.addf %5, %7 : vector<64x150xf32>
    %c0_8 = arith.constant 0 : index
    %c0_9 = arith.constant 0 : index
    %9 = vector.load %arg10[%c0_8, %c0_9] : memref<64x32xf32, #tpu.memory_space<vmem>>, vector<64x32xf32>
    %cst_10 = arith.constant dense<0.000000e+00> : vector<64x150xf32>
    %10 = tpu.matmul %9, %1, %cst_10 {dimension_numbers = #tpu.dot_dimension_numbers<[1], [0], [0], [1], [0, 0, 1, 1], [], []>} : vector<64x32xf32>, vector<32x150xf32>, vector<64x150xf32> -> vector<64x150xf32>
    %c0_11 = arith.constant 0 : index
    %c0_12 = arith.constant 0 : index
    %11 = vector.load %arg11[%c0_11, %c0_12] : memref<64x1xf32, #tpu.memory_space<vmem>>, vector<64x1xf32>
    %12 = vector.broadcast %11 : vector<64x1xf32> to vector<64x150xf32>
    %13 = arith.addf %10, %12 : vector<64x150xf32>
    %c0_13 = arith.constant 0 : index
    %c0_14 = arith.constant 0 : index
    %14 = vector.load %arg9[%c0_13, %c0_14] : memref<64x1xf32, #tpu.memory_space<vmem>>, vector<64x1xf32>
    %15 = vector.broadcast %14 : vector<64x1xf32> to vector<64x150xf32>
    %16 = arith.addf %15, %13 : vector<64x150xf32>
    %17 = vector.extract_strided_slice %8 {offsets = [0, 0], sizes = [16, 150], strides = [1, 1]} : vector<64x150xf32> to vector<16x150xf32>
    %18 = vector.extract_strided_slice %8 {offsets = [32, 0], sizes = [16, 150], strides = [1, 1]} : vector<64x150xf32> to vector<16x150xf32>
    %cst_15 = arith.constant dense<0.000000e+00> : vector<150x150xf32>
    %19 = tpu.matmul %17, %18, %cst_15 {dimension_numbers = #tpu.dot_dimension_numbers<[0], [0], [1], [1], [0, 1, 1, 1], [], []>} : vector<16x150xf32>, vector<16x150xf32>, vector<150x150xf32> -> vector<150x150xf32>
    %cst_16 = arith.constant 6.250000e-02 : f32
    %20 = vector.broadcast %cst_16 : f32 to vector<150x150xf32>
    %21 = arith.mulf %19, %20 : vector<150x150xf32>
    %22 = math.tanh %21 : vector<150x150xf32>
    %c0_17 = arith.constant 0 : index
    %23 = memref.load %arg1[%c0_17] : memref<2xf32, #tpu.memory_space<smem>>
    %24 = vector.broadcast %23 : f32 to vector<150x150xf32>
    %25 = arith.mulf %22, %24 : vector<150x150xf32>
    %c0_18 = arith.constant 0 : index
    %c0_19 = arith.constant 0 : index
    %c0_20 = arith.constant 0 : index
    %26 = vector.load %arg6[%c0_18, %c0_19, %c0_20] : memref<2x150x150xf32, #tpu.memory_space<vmem>>, vector<1x150x150xf32>
    %27 = vector.shape_cast %26 : vector<1x150x150xf32> to vector<150x150xf32>
    %28 = arith.addf %25, %27 : vector<150x150xf32>
    %cst_21 = arith.constant dense<0.000000e+00> : vector<32x150xf32>
    %29 = tpu.matmul %1, %28, %cst_21 {dimension_numbers = #tpu.dot_dimension_numbers<[1], [0], [0], [1], [0, 0, 1, 1], [], []>} : vector<32x150xf32>, vector<150x150xf32>, vector<32x150xf32> -> vector<32x150xf32>
    %c0_22 = arith.constant 0 : index
    %c0_23 = arith.constant 0 : index
    %c0_24 = arith.constant 0 : index
    %30 = vector.load %arg7[%c0_22, %c0_23, %c0_24] : memref<3x150x150xf32, #tpu.memory_space<vmem>>, vector<1x150x150xf32>
    %31 = vector.shape_cast %30 : vector<1x150x150xf32> to vector<150x150xf32>
    %cst_25 = arith.constant dense<0.000000e+00> : vector<32x150xf32>
    %32 = tpu.matmul %29, %31, %cst_25 {dimension_numbers = #tpu.dot_dimension_numbers<[1], [0], [0], [1], [0, 0, 1, 1], [], []>} : vector<32x150xf32>, vector<150x150xf32>, vector<32x150xf32> -> vector<32x150xf32>
    %c0_26 = arith.constant 0 : index
    %c0_27 = arith.constant 0 : index
    %c0_28 = arith.constant 0 : index
    %33 = vector.load %arg8[%c0_26, %c0_27, %c0_28] : memref<6x64x32xf32, #tpu.memory_space<vmem>>, vector<1x64x32xf32>
    %34 = vector.shape_cast %33 : vector<1x64x32xf32> to vector<64x32xf32>
    %cst_29 = arith.constant dense<0.000000e+00> : vector<64x150xf32>
    %35 = tpu.matmul %34, %32, %cst_29 {dimension_numbers = #tpu.dot_dimension_numbers<[1], [0], [0], [1], [0, 0, 1, 1], [], []>} : vector<64x32xf32>, vector<32x150xf32>, vector<64x150xf32> -> vector<64x150xf32>
    %36 = arith.addf %16, %35 : vector<64x150xf32>
    %c1 = arith.constant 1 : index
    %c0_30 = arith.constant 0 : index
    %c0_31 = arith.constant 0 : index
    %37 = vector.load %arg8[%c1, %c0_30, %c0_31] : memref<6x64x32xf32, #tpu.memory_space<vmem>>, vector<1x64x32xf32>
    %38 = vector.shape_cast %37 : vector<1x64x32xf32> to vector<64x32xf32>
    %cst_32 = arith.constant dense<0.000000e+00> : vector<64x150xf32>
    %39 = tpu.matmul %38, %29, %cst_32 {dimension_numbers = #tpu.dot_dimension_numbers<[1], [0], [0], [1], [0, 0, 1, 1], [], []>} : vector<64x32xf32>, vector<32x150xf32>, vector<64x150xf32> -> vector<64x150xf32>
    %40 = arith.addf %36, %39 : vector<64x150xf32>
    %c2 = arith.constant 2 : index
    %c0_33 = arith.constant 0 : index
    %c0_34 = arith.constant 0 : index
    %41 = vector.load %arg7[%c2, %c0_33, %c0_34] : memref<3x150x150xf32, #tpu.memory_space<vmem>>, vector<1x150x150xf32>
    %42 = vector.shape_cast %41 : vector<1x150x150xf32> to vector<150x150xf32>
    %cst_35 = arith.constant dense<0.000000e+00> : vector<32x150xf32>
    %43 = tpu.matmul %29, %42, %cst_35 {dimension_numbers = #tpu.dot_dimension_numbers<[1], [0], [0], [1], [0, 0, 1, 1], [], []>} : vector<32x150xf32>, vector<150x150xf32>, vector<32x150xf32> -> vector<32x150xf32>
    %c2_36 = arith.constant 2 : index
    %c0_37 = arith.constant 0 : index
    %c0_38 = arith.constant 0 : index
    %44 = vector.load %arg8[%c2_36, %c0_37, %c0_38] : memref<6x64x32xf32, #tpu.memory_space<vmem>>, vector<1x64x32xf32>
    %45 = vector.shape_cast %44 : vector<1x64x32xf32> to vector<64x32xf32>
    %cst_39 = arith.constant dense<0.000000e+00> : vector<64x150xf32>
    %46 = tpu.matmul %45, %43, %cst_39 {dimension_numbers = #tpu.dot_dimension_numbers<[1], [0], [0], [1], [0, 0, 1, 1], [], []>} : vector<64x32xf32>, vector<32x150xf32>, vector<64x150xf32> -> vector<64x150xf32>
    %47 = arith.addf %40, %46 : vector<64x150xf32>
    %48 = vector.extract_strided_slice %8 {offsets = [16, 0], sizes = [16, 150], strides = [1, 1]} : vector<64x150xf32> to vector<16x150xf32>
    %49 = vector.extract_strided_slice %8 {offsets = [48, 0], sizes = [16, 150], strides = [1, 1]} : vector<64x150xf32> to vector<16x150xf32>
    %cst_40 = arith.constant dense<0.000000e+00> : vector<150x150xf32>
    %50 = tpu.matmul %48, %49, %cst_40 {dimension_numbers = #tpu.dot_dimension_numbers<[0], [0], [1], [1], [0, 1, 1, 1], [], []>} : vector<16x150xf32>, vector<16x150xf32>, vector<150x150xf32> -> vector<150x150xf32>
    %cst_41 = arith.constant 6.250000e-02 : f32
    %51 = vector.broadcast %cst_41 : f32 to vector<150x150xf32>
    %52 = arith.mulf %50, %51 : vector<150x150xf32>
    %53 = math.tanh %52 : vector<150x150xf32>
    %c1_42 = arith.constant 1 : index
    %54 = memref.load %arg1[%c1_42] : memref<2xf32, #tpu.memory_space<smem>>
    %55 = vector.broadcast %54 : f32 to vector<150x150xf32>
    %56 = arith.mulf %53, %55 : vector<150x150xf32>
    %c1_43 = arith.constant 1 : index
    %c0_44 = arith.constant 0 : index
    %c0_45 = arith.constant 0 : index
    %57 = vector.load %arg6[%c1_43, %c0_44, %c0_45] : memref<2x150x150xf32, #tpu.memory_space<vmem>>, vector<1x150x150xf32>
    %58 = vector.shape_cast %57 : vector<1x150x150xf32> to vector<150x150xf32>
    %59 = arith.addf %56, %58 : vector<150x150xf32>
    %cst_46 = arith.constant dense<0.000000e+00> : vector<32x150xf32>
    %60 = tpu.matmul %1, %59, %cst_46 {dimension_numbers = #tpu.dot_dimension_numbers<[1], [0], [0], [1], [0, 0, 1, 1], [], []>} : vector<32x150xf32>, vector<150x150xf32>, vector<32x150xf32> -> vector<32x150xf32>
    %c0_47 = arith.constant 0 : index
    %c0_48 = arith.constant 0 : index
    %c0_49 = arith.constant 0 : index
    %61 = vector.load %arg7[%c0_47, %c0_48, %c0_49] : memref<3x150x150xf32, #tpu.memory_space<vmem>>, vector<1x150x150xf32>
    %62 = vector.shape_cast %61 : vector<1x150x150xf32> to vector<150x150xf32>
    %cst_50 = arith.constant dense<0.000000e+00> : vector<32x150xf32>
    %63 = tpu.matmul %60, %62, %cst_50 {dimension_numbers = #tpu.dot_dimension_numbers<[1], [0], [0], [1], [0, 0, 1, 1], [], []>} : vector<32x150xf32>, vector<150x150xf32>, vector<32x150xf32> -> vector<32x150xf32>
    %c3 = arith.constant 3 : index
    %c0_51 = arith.constant 0 : index
    %c0_52 = arith.constant 0 : index
    %64 = vector.load %arg8[%c3, %c0_51, %c0_52] : memref<6x64x32xf32, #tpu.memory_space<vmem>>, vector<1x64x32xf32>
    %65 = vector.shape_cast %64 : vector<1x64x32xf32> to vector<64x32xf32>
    %cst_53 = arith.constant dense<0.000000e+00> : vector<64x150xf32>
    %66 = tpu.matmul %65, %63, %cst_53 {dimension_numbers = #tpu.dot_dimension_numbers<[1], [0], [0], [1], [0, 0, 1, 1], [], []>} : vector<64x32xf32>, vector<32x150xf32>, vector<64x150xf32> -> vector<64x150xf32>
    %67 = arith.addf %47, %66 : vector<64x150xf32>
    %c4 = arith.constant 4 : index
    %c0_54 = arith.constant 0 : index
    %c0_55 = arith.constant 0 : index
    %68 = vector.load %arg8[%c4, %c0_54, %c0_55] : memref<6x64x32xf32, #tpu.memory_space<vmem>>, vector<1x64x32xf32>
    %69 = vector.shape_cast %68 : vector<1x64x32xf32> to vector<64x32xf32>
    %cst_56 = arith.constant dense<0.000000e+00> : vector<64x150xf32>
    %70 = tpu.matmul %69, %60, %cst_56 {dimension_numbers = #tpu.dot_dimension_numbers<[1], [0], [0], [1], [0, 0, 1, 1], [], []>} : vector<64x32xf32>, vector<32x150xf32>, vector<64x150xf32> -> vector<64x150xf32>
    %71 = arith.addf %67, %70 : vector<64x150xf32>
    %c2_57 = arith.constant 2 : index
    %c0_58 = arith.constant 0 : index
    %c0_59 = arith.constant 0 : index
    %72 = vector.load %arg7[%c2_57, %c0_58, %c0_59] : memref<3x150x150xf32, #tpu.memory_space<vmem>>, vector<1x150x150xf32>
    %73 = vector.shape_cast %72 : vector<1x150x150xf32> to vector<150x150xf32>
    %cst_60 = arith.constant dense<0.000000e+00> : vector<32x150xf32>
    %74 = tpu.matmul %60, %73, %cst_60 {dimension_numbers = #tpu.dot_dimension_numbers<[1], [0], [0], [1], [0, 0, 1, 1], [], []>} : vector<32x150xf32>, vector<150x150xf32>, vector<32x150xf32> -> vector<32x150xf32>
    %c5 = arith.constant 5 : index
    %c0_61 = arith.constant 0 : index
    %c0_62 = arith.constant 0 : index
    %75 = vector.load %arg8[%c5, %c0_61, %c0_62] : memref<6x64x32xf32, #tpu.memory_space<vmem>>, vector<1x64x32xf32>
    %76 = vector.shape_cast %75 : vector<1x64x32xf32> to vector<64x32xf32>
    %cst_63 = arith.constant dense<0.000000e+00> : vector<64x150xf32>
    %77 = tpu.matmul %76, %74, %cst_63 {dimension_numbers = #tpu.dot_dimension_numbers<[1], [0], [0], [1], [0, 0, 1, 1], [], []>} : vector<64x32xf32>, vector<32x150xf32>, vector<64x150xf32> -> vector<64x150xf32>
    %78 = arith.addf %71, %77 : vector<64x150xf32>
    %cst_64 = arith.constant 0.000000e+00 : f32
    %79 = vector.broadcast %cst_64 : f32 to vector<64x150xf32>
    %80 = arith.cmpf oge, %78, %79 : vector<64x150xf32>
    %cst_65 = arith.constant 1.000000e-01 : f32
    %81 = vector.broadcast %cst_65 : f32 to vector<64x150xf32>
    %82 = arith.mulf %81, %78 : vector<64x150xf32>
    %83 = arith.select %80, %78, %82 : vector<64x150xi1>, vector<64x150xf32>
    %c0_66 = arith.constant 0 : index
    %c0_67 = arith.constant 0 : index
    %84 = vector.load %arg12[%c0_66, %c0_67] : memref<64x64xf32, #tpu.memory_space<vmem>>, vector<64x64xf32>
    %cst_68 = arith.constant dense<0.000000e+00> : vector<64x150xf32>
    %85 = tpu.matmul %84, %83, %cst_68 {dimension_numbers = #tpu.dot_dimension_numbers<[1], [0], [0], [1], [0, 0, 1, 1], [], []>} : vector<64x64xf32>, vector<64x150xf32>, vector<64x150xf32> -> vector<64x150xf32>
    %c0_69 = arith.constant 0 : index
    %c0_70 = arith.constant 0 : index
    %86 = vector.load %arg13[%c0_69, %c0_70] : memref<64x1xf32, #tpu.memory_space<vmem>>, vector<64x1xf32>
    %87 = vector.broadcast %86 : vector<64x1xf32> to vector<64x150xf32>
    %88 = arith.addf %85, %87 : vector<64x150xf32>
    %89 = arith.addf %88, %13 : vector<64x150xf32>
    %cst_71 = arith.constant 0.000000e+00 : f32
    %90 = vector.broadcast %cst_71 : f32 to vector<64x150xf32>
    %91 = arith.cmpf oge, %89, %90 : vector<64x150xf32>
    %cst_72 = arith.constant 1.000000e-01 : f32
    %92 = vector.broadcast %cst_72 : f32 to vector<64x150xf32>
    %93 = arith.mulf %92, %89 : vector<64x150xf32>
    %94 = arith.select %91, %89, %93 : vector<64x150xi1>, vector<64x150xf32>
    %c0_73 = arith.constant 0 : index
    %c0_74 = arith.constant 0 : index
    %95 = vector.load %arg14[%c0_73, %c0_74] : memref<64x64xf32, #tpu.memory_space<vmem>>, vector<64x64xf32>
    %cst_75 = arith.constant dense<0.000000e+00> : vector<64x150xf32>
    %96 = tpu.matmul %95, %94, %cst_75 {dimension_numbers = #tpu.dot_dimension_numbers<[1], [0], [0], [1], [0, 0, 1, 1], [], []>} : vector<64x64xf32>, vector<64x150xf32>, vector<64x150xf32> -> vector<64x150xf32>
    %c0_76 = arith.constant 0 : index
    %c0_77 = arith.constant 0 : index
    %97 = vector.load %arg15[%c0_76, %c0_77] : memref<64x1xf32, #tpu.memory_space<vmem>>, vector<64x1xf32>
    %98 = vector.broadcast %97 : vector<64x1xf32> to vector<64x150xf32>
    %99 = arith.addf %96, %98 : vector<64x150xf32>
    %cst_78 = arith.constant 0.000000e+00 : f32
    %100 = vector.broadcast %cst_78 : f32 to vector<64x150xf32>
    %101 = arith.cmpf oge, %99, %100 : vector<64x150xf32>
    %cst_79 = arith.constant 1.000000e-01 : f32
    %102 = vector.broadcast %cst_79 : f32 to vector<64x150xf32>
    %103 = arith.mulf %102, %99 : vector<64x150xf32>
    %104 = arith.select %101, %99, %103 : vector<64x150xi1>, vector<64x150xf32>
    %c0_80 = arith.constant 0 : index
    %c0_81 = arith.constant 0 : index
    %c0_82 = arith.constant 0 : index
    %105 = vector.load %arg16[%c0_80, %c0_81, %c0_82] : memref<1x64x150xf32, #tpu.memory_space<vmem>>, vector<1x64x150xf32>
    %106 = vector.shape_cast %105 : vector<1x64x150xf32> to vector<64x150xf32>
    %107 = vector.shape_cast %104 : vector<64x150xf32> to vector<1x64x150xf32>
    tpu.vector_store %arg16[%c0_80, %c0_81, %c0_82], %107 {strides = array<i32>} : memref<1x64x150xf32, #tpu.memory_space<vmem>>, vector<1x64x150xf32>,
    return
  }
  func.func @transform_0(%arg0: i32) -> i32 {
    %c0_i32 = arith.constant 0 : i32
    %c0_i32_0 = arith.constant 0 : i32
    return %c0_i32 : i32
  }
  func.func @transform_1(%arg0: i32) -> (i32, i32, i32) {
    %c0_i32 = arith.constant 0 : i32
    %c0_i32_0 = arith.constant 0 : i32
    %c0_i32_1 = arith.constant 0 : i32
    return %arg0, %c0_i32, %c0_i32_0 : i32, i32, i32
  }
  func.func @transform_2(%arg0: i32) -> (i32, i32) {
    %c0_i32 = arith.constant 0 : i32
    %c0_i32_0 = arith.constant 0 : i32
    %c0_i32_1 = arith.constant 0 : i32
    return %c0_i32, %c0_i32_0 : i32, i32
  }
  func.func @transform_3(%arg0: i32) -> (i32, i32) {
    %c0_i32 = arith.constant 0 : i32
    %c0_i32_0 = arith.constant 0 : i32
    %c0_i32_1 = arith.constant 0 : i32
    return %c0_i32, %c0_i32_0 : i32, i32
  }
  func.func @transform_4(%arg0: i32) -> (i32, i32) {
    %c0_i32 = arith.constant 0 : i32
    %c0_i32_0 = arith.constant 0 : i32
    %c0_i32_1 = arith.constant 0 : i32
    return %c0_i32, %c0_i32_0 : i32, i32
  }
  func.func @transform_5(%arg0: i32) -> (i32, i32, i32) {
    %c0_i32 = arith.constant 0 : i32
    %c0_i32_0 = arith.constant 0 : i32
    %c0_i32_1 = arith.constant 0 : i32
    %c0_i32_2 = arith.constant 0 : i32
    return %c0_i32, %c0_i32_0, %c0_i32_1 : i32, i32, i32
  }
  func.func @transform_6(%arg0: i32) -> (i32, i32, i32) {
    %c0_i32 = arith.constant 0 : i32
    %c0_i32_0 = arith.constant 0 : i32
    %c0_i32_1 = arith.constant 0 : i32
    %c0_i32_2 = arith.constant 0 : i32
    return %c0_i32, %c0_i32_0, %c0_i32_1 : i32, i32, i32
  }
  func.func @transform_7(%arg0: i32) -> (i32, i32, i32) {
    %c0_i32 = arith.constant 0 : i32
    %c0_i32_0 = arith.constant 0 : i32
    %c0_i32_1 = arith.constant 0 : i32
    %c0_i32_2 = arith.constant 0 : i32
    return %c0_i32, %c0_i32_0, %c0_i32_1 : i32, i32, i32
  }
  func.func @transform_8(%arg0: i32) -> (i32, i32) {
    %c0_i32 = arith.constant 0 : i32
    %c0_i32_0 = arith.constant 0 : i32
    %c0_i32_1 = arith.constant 0 : i32
    return %c0_i32, %c0_i32_0 : i32, i32
  }
  func.func @transform_9(%arg0: i32) -> (i32, i32) {
    %c0_i32 = arith.constant 0 : i32
    %c0_i32_0 = arith.constant 0 : i32
    %c0_i32_1 = arith.constant 0 : i32
    return %c0_i32, %c0_i32_0 : i32, i32
  }
  func.func @transform_10(%arg0: i32) -> (i32, i32) {
    %c0_i32 = arith.constant 0 : i32
    %c0_i32_0 = arith.constant 0 : i32
    %c0_i32_1 = arith.constant 0 : i32
    return %c0_i32, %c0_i32_0 : i32, i32
  }
  func.func @transform_11(%arg0: i32) -> (i32, i32) {
    %c0_i32 = arith.constant 0 : i32
    %c0_i32_0 = arith.constant 0 : i32
    %c0_i32_1 = arith.constant 0 : i32
    return %c0_i32, %c0_i32_0 : i32, i32
  }
  func.func @transform_12(%arg0: i32) -> (i32, i32) {
    %c0_i32 = arith.constant 0 : i32
    %c0_i32_0 = arith.constant 0 : i32
    %c0_i32_1 = arith.constant 0 : i32
    return %c0_i32, %c0_i32_0 : i32, i32
  }
  func.func @transform_13(%arg0: i32) -> (i32, i32) {
    %c0_i32 = arith.constant 0 : i32
    %c0_i32_0 = arith.constant 0 : i32
    %c0_i32_1 = arith.constant 0 : i32
    return %c0_i32, %c0_i32_0 : i32, i32
  }
  func.func @transform_14(%arg0: i32) -> (i32, i32) {
    %c0_i32 = arith.constant 0 : i32
    %c0_i32_0 = arith.constant 0 : i32
    %c0_i32_1 = arith.constant 0 : i32
    return %c0_i32, %c0_i32_0 : i32, i32
  }
  func.func @transform_15(%arg0: i32) -> (i32, i32, i32) {
    %c0_i32 = arith.constant 0 : i32
    %c0_i32_0 = arith.constant 0 : i32
    %c0_i32_1 = arith.constant 0 : i32
    return %arg0, %c0_i32, %c0_i32_0 : i32, i32, i32
  }
}

</mosaic_0001>

<bundles_post_ra>
// kernel: tpu_custom_call.1
= control target key start
LH: loop header
LB: loop body
LE: loop exit
PB: predicated region body
PF: predicated region fallthrough
CT: control target
= control target key end

     0   :  { %s7537_s0 = inlined_call_operand.vmem [shape: f32[2], index: 0, kind: input, shape index: {}]   ;;  %s7538_s1 = inlined_call_operand.vmem [shape: f32[2,32,150], index: 1, kind: input, shape index: {}]   ;;  %s7539_s2 = inlined_call_operand.vmem [shape: f32[32,150], index: 2, kind: input, shape index: {}]   ;;  %s7540_s3 = inlined_call_operand.vmem [shape: f32[64,32], index: 3, kind: input, shape index: {}]   ;;  %s7541_s4 = inlined_call_operand.vmem [shape: f32[64,1], index: 4, kind: input, shape index: {}]   ;;  %s7542_s5 = inlined_call_operand.vmem [shape: f32[2,150,150], index: 5, kind: input, shape index: {}]   ;;  %s7543_s6 = inlined_call_operand.vmem [shape: f32[3,150,150], index: 6, kind: input, shape index: {}]   ;;  %s7544_s7 = inlined_call_operand.vmem [shape: f32[6,64,32], index: 7, kind: input, shape index: {}]   ;;  %s7545_s8 = inlined_call_operand.vmem [shape: f32[64,1], index: 8, kind: input, shape index: {}]   ;;  %s7546_s9 = inlined_call_operand.vmem [shape: f32[64,32], index: 9, kind: input, shape index: {}]   ;;  %s7547_s10 = inlined_call_operand.vmem [shape: f32[64,1], index: 10, kind: input, shape index: {}]   ;;  %s7548_s11 = inlined_call_operand.vmem [shape: f32[64,64], index: 11, kind: input, shape index: {}]   ;;  %s7549_s12 = inlined_call_operand.vmem [shape: f32[64,1], index: 12, kind: input, shape index: {}]   ;;  %s7550_s13 = inlined_call_operand.vmem [shape: f32[64,64], index: 13, kind: input, shape index: {}]   ;;  %s7551_s14 = inlined_call_operand.vmem [shape: f32[64,1], index: 14, kind: input, shape index: {}]   ;;  %s7552_s15 = inlined_call_operand.hbm [shape: f32[2,64,150], index: 15, kind: output, shape index: {}]  }
   0x1   :  { %7569 = sst [smem:[#allocation77_spill]] %s7537_s0 }
   0x2   :  { %7570 = sst [smem:[#allocation78_spill]] %s7538_s1 }
   0x3   :  { %20 = vsyncpa [#allocation4], 0 }
   0x4   :  { %21 = vsyncpa [#allocation3], 0 }
   0x5   :  { %23 = vsyncpa [#allocation3 + $0x1], 0  ;;  %s4960_s18 = smov 0   ;;  %s4962_s19 = smov 0  }
   0x6   :  { %s4964_s20 = smov 0   ;;  %s4966_s21 = smov 0  }
   0x7 LB: > { %7571 = sst [smem:[#allocation8_spill]] %s4862_s18  ;;  %s4981_s22 = sadd.s32 4294967295, %s4874_s21   ;;  %s4874_s21 = sphi %s4966_s21, %s7734_s21   ;;  %s4870_s20 = sphi %s4964_s20, %s7739_s20   ;;  %s4866_s19 = sphi %s4962_s19, %s7738_s19   ;;  %s4862_s18 = sphi %s4960_s18, %s7737_s18  }
   0x8   : > { %7572 = sst [smem:[#allocation9_spill]] %s4870_s20  ;;  %s4055_s23 = sadd.s32 4294967294, %s4874_s21  }
   0x9   : > { %7573 = sst [smem:[#allocation10_spill]] %s4874_s21  ;;  %s4985_s24 = sadd.s32 1, %s4874_s21  }
   0xa   : > { %7574 = sst [smem:[#allocation11_spill]] %s4985_s24  ;;  %s356_s25 = sadd.s32 1, %s4870_s20 }
   0xb   : > { %s353_s26 = ssub.s32 %s4874_s21, %s4985_s24  ;;  %p366_p0 = scmp.ne.s32.totalorder %s4870_s20, %s4866_s19 }
   0xc   : > { %p354_p1 = scmp.eq.s32.totalorder %s353_s26, 0  ;;  %p367_p2 = scmp.eq.s32.totalorder %s4981_s22, 1 }
   0xd   : > { %p372_p3 = scmp.ne.s32.totalorder %s4866_s19, %s4862_s18  ;;  %p373_p4 = scmp.eq.s32.totalorder %s4055_s23, 1 }
   0xe   : > { %s4996_s27 = scalar_select %p354_p1, %s4870_s20, %s356_s25  }
   0xf   : > { %p4998_p5 = por %p367_p2, %p366_p0  ;;  %p5002_p6 = por %p373_p4, %p372_p3 }
  0x10   : > { %7575 = sst [smem:[#allocation12_spill]] %s4996_s27  ;;  %p4056_p7 = scmp.ge.s32.totalorder %s4874_s21, 1 }
  0x11   : > { %s7577_s29 = scalar_select %p5002_p6, 1, 0 }
  0x12   : > { %p380_p8 = scmp.lt.s32.totalorder %s4874_s21, 3  ;;  %p4506_p9 = scmp.eq.s32.totalorder %s4981_s22, 0 }
  0x13   : > { %7578 = sst [smem:[#allocation13_spill]] %s7577_s29  ;;  %s4876_s23 = smov [#allocation2]  }
  0x14   : > { %p381_p10 = pnand %p4056_p7, %p380_p8  ;;  %s7579_s0 = sld [smem:[#allocation77_spill]] }
  0x16   : > { %p4498_p11 = pneg %p381_p10 }
  0x17   : > { %452 = sbr.rel (%p381_p10) target bundleno = 2466 (0x9a2), region = 80 }
  0x18   : > { %p4499_p12 = pnand %p4506_p9, %p4498_p11 }
  0x1a   : > { %s392_s17 = sshll.u32 %s7579_s0, 4  ;;  %s393_s17 = int_to_ptr.vmem [resolvable:$true] %s392_s17 }
  0x1b   : > { %4501 = dma.vmem_to_smem (!%p4499_p12), %s393_s17, 16, %s4876_s23, [#allocation4]  }
  0x1c   : > { %4853 = dma.done.wait (%p4506_p9), [#allocation4], 16  }
  0x1d   : > { %4855 = vsyncadd (%p4506_p9), [#allocation4], 4294967280 }
  0x1e   : > { %459 = sfence }
  0x1f   : > { %p502_p13 = scmp.lt.s32.totalorder %s4981_s22, 1  ;;  %v4877_v0 = vmov 0   ;;  %v539_v1 = vld [vmem:[%s7541_s4] sm:$0xff]  ;;  %v521_v2 = vld [vmem:[%s7539_s2 + $0x30] sm:$0xff]  ;;  %v522_v3 = vld [vmem:[%s7539_s2 + $0x38] sm:$0xff]  ;;  %s7580_s1 = sld [smem:[#allocation78_spill]] }
  0x20   : > { %4546 = vset.pattern.permute.xlu0 %v4877_v0  ;;  %4547 = vset.pattern.permute.xlu1 %v4877_v0  ;;  %v519_v4 = vld [vmem:[%s7539_s2 + $0x20] sm:$0xff]  ;;  %v520_v5 = vld [vmem:[%s7539_s2 + $0x28] sm:$0xff]  ;;  %v517_v6 = vld [vmem:[%s7539_s2 + $0x10] sm:$0xff]  ;;  %vm587_vm0 = vcmask 261120   ;;  %vm984_vm1 = vcmask 130048   ;;  %s1266_s27 = sld [smem:[#allocation2]] }
  0x21   : > { %s503_s25 = scalar_select %p502_p13, %s4981_s22, 1  ;;  %549 = vperm.xlu0 %4546, %v539_v1   ;;  %v518_v7 = vld [vmem:[%s7539_s2 + $0x18] sm:$0xff]  ;;  %v515_v11 = vld [vmem:[%s7539_s2] sm:$0xff]  ;;  %v516_v21 = vld [vmem:[%s7539_s2 + $0x8] sm:$0xff]  ;;  %vm1395_vm2 = vcmask 1045504   ;;  %vm1382_vm3 = vcmask 179200  }
  0x22   : > { %v540_v24 = vld [vmem:[%s7541_s4 + $0x8] sm:$0xff]  ;;  %v531_v27 = vld [vmem:[%s7540_s3] sm:$0xff]  ;;  %v533_v31 = vld [vmem:[%s7540_s3 + $0x10] sm:$0xff]  ;;  %vm3568_vm12 = vcmask 523264   ;;  %s499_s29 = sand.u32 1, %s4866_s19   ;;  %s4483_s17 = sshll.u32 %s4981_s22, 7 }
  0x23   : > { %s4482_s16 = sshll.u32 %s503_s25, 6  ;;  %v532_v28 = vld [vmem:[%s7540_s3 + $0x8] sm:$0xff]  ;;  %v537_v32 = vld [vmem:[%s7540_s3 + $0x30] sm:$0xff]  ;;  %v543_v33 = vld [vmem:[%s7541_s4 + $0x20] sm:$0xff]  ;;  %s4304_s25 = sld [smem:[#allocation2 + $0x1]] }
  0x24   : > { %v536_v29 = vld [vmem:[%s7540_s3 + $0x28] sm:$0xff]  ;;  %v534_v34 = vld [vmem:[%s7540_s3 + $0x18] sm:$0xff]  ;;  %v541_v36 = vld [vmem:[%s7541_s4 + $0x10] sm:$0xff]  ;;  %s4061_s30 = sshll.u32 %s499_s29, 7  ;;  %s3966_s22 = scalar_lea.sflag [#allocation3], %s499_s29 }
  0x25   : > { %s5031_s21 = scalar_lea.vmem %s7580_s1, %s4482_s16  ;;  %v544_v30 = vld [vmem:[%s7541_s4 + $0x28] sm:$0xff]  ;;  %v538_v35 = vld [vmem:[%s7540_s3 + $0x38] sm:$0xff]  ;;  %v535_v37 = vld [vmem:[%s7540_s3 + $0x20] sm:$0xff]  ;;  %s7458_s16 = scalar_lea.vmem [#allocation5], %s4061_s30 }
  0x26   : > { %v513_v8 = vld [vmem:[%s5031_s21 + $0x30] sm:$0xff]  ;;  %v514_v9 = vld [vmem:[%s5031_s21 + $0x38] sm:$0xff]  ;;  %v5045_v10 = vld [vmem:[%s5031_s21 + $0x20] sm:$0xff]  ;;  %574 = vperm.xlu1 %4547, %v544_v30   ;;  %s4828_s30 = scalar_lea.hbm %s7552_s15, 256 }
  0x27   : > { %v529_v12 = vadd.f32 %v521_v2, %v513_v8  ;;  %v530_v13 = vadd.f32 %v522_v3, %v514_v9  ;;  %v527_v14 = vadd.f32 %v519_v4, %v5045_v10  ;;  %v5052_v15 = vld [vmem:[%s5031_s21 + $0x28] sm:$0xff]  ;;  %v5055_v16 = vld [vmem:[%s5031_s21 + $0x10] sm:$0xff]  ;;  %v5058_v17 = vld [vmem:[%s5031_s21 + $0x18] sm:$0xff] }
  0x28   : > { %v528_v18 = vadd.f32 %v520_v5, %v5052_v15  ;;  %v5062_v19 = vld [vmem:[%s5031_s21] sm:$0xff]  ;;  %v5065_v20 = vld [vmem:[%s5031_s21 + $0x8] sm:$0xff]  ;;  %v525_v22 = vadd.f32 %v517_v6, %v5055_v16  ;;  %v526_v23 = vadd.f32 %v518_v7, %v5058_v17  ;;  %v546_v38 = vld [vmem:[%s7541_s4 + $0x38] sm:$0xff] }
  0x29   : > { %624 = vmatpush.msra.mxu0 %v529_v12  ;;  %665 = vmatpush.msra.mxu1 %v530_v13  ;;  %v523_v25 = vadd.f32 %v515_v11, %v5062_v19  ;;  %v524_v26 = vadd.f32 %v516_v21, %v5065_v20  ;;  %v545_v39 = vld [vmem:[%s7541_s4 + $0x30] sm:$0xff] }
  0x2a   : > { %4484 = vmatpush.msra.mxu2 %v529_v12  ;;  %4488 = vmatpush.msra.mxu3 %v530_v13  ;;  %v542_v13 = vld [vmem:[%s7541_s4 + $0x18] sm:$0xff] }
  0x2b   : > { %625 = vmatpush.msra.mxu0 %v527_v14  ;;  %666 = vmatpush.msra.mxu1 %v528_v18 }
  0x2c   : > { %554 = vperm.xlu0 %4546, %v540_v24   ;;  %4485 = vmatpush.msra.mxu2 %v527_v14 }
  0x2d   : > { %626 = vmatpush.msra.mxu0 %v525_v22  ;;  %667 = vmatpush.msra.mxu1 %v526_v23 }
  0x2e   : > { %4489 = vmatpush.msra.mxu3 %v528_v18  ;;  %4486 = vmatpush.msra.mxu2 %v525_v22 }
  0x2f   : > { %627 = vmatpush.msra.mxu0 %v523_v25  ;;  %668 = vmatpush.msra.mxu1 %v524_v26 }
  0x30   : > { %4064 = vmatmul.msk.f32.vlgmr.msra.gmra.mxu0 %vm587_vm0, %v531_v27  ;;  %4072 = vmatmul.msk.f32.vlgmr.msra.gmra.mxu1 %vm587_vm0, %v531_v27 }
  0x31   : > { %4490 = vmatpush.msra.mxu3 %v526_v23  ;;  %4487 = vmatpush.msra.mxu2 %v523_v25 }
  0x32   : > { %4069 = vmatmul.msk.f32.vlgmr.msra.gmra.mxu2 %vm587_vm0, %v536_v29  ;;  %569 = vperm.xlu1 %4547, %v543_v33  }
  0x33   : > { %786 = vmatpush.msrb.mxu2 %v513_v8  ;;  %4491 = vmatpush.msra.mxu3 %v524_v26 }
  0x34   : > { %4077 = vmatmul.msk.f32.vlgmr.msra.gmra.mxu3 %vm587_vm0, %v536_v29 }
  0x35   : > { %827 = vmatpush.msrb.mxu3 %v514_v9  ;;  %787 = vmatpush.msrb.mxu2 %v5045_v10 }
  0x37   : > { %828 = vmatpush.msrb.mxu3 %v5052_v15  ;;  %788 = vmatpush.msrb.mxu2 %v5055_v16 }
  0x38   : > { %4065 = vmatmul.msk.f32.gmra.mxu0 %vm587_vm0, %v532_v28  ;;  %4073 = vmatmul.msk.f32.gmra.mxu1 %vm587_vm0, %v532_v28 }
  0x39   : > { %829 = vmatpush.msrb.mxu3 %v5058_v17  ;;  %789 = vmatpush.msrb.mxu2 %v5062_v19 }
  0x3a   : > { %4070 = vmatmul.msk.f32.gmra.mxu2 %vm587_vm0, %v537_v32  ;;  %559 = vperm.xlu1 %4547, %v541_v36  }
  0x3b   : > { %830 = vmatpush.msrb.mxu3 %v5065_v20 }
  0x3c   : > { %4078 = vmatmul.msk.f32.gmra.mxu3 %vm587_vm0, %v537_v32 }
  0x40   : > { %4066 = vmatmul.msk.f32.gmra.mxu0 %vm587_vm0, %v533_v31  ;;  %4074 = vmatmul.msk.f32.gmra.mxu1 %vm587_vm0, %v533_v31 }
  0x42   : > { %4071 = vmatmul.msk.f32.gmra.mxu2 %vm587_vm0, %v538_v35  ;;  %584 = vperm.xlu1 %4547, %v546_v38  }
  0x44   : > { %4079 = vmatmul.msk.f32.gmra.mxu3 %vm587_vm0, %v538_v35 }
  0x48   : > { %4067 = vmatmul.msk.f32.gmra.mxu0 %vm587_vm0, %v534_v34  ;;  %4075 = vmatmul.msk.f32.gmra.mxu1 %vm587_vm0, %v534_v34 }
  0x4a   : > { %579 = vperm.xlu1 %4547, %v545_v39  }
  0x50   : > { %4068 = vmatmul.msk.f32.gmra.mxu0 %vm587_vm0, %v535_v37  ;;  %4076 = vmatmul.msk.f32.gmra.mxu1 %vm587_vm0, %v535_v37 }
  0x93   : > { %v550_v40 = vpop.permute.xlu0 %549 }
  0x98   : > { %v575_v50 = vpop.permute.xlu1 %574 }
  0x9e   : > { %v555_v45 = vpop.permute.xlu0 %554 }
  0xa4   : > { %v570_v55 = vpop.permute.xlu1 %569 }
  0xac   : > { %v560_v56 = vpop.permute.xlu1 %559 }
  0xad   : > { %v629_v41 = vpop.f32.mrf.mxu0  ;;  %v670_v42 = vpop.f32.mrf.mxu1 }
  0xae   : > { %v671_v43 = vadd.f32 %v670_v42, %v550_v40  ;;  %v630_v44 = vadd.f32 %v629_v41, %v550_v40 }
  0xb0   : > { %952 = vxpose.xlu0.b32.start [1/2] (short) (narrow) %v671_v43, 24  ;;  %920 = vxpose.xlu2.b32.start [1/2] (short) %v630_v44, 128 }
  0xb5   : > { %v632_v46 = vpop.f32.mrf.mxu0  ;;  %v673_v47 = vpop.f32.mrf.mxu1 }
  0xb6   : > { %v674_v48 = vadd.f32 %v673_v47, %v555_v45  ;;  %v633_v49 = vadd.f32 %v632_v46, %v555_v45  ;;  %v644_v51 = vpop.f32.mrf.mxu2  ;;  %v694_v46 = vld [vmem:[%s7546_s9] sm:$0xff] }
  0xb7   : > { %v685_v52 = vpop.f32.mrf.mxu3  ;;  %v645_v53 = vadd.f32 %v644_v51, %v575_v50  ;;  %4080 = vmatmul.msk.f32.vlgmr.msrb.gmra.mxu2 %vm587_vm0, %v694_v46  ;;  %4088 = vmatmul.msk.f32.vlgmr.msrb.gmra.mxu3 %vm587_vm0, %v694_v46  ;;  %v5291_v46 = vstv %s1266_s27 }
  0xb8   : > { %953 = vxpose.xlu0.b32.end [2/2] (short) (narrow) %v674_v48, 24  ;;  %921 = vxpose.xlu2.b32.end [2/2] (short) %v633_v49, 128  ;;  %v686_v54 = vadd.f32 %v685_v52, %v575_v50  ;;  %v695_v49 = vld [vmem:[%s7546_s9 + $0x8] sm:$0xff]  ;;  %v696_v52 = vld [vmem:[%s7546_s9 + $0x10] sm:$0xff] }
  0xb9   : > { %1056 = vmatpush.msrb.mxu0 %v645_v53 }
  0xba   : > { %1130 = vmatpush.msrb.mxu1 %v686_v54 }
  0xbd   : > { %v635_v57 = vpop.f32.mrf.mxu0  ;;  %v676_v58 = vpop.f32.mrf.mxu1 }
  0xbe   : > { %v636_v59 = vadd.f32 %v635_v57, %v560_v56  ;;  %v677_v60 = vadd.f32 %v676_v58, %v560_v56  ;;  %v705_v56 = vld [vmem:[%s7547_s10 + $0x18] sm:$0xff] }
  0xbf   : > { %4081 = vmatmul.msk.f32.gmra.mxu2 %vm587_vm0, %v695_v49  ;;  %4089 = vmatmul.msk.f32.gmra.mxu3 %vm587_vm0, %v695_v49  ;;  %v1336_v49 = vld [vmem:[%s7542_s5 + $0xf0] sm:$0xff] }
  0xc0   : > { %2243 = vxpose.xlu1.b32.start [1/2] (short) %v636_v59, 128  ;;  %v698_v59 = vld [vmem:[%s7546_s9 + $0x20] sm:$0xff] }
  0xc5   : > { %v5138_v61 = vpop.f32.mrf.mxu0  ;;  %v5140_v62 = vpop.f32.mrf.mxu1 }
  0xc7   : > { %4082 = vmatmul.msk.f32.gmra.mxu2 %vm587_vm0, %v696_v52  ;;  %4090 = vmatmul.msk.f32.gmra.mxu3 %vm587_vm0, %v696_v52 }
  0xc8   : > { %2275 = vxpose.xlu0.b32.start [1/2] (short) (narrow) %v677_v60, 24  ;;  %v704_v60 = vld [vmem:[%s7547_s10 + $0x10] sm:$0xff] }
  0xcd   : > { %v641_v63 = vpop.f32.mrf.mxu0  ;;  %v682_v1 = vpop.f32.mrf.mxu1 }
  0xce   : > { %v683_v2 = vadd.f32 %v682_v1, %v570_v55  ;;  %v642_v3 = vadd.f32 %v641_v63, %v570_v55  ;;  %v697_v55 = vld [vmem:[%s7546_s9 + $0x18] sm:$0xff]  ;;  %v699_v63 = vld [vmem:[%s7546_s9 + $0x28] sm:$0xff] }
  0xcf   : > { %4083 = vmatmul.msk.f32.gmra.mxu2 %vm587_vm0, %v697_v55  ;;  %4091 = vmatmul.msk.f32.gmra.mxu3 %vm587_vm0, %v697_v55 }
  0xd0   : > { %1131 = vmatpush.msrb.mxu1 %v683_v2  ;;  %1057 = vmatpush.msrb.mxu0 %v642_v3  ;;  %v703_v3 = vld [vmem:[%s7547_s10 + $0x8] sm:$0xff] }
  0xd7   : > { %4084 = vmatmul.msk.f32.gmra.mxu2 %vm587_vm0, %v698_v59  ;;  %4092 = vmatmul.msk.f32.gmra.mxu3 %vm587_vm0, %v698_v59 }
  0xdf   : > { %4085 = vmatmul.msk.f32.gmra.mxu2 %vm587_vm0, %v699_v63  ;;  %4093 = vmatmul.msk.f32.gmra.mxu3 %vm587_vm0, %v699_v63  ;;  %v1332_v63 = vld [vmem:[%s7542_s5 + $0xd0] sm:$0xff] }
 0x11a   : > { %4548 = vset.pattern.permute.xlu2 %v4877_v0 }
 0x149   : > { %v936_v4 = vpop.trf.xlu2 }
 0x14a   : > { %4096 = vmatmul.msk.f32.vlgmr.msrb.gmra.mxu0 %vm984_vm1, %v936_v4  ;;  %4115 = vmatmul.msk.f32.vlgmr.msrb.gmra.mxu1 %vm984_vm1, %v936_v4  ;;  %v700_v4 = vld [vmem:[%s7546_s9 + $0x30] sm:$0xff] }
 0x14b   : > { %4086 = vmatmul.msk.f32.gmra.mxu2 %vm587_vm0, %v700_v4  ;;  %4094 = vmatmul.msk.f32.gmra.mxu3 %vm587_vm0, %v700_v4 }
 0x151   : > { %v937_v5 = vpop.trf.xlu2 }
 0x152   : > { %4097 = vmatmul.msk.f32.gmra.mxu0 %vm984_vm1, %v937_v5  ;;  %4116 = vmatmul.msk.f32.gmra.mxu1 %vm984_vm1, %v937_v5  ;;  %v702_v5 = vld [vmem:[%s7547_s10] sm:$0xff] }
 0x154   : > { %v968_v26 = vpop.trf.xlu0 }
 0x159   : > { %v938_v6 = vpop.trf.xlu2 }
 0x15a   : > { %4098 = vmatmul.msk.f32.gmra.mxu0 %vm984_vm1, %v938_v6  ;;  %4117 = vmatmul.msk.f32.gmra.mxu1 %vm984_vm1, %v938_v6 }
 0x15c   : > { %v969_v29 = vpop.trf.xlu0 }
 0x161   : > { %v939_v0 = vpop.trf.xlu2 }
 0x162   : > { %4099 = vmatmul.msk.f32.gmra.mxu0 %vm984_vm1, %v939_v0  ;;  %4118 = vmatmul.msk.f32.gmra.mxu1 %vm984_vm1, %v939_v0 }
 0x164   : > { %v970_v32 = vpop.trf.xlu0 }
 0x169   : > { %v940_v7 = vpop.trf.xlu2 }
 0x16a   : > { %4100 = vmatmul.msk.f32.gmra.mxu0 %vm984_vm1, %v940_v7  ;;  %4119 = vmatmul.msk.f32.gmra.mxu1 %vm984_vm1, %v940_v7  ;;  %v701_v7 = vld [vmem:[%s7546_s9 + $0x38] sm:$0xff] }
 0x16b   : > { %4087 = vmatmul.msk.f32.gmra.mxu2 %vm587_vm0, %v701_v7  ;;  %4095 = vmatmul.msk.f32.gmra.mxu3 %vm587_vm0, %v701_v7 }
 0x171   : > { %v941_v8 = vpop.trf.xlu2 }
 0x172   : > { %4101 = vmatmul.msk.f32.gmra.mxu0 %vm984_vm1, %v941_v8  ;;  %4120 = vmatmul.msk.f32.gmra.mxu1 %vm984_vm1, %v941_v8  ;;  %v856_v8 = vld [vmem:[%s7545_s8] sm:$0xff] }
 0x179   : > { %v942_v9 = vpop.trf.xlu2 }
 0x17a   : > { %4102 = vmatmul.msk.f32.gmra.mxu0 %vm984_vm1, %v942_v9  ;;  %4121 = vmatmul.msk.f32.gmra.mxu1 %vm984_vm1, %v942_v9 }
 0x181   : > { %v943_v11 = vpop.trf.xlu2 }
 0x182   : > { %4103 = vmatmul.msk.f32.gmra.mxu0 %vm984_vm1, %v943_v11  ;;  %4122 = vmatmul.msk.f32.gmra.mxu1 %vm984_vm1, %v943_v11 }
 0x189   : > { %v944_v12 = vpop.trf.xlu2 }
 0x18a   : > { %4104 = vmatmul.msk.f32.gmra.mxu0 %vm984_vm1, %v944_v12  ;;  %4123 = vmatmul.msk.f32.gmra.mxu1 %vm984_vm1, %v944_v12 }
 0x191   : > { %564 = vperm.xlu2 %4548, %v542_v13   ;;  %v945_v14 = vpop.trf.xlu2 }
 0x192   : > { %4105 = vmatmul.msk.f32.gmra.mxu0 %vm984_vm1, %v945_v14  ;;  %4124 = vmatmul.msk.f32.gmra.mxu1 %vm984_vm1, %v945_v14 }
 0x199   : > { %v946_v18 = vpop.trf.xlu2  ;;  %727 = vperm.xlu2 %4548, %v705_v56  }
 0x19a   : > { %4106 = vmatmul.msk.f32.gmra.mxu0 %vm984_vm1, %v946_v18  ;;  %4125 = vmatmul.msk.f32.gmra.mxu1 %vm984_vm1, %v946_v18 }
 0x1a1   : > { %v947_v21 = vpop.trf.xlu2  ;;  %722 = vperm.xlu2 %4548, %v704_v60  }
 0x1a2   : > { %4107 = vmatmul.msk.f32.gmra.mxu0 %vm984_vm1, %v947_v21  ;;  %4126 = vmatmul.msk.f32.gmra.mxu1 %vm984_vm1, %v947_v21 }
 0x1a9   : > { %v948_v22 = vpop.trf.xlu2  ;;  %717 = vperm.xlu2 %4548, %v703_v3  }
 0x1aa   : > { %4108 = vmatmul.msk.f32.gmra.mxu0 %vm984_vm1, %v948_v22  ;;  %4127 = vmatmul.msk.f32.gmra.mxu1 %vm984_vm1, %v948_v22 }
 0x1b1   : > { %v949_v23 = vpop.trf.xlu2  ;;  %712 = vperm.xlu2 %4548, %v702_v5   ;;  %v1330_v5 = vld [vmem:[%s7542_s5 + $0xc0] sm:$0xff] }
 0x1b2   : > { %4109 = vmatmul.msk.f32.gmra.mxu0 %vm984_vm1, %v949_v23  ;;  %4128 = vmatmul.msk.f32.gmra.mxu1 %vm984_vm1, %v949_v23 }
 0x1b9   : > { %v950_v24 = vpop.trf.xlu2  ;;  %866 = vperm.xlu2 %4548, %v856_v8  }
 0x1ba   : > { %4110 = vmatmul.msk.f32.gmra.mxu0 %vm984_vm1, %v950_v24  ;;  %4129 = vmatmul.msk.f32.gmra.mxu1 %vm984_vm1, %v950_v24 }
 0x1c1   : > { %v951_v25 = vpop.trf.xlu2 }
 0x1c2   : > { %4111 = vmatmul.msk.f32.gmra.mxu0 %vm984_vm1, %v951_v25  ;;  %4130 = vmatmul.msk.f32.gmra.mxu1 %vm984_vm1, %v951_v25 }
 0x1c7   : > { %v5178_v27 = vpop.f32.mrf.mxu0  ;;  %v5180_v28 = vpop.f32.mrf.mxu1 }
 0x1ca   : > { %4112 = vmatmul.msk.f32.gmra.mxu0 %vm984_vm1, %v968_v26  ;;  %4131 = vmatmul.msk.f32.gmra.mxu1 %vm984_vm1, %v968_v26 }
 0x1cf   : > { %v5184_v30 = vpop.f32.mrf.mxu0  ;;  %v5186_v31 = vpop.f32.mrf.mxu1 }
 0x1d2   : > { %4113 = vmatmul.msk.f32.gmra.mxu0 %vm984_vm1, %v969_v29  ;;  %4132 = vmatmul.msk.f32.gmra.mxu1 %vm984_vm1, %v969_v29 }
 0x1d7   : > { %v5190_v33 = vpop.f32.mrf.mxu0  ;;  %v5192_v34 = vpop.f32.mrf.mxu1 }
 0x1da   : > { %4114 = vmatmul.msk.f32.gmra.mxu0 %vm984_vm1, %v970_v32  ;;  %4133 = vmatmul.msk.f32.gmra.mxu1 %vm984_vm1, %v970_v32 }
 0x1df   : > { %v5196_v35 = vpop.f32.mrf.mxu0  ;;  %v5198_v36 = vpop.f32.mrf.mxu1 }
 0x1e7   : > { %v5200_v37 = vpop.f32.mrf.mxu0  ;;  %v5202_v38 = vpop.f32.mrf.mxu1 }
 0x1eb   : > { %v565_v39 = vpop.permute.xlu2 %564 }
 0x1ec   : > { %v639_v40 = vadd.f32 %v5138_v61, %v565_v39  ;;  %v680_v41 = vadd.f32 %v5140_v62, %v565_v39 }
 0x1ee   : > { %2276 = vxpose.xlu0.b32.end [2/2] (short) (narrow) %v680_v41, 24  ;;  %2244 = vxpose.xlu1.b32.end [2/2] (short) %v639_v40, 128 }
 0x1ef   : > { %v5206_v42 = vpop.f32.mrf.mxu0  ;;  %v5208_v43 = vpop.f32.mrf.mxu1 }
 0x1f0   : > { %v1200_v4 = vmul.f32 0.0625, %v5206_v42  ;;  %v1192_v42 = vmul.f32 0.0625, %v5184_v30 }
 0x1f7   : > { %v5210_v44 = vpop.f32.mrf.mxu0  ;;  %v5212_v45 = vpop.f32.mrf.mxu1 }
 0x1ff   : > { %v5219_v47 = vpop.f32.mrf.mxu0  ;;  %v5221_v48 = vpop.f32.mrf.mxu1 }
 0x207   : > { %v1083_v50 = vpop.f32.mrf.mxu0  ;;  %v5228_v51 = vpop.f32.mrf.mxu1 }
 0x208   : > { %v1206_v41 = vmul.f32 0.0625, %v1083_v50 }
 0x20f   : > { %v1086_v53 = vpop.f32.mrf.mxu0  ;;  %v5235_v54 = vpop.f32.mrf.mxu1 }
 0x210   : > { %v1208_v26 = vmul.f32 0.0625, %v1086_v53  ;;  %v1204_v53 = vmul.f32 0.0625, %v5219_v47 }
 0x217   : > { %v1089_v57 = vpop.f32.mrf.mxu0  ;;  %v5245_v58 = vpop.f32.mrf.mxu1 }
 0x218   : > { %v1210_v24 = vmul.f32 0.0625, %v1089_v57  ;;  %v1334_v57 = vld [vmem:[%s7542_s5 + $0xe0] sm:$0xff] }
 0x21f   : > { %v1092_v61 = vpop.f32.mrf.mxu0  ;;  %v5255_v62 = vpop.f32.mrf.mxu1 }
 0x220   : > { %v1212_v23 = vmul.f32 0.0625, %v1092_v61  ;;  %v1202_v61 = vmul.f32 0.0625, %v5210_v44 }
 0x227   : > { %v1095_v1 = vpop.f32.mrf.mxu0  ;;  %v5262_v2 = vpop.f32.mrf.mxu1 }
 0x228   : > { %v1214_v21 = vmul.f32 0.0625, %v1095_v1 }
 0x22f   : > { %v1098_v6 = vpop.f32.mrf.mxu0  ;;  %v5275_v0 = vpop.f32.mrf.mxu1 }
 0x230   : > { %v1216_v13 = vmul.f32 0.0625, %v1098_v6 }
 0x237   : > { %v1101_v9 = vpop.f32.mrf.mxu0  ;;  %v5285_v11 = vpop.f32.mrf.mxu1 }
 0x238   : > { %v1218_v12 = vmul.f32 0.0625, %v1101_v9 }
 0x23a   : > { %4549 = vtanh.f32 %v1218_v12  ;;  %v1198_v12 = vmul.f32 0.0625, %v5200_v37  ;;  %v1194_v37 = vmul.f32 0.0625, %v5190_v33  ;;  %v1322_v33 = vld [vmem:[%s7542_s5 + $0x80] sm:$0xff] }
 0x23b   : > { %4551 = vtanh.f32 %v1216_v13  ;;  %v1328_v13 = vld [vmem:[%s7542_s5 + $0xb0] sm:$0xff] }
 0x23f   : > { %v1104_v14 = vpop.f32.mrf.mxu0  ;;  %v5287_v18 = vpop.f32.mrf.mxu1 }
 0x240   : > { %v1220_v22 = vmul.f32 0.0625, %v1104_v14  ;;  %v4550_v25 = vpop.eup %4549 }
 0x241   : > { %v4552_v29 = vpop.eup %4551  ;;  %v1296_v55 = vmul.f32 %v4550_v25, %v5291_v46 }
 0x242   : > { %4553 = vtanh.f32 %v1220_v22  ;;  %v1294_v59 = vmul.f32 %v4552_v29, %v5291_v46 }
 0x243   : > { %4555 = vtanh.f32 %v1214_v21  ;;  %v1372_v1 = vadd.f32 %v1334_v57, %v1296_v55 }
 0x244   : > { %4557 = vtanh.f32 %v1212_v23  ;;  %v1370_v7 = vadd.f32 %v1332_v63, %v1294_v59  ;;  %v1196_v23 = vmul.f32 0.0625, %v5196_v35 }
 0x245   : > { %4559 = vtanh.f32 %v1210_v24  ;;  %v1326_v24 = vld [vmem:[%s7542_s5 + $0xa0] sm:$0xff] }
 0x246   : > { %4561 = vtanh.f32 %v1208_v26 }
 0x247   : > { %v1107_v32 = vpop.f32.mrf.mxu0  ;;  %v5289_v39 = vpop.f32.mrf.mxu1  ;;  %4563 = vtanh.f32 %v1206_v41 }
 0x248   : > { %v4554_v40 = vpop.eup %4553  ;;  %4565 = vtanh.f32 %v1204_v53  ;;  %v1222_v35 = vmul.f32 0.0625, %v1107_v32  ;;  %v1190_v32 = vmul.f32 0.0625, %v5178_v27  ;;  %v1318_v27 = vld [vmem:[%s7542_s5 + $0x60] sm:$0xff] }
 0x249   : > { %v1298_v52 = vmul.f32 %v4554_v40, %v5291_v46  ;;  %v4556_v56 = vpop.eup %4555  ;;  %4567 = vtanh.f32 %v1202_v61  ;;  %v1324_v40 = vld [vmem:[%s7542_s5 + $0x90] sm:$0xff] }
 0x24a   : > { %v4558_v60 = vpop.eup %4557  ;;  %v1292_v47 = vmul.f32 %v4556_v56, %v5291_v46  ;;  %4569 = vtanh.f32 %v1200_v4  ;;  %v1320_v61 = vld [vmem:[%s7542_s5 + $0x70] sm:$0xff]  ;;  %v1221_v4 = vmul.f32 0.0625, %v5287_v18 }
 0x24b   : > { %v1374_v50 = vadd.f32 %v1336_v49, %v1298_v52  ;;  %v4560_v3 = vpop.eup %4559  ;;  %v1290_v8 = vmul.f32 %v4558_v60, %v5291_v46  ;;  %4571 = vtanh.f32 %v1198_v12  ;;  %v1316_v18 = vld [vmem:[%s7542_s5 + $0x50] sm:$0xff] }
 0x24c   : > { %v4562_v9 = vpop.eup %4561  ;;  %v1368_v14 = vadd.f32 %v1330_v5, %v1292_v47  ;;  %v1288_v21 = vmul.f32 %v4560_v3, %v5291_v46  ;;  %4573 = vtanh.f32 %v1192_v42 }
 0x24d   : > { %1402 = vmatpush.msra.mxu2 %v1374_v50  ;;  %v4564_v22 = vpop.eup %4563  ;;  %v1366_v25 = vadd.f32 %v1328_v13, %v1290_v8  ;;  %v1286_v26 = vmul.f32 %v4562_v9, %v5291_v46  ;;  %4575 = vtanh.f32 %v1196_v23  ;;  %v1219_v9 = vmul.f32 0.0625, %v5285_v11 }
 0x24e   : > { %v4566_v29 = vpop.eup %4565  ;;  %v1364_v41 = vadd.f32 %v1326_v24, %v1288_v21  ;;  %v1284_v49 = vmul.f32 %v4564_v22, %v5291_v46  ;;  %4577 = vtanh.f32 %v1194_v37  ;;  %v1314_v21 = vld [vmem:[%s7542_s5 + $0x40] sm:$0xff]  ;;  %v1215_v37 = vmul.f32 0.0625, %v5262_v2 }
 0x24f   : > { %v1110_v6 = vpop.f32.mrf.mxu0  ;;  %1403 = vmatpush.msra.mxu2 %v1372_v1  ;;  %v1184_v44 = vpop.f32.mrf.mxu1  ;;  %v1362_v53 = vadd.f32 %v1324_v40, %v1286_v26  ;;  %v1282_v57 = vmul.f32 %v4566_v29, %v5291_v46  ;;  %v709_v40 = vld [vmem:[%s7547_s10 + $0x38] sm:$0xff] }
 0x250   : > { %v1224_v30 = vmul.f32 0.0625, %v1110_v6  ;;  %v4568_v52 = vpop.eup %4567  ;;  %v1225_v63 = vmul.f32 0.0625, %v1184_v44  ;;  %v1360_v1 = vadd.f32 %v1322_v33, %v1284_v49  ;;  %v1223_v6 = vmul.f32 0.0625, %v5289_v39  ;;  %v1340_v33 = vld [vmem:[%s7542_s5 + $0x110] sm:$0xff] }
 0x251   : > { %1404 = vmatpush.msra.mxu2 %v1370_v7  ;;  %v4570_v50 = vpop.eup %4569  ;;  %v1280_v47 = vmul.f32 %v4568_v52, %v5291_v46  ;;  %v1358_v7 = vadd.f32 %v1320_v61, %v1282_v57  ;;  %v1213_v49 = vmul.f32 0.0625, %v5255_v62  ;;  %v1310_v52 = vld [vmem:[%s7542_s5 + $0x20] sm:$0xff]  ;;  %v1211_v62 = vmul.f32 0.0625, %v5245_v58 }
 0x252   : > { %4579 = vtanh.f32 %v1224_v30  ;;  %v4572_v3 = vpop.eup %4571  ;;  %v1278_v44 = vmul.f32 %v4570_v50, %v5291_v46  ;;  %v1338_v61 = vld [vmem:[%s7542_s5 + $0x100] sm:$0xff] }
 0x253   : > { %1405 = vmatpush.msra.mxu2 %v1368_v14  ;;  %4581 = vtanh.f32 %v1222_v35  ;;  %v4574_v5 = vpop.eup %4573  ;;  %v1356_v13 = vadd.f32 %v1318_v27, %v1280_v47  ;;  %v1276_v42 = vmul.f32 %v4572_v3, %v5291_v46  ;;  %v1217_v14 = vmul.f32 0.0625, %v5275_v0  ;;  %v1312_v0 = vld [vmem:[%s7542_s5 + $0x30] sm:$0xff] }
 0x254   : > { %v4576_v8 = vpop.eup %4575  ;;  %v1354_v11 = vadd.f32 %v1316_v18, %v1278_v44  ;;  %v1270_v57 = vmul.f32 %v4574_v5, %v5291_v46  ;;  %v1209_v27 = vmul.f32 0.0625, %v5235_v54  ;;  %v1306_v5 = vld [vmem:[%s7542_s5] sm:$0xff]  ;;  %v1341_v18 = vld [vmem:[%s7542_s5 + $0x118] sm:$0xff] }
 0x255   : > { %1406 = vmatpush.msra.mxu2 %v1366_v25  ;;  %v4578_v12 = vpop.eup %4577  ;;  %v1274_v23 = vmul.f32 %v4576_v8, %v5291_v46  ;;  %v1342_v25 = vld [vmem:[%s7542_s5 + $0x120] sm:$0x3f]  ;;  %v1352_v30 = vadd.f32 %v1314_v21, %v1276_v42 }
 0x256   : > { %v1272_v2 = vmul.f32 %v4578_v12, %v5291_v46 }
 0x257   : > { %v1113_v55 = vpop.f32.mrf.mxu0  ;;  %1407 = vmatpush.msra.mxu2 %v1364_v41  ;;  %v1187_v56 = vpop.f32.mrf.mxu1 }
 0x258   : > { %v1226_v59 = vmul.f32 0.0625, %v1113_v55  ;;  %v1227_v60 = vmul.f32 0.0625, %v1187_v56  ;;  %v4580_v39 = vpop.eup %4579  ;;  %v1348_v58 = vadd.f32 %v1310_v52, %v1272_v2  ;;  %v1201_v2 = vmul.f32 0.0625, %v5208_v43  ;;  %v1329_v52 = vld [vmem:[%s7542_s5 + $0xb8] sm:$0xff] }
 0x259   : > { %1408 = vmatpush.msra.mxu2 %v1362_v53  ;;  %v4582_v22 = vpop.eup %4581  ;;  %v1302_v35 = vmul.f32 %v4580_v39, %v5291_v46  ;;  %v1350_v53 = vadd.f32 %v1312_v0, %v1274_v23  ;;  %v863_v23 = vld [vmem:[%s7545_s8 + $0x38] sm:$0xff]  ;;  %v1203_v0 = vmul.f32 0.0625, %v5212_v45 }
 0x25a   : > { %4583 = vtanh.f32 %v1226_v59  ;;  %v1300_v50 = vmul.f32 %v4582_v22, %v5291_v46  ;;  %v1205_v22 = vmul.f32 0.0625, %v5221_v48 }
 0x25b   : > { %4585 = vtanh.f32 %v1227_v60  ;;  %1409 = vmatpush.msra.mxu2 %v1360_v1  ;;  %v1308_v60 = vld [vmem:[%s7542_s5 + $0x10] sm:$0xff]  ;;  %v1343_v1 = vld [vmem:[%s7542_s5 + $0x128] sm:$0x3f]  ;;  %v1378_v47 = vadd.f32 %v1340_v33, %v1302_v35 }
 0x25c   : > { %4587 = vtanh.f32 %v1190_v32  ;;  %v1346_v8 = vadd.f32 %v1308_v60, %v1270_v57 }
 0x25d   : > { %4589 = vtanh.f32 %v1225_v63  ;;  %1410 = vmatpush.msra.mxu2 %v1358_v7  ;;  %v1207_v7 = vmul.f32 0.0625, %v5228_v51 }
 0x25e   : > { %4591 = vtanh.f32 %v1221_v4 }
 0x25f   : > { %4593 = vtanh.f32 %v1223_v6  ;;  %1411 = vmatpush.msra.mxu2 %v1356_v13  ;;  %v1337_v13 = vld [vmem:[%s7542_s5 + $0xf8] sm:$0xff] }
 0x260   : > { %v4584_v24 = vpop.eup %4583  ;;  %4595 = vtanh.f32 %v1219_v9  ;;  %v1376_v9 = vadd.f32 %v1338_v61, %v1300_v50 }
 0x261   : > { %v4586_v26 = vpop.eup %4585  ;;  %v1304_v29 = vmul.f32 %v4584_v24, %v5291_v46  ;;  %1412 = vmatpush.msra.mxu2 %v1354_v11  ;;  %4597 = vtanh.f32 %v1217_v14  ;;  %v1339_v14 = vld [vmem:[%s7542_s5 + $0x108] sm:$0xff] }
 0x262   : > { %v4588_v41 = vpop.eup %4587  ;;  %4599 = vtanh.f32 %v1215_v37  ;;  %v1305_v59 = vmul.f32 %v4586_v26, %v5291_v46  ;;  %v1335_v24 = vld [vmem:[%s7542_s5 + $0xe8] sm:$0xff] }
 0x263   : > { %v4590_v55 = vpop.eup %4589  ;;  %v1380_v56 = vadd.f32 %v1342_v25, %v1304_v29  ;;  %1413 = vmatpush.msra.mxu2 %v1352_v30  ;;  %v1268_v3 = vmul.f32 %v4588_v41, %v5291_v46  ;;  %4601 = vtanh.f32 %v1213_v49  ;;  %v1333_v29 = vld [vmem:[%s7542_s5 + $0xd8] sm:$0xff]  ;;  %v1199_v49 = vmul.f32 0.0625, %v5202_v38  ;;  %v1327_v38 = vld [vmem:[%s7542_s5 + $0xa8] sm:$0xff] }
 0x264   : > { %v4592_v32 = vpop.eup %4591  ;;  %747 = vperm.xlu0 %4546, %v709_v40   ;;  %v1303_v6 = vmul.f32 %v4590_v55, %v5291_v46  ;;  %4603 = vtanh.f32 %v1211_v62  ;;  %v1381_v12 = vadd.f32 %v1343_v1, %v1305_v59  ;;  %v1195_v62 = vmul.f32 0.0625, %v5192_v34  ;;  %v1323_v34 = vld [vmem:[%s7542_s5 + $0x88] sm:$0xff] }
 0x265   : > { %v4594_v63 = vpop.eup %4593  ;;  %1414 = vmatpush.msra.mxu2 %v1350_v53  ;;  %4134 = vmatpush.msk.msra.mxu3 %vm1395_vm2, %v1380_v56  ;;  %v1299_v44 = vmul.f32 %v4592_v32, %v5291_v46  ;;  %v1344_v42 = vadd.f32 %v1306_v5, %v1268_v3  ;;  %4605 = vtanh.f32 %v1209_v27  ;;  %v1197_v56 = vmul.f32 0.0625, %v5198_v36  ;;  %v707_v53 = vld [vmem:[%s7547_s10 + $0x28] sm:$0xff]  ;;  %v1325_v36 = vld [vmem:[%s7542_s5 + $0x98] sm:$0xff]  ;;  %v862_v27 = vld [vmem:[%s7545_s8 + $0x30] sm:$0xff] }
 0x266   : > { %v4596_v4 = vpop.eup %4595  ;;  %v1301_v51 = vmul.f32 %v4594_v63, %v5291_v46  ;;  %v1379_v11 = vadd.f32 %v1341_v18, %v1303_v6  ;;  %4607 = vtanh.f32 %v1207_v7  ;;  %v1319_v5 = vld [vmem:[%s7542_s5 + $0x68] sm:$0xff] }
 0x267   : > { %1415 = vmatpush.msra.mxu2 %v1348_v58  ;;  %1445 = vmatpush.msra.mxu3 %v1378_v47  ;;  %v4598_v54 = vpop.eup %4597  ;;  %v1297_v39 = vmul.f32 %v4596_v4, %v5291_v46  ;;  %v1375_v37 = vadd.f32 %v1337_v13, %v1299_v44  ;;  %4609 = vtanh.f32 %v1205_v22  ;;  %v1191_v58 = vmul.f32 0.0625, %v5180_v28  ;;  %v1321_v47 = vld [vmem:[%s7542_s5 + $0x78] sm:$0xff] }
 0x268   : > { %v4600_v21 = vpop.eup %4599  ;;  %v1295_v25 = vmul.f32 %v4598_v54, %v5291_v46  ;;  %v1377_v26 = vadd.f32 %v1339_v14, %v1301_v51  ;;  %4611 = vtanh.f32 %v1203_v0  ;;  %v1317_v44 = vld [vmem:[%s7542_s5 + $0x58] sm:$0xff]  ;;  %v706_v14 = vld [vmem:[%s7547_s10 + $0x20] sm:$0xff]  ;;  %v1307_v0 = vld [vmem:[%s7542_s5 + $0x8] sm:$0xff] }
 0x269   : > { %1416 = vmatpush.msra.mxu2 %v1346_v8  ;;  %1446 = vmatpush.msra.mxu3 %v1376_v9  ;;  %v4602_v48 = vpop.eup %4601  ;;  %v1373_v30 = vadd.f32 %v1335_v24, %v1297_v39  ;;  %4613 = vtanh.f32 %v1201_v2  ;;  %v1313_v13 = vld [vmem:[%s7542_s5 + $0x38] sm:$0xff]  ;;  %v4702_v24 = vld [vmem:[%s5031_s21 + $0x30] sm:$0xff]  ;;  %v5507_v2 = vpop.f32.mrf.mxu2 }
 0x26a   : > { %4135 = vmatmul.msk.f32.vlgmr.msra.gmra.mxu3 %vm1382_vm3, %v5065_v20  ;;  %v1293_v20 = vmul.f32 %v4600_v21, %v5291_v46  ;;  %v4604_v40 = vpop.eup %4603  ;;  %v1371_v45 = vadd.f32 %v1333_v29, %v1295_v25  ;;  %v1291_v35 = vmul.f32 %v4602_v48, %v5291_v46  ;;  %4615 = vtanh.f32 %v1199_v49  ;;  %v1311_v21 = vld [vmem:[%s7542_s5 + $0x28] sm:$0xff]  ;;  %v4701_v22 = vld [vmem:[%s5031_s21 + $0x38] sm:$0xff] }
 0x26b   : > { %4139 = vmatpush.msk.msrb.mxu3 %vm1395_vm2, %v1381_v12  ;;  %1417 = vmatpush.msra.mxu2 %v1344_v42  ;;  %v4606_v41 = vpop.eup %4605  ;;  %v1289_v33 = vmul.f32 %v4604_v40, %v5291_v46  ;;  %4617 = vtanh.f32 %v1197_v56  ;;  %v4704_v40 = vld [vmem:[%s5031_s21] sm:$0xff] }
 0x26c   : > { %1418 = vmatmul.f32.vlgmr.msra.gmra.mxu2 %v5062_v19  ;;  %901 = vperm.xlu0 %4546, %v863_v23   ;;  %v1331_v19 = vld [vmem:[%s7542_s5 + $0xc8] sm:$0xff]  ;;  %v4608_v55 = vpop.eup %4607  ;;  %v1367_v57 = vadd.f32 %v1329_v52, %v1291_v35  ;;  %v1287_v50 = vmul.f32 %v4606_v41, %v5291_v46  ;;  %4619 = vtanh.f32 %v1195_v62  ;;  %v4706_v35 = vld [vmem:[%s5031_s21 + $0x10] sm:$0xff]  ;;  %v3524_v56 = vld [vmem:[%s7549_s12 + $0x20] sm:$0xff] }
 0x26d   : > { %1503 = vmatpush.msrb.mxu3 %v1379_v11  ;;  %1460 = vmatpush.msrb.mxu2 %v1375_v37  ;;  %v1369_v43 = vadd.f32 %v1331_v19, %v1293_v20  ;;  %v4610_v32 = vpop.eup %4609  ;;  %v1365_v59 = vadd.f32 %v1327_v38, %v1289_v33  ;;  %v1285_v60 = vmul.f32 %v4608_v55, %v5291_v46  ;;  %v1309_v37 = vld [vmem:[%s7542_s5 + $0x18] sm:$0xff]  ;;  %v4703_v20 = vld [vmem:[%s5031_s21 + $0x8] sm:$0xff]  ;;  %v860_v19 = vld [vmem:[%s7545_s8 + $0x20] sm:$0xff] }
 0x26e   : > { %v4612_v61 = vpop.eup %4611  ;;  %v1363_v63 = vadd.f32 %v1325_v36, %v1287_v50  ;;  %v3526_v41 = vld [vmem:[%s7549_s12 + $0x30] sm:$0xff]  ;;  %v4707_v33 = vld [vmem:[%s5031_s21 + $0x28] sm:$0xff]  ;;  %v4708_v55 = vld [vmem:[%s5031_s21 + $0x20] sm:$0xff] }
 0x26f   : > { %1504 = vmatpush.msrb.mxu3 %v1377_v26  ;;  %1461 = vmatpush.msrb.mxu2 %v1373_v30  ;;  %v4614_v1 = vpop.eup %4613  ;;  %v1361_v3 = vadd.f32 %v1323_v34, %v1285_v60  ;;  %v861_v30 = vld [vmem:[%s7545_s8 + $0x28] sm:$0xff]  ;;  %v3522_v50 = vld [vmem:[%s7549_s12 + $0x10] sm:$0xff] }
 0x270   : > { %v4616_v4 = vpop.eup %4615  ;;  %v1279_v6 = vmul.f32 %v4614_v1, %v5291_v46  ;;  %3560 = vperm.xlu2 %4548, %v3526_v41   ;;  %v857_v62 = vld [vmem:[%s7545_s8 + $0x8] sm:$0xff]  ;;  %v1548_v60 = vld [vmem:[%s7543_s6 + $0xf0] sm:$0xff]  ;;  %v1533_v41 = vld [vmem:[%s7543_s6 + $0x78] sm:$0xff] }
 0x271   : > { %1462 = vmatpush.msrb.mxu2 %v1371_v45  ;;  %v4618_v7 = vpop.eup %4617  ;;  %v1277_v9 = vmul.f32 %v4616_v4, %v5291_v46  ;;  %v4705_v45 = vld [vmem:[%s5031_s21 + $0x18] sm:$0xff]  ;;  %v5520_v52 = vpop.f32.mrf.mxu2  ;;  %v1544_v1 = vld [vmem:[%s7543_s6 + $0xd0] sm:$0xff]  ;;  %v3747_v4 = vld [vmem:[%s7551_s14] sm:$0xff] }
 0x272   : > { %4136 = vmatmul.msk.f32.gmra.mxu3 %vm1382_vm3, %v5058_v17  ;;  %v1193_v17 = vmul.f32 0.0625, %v5186_v31  ;;  %v1281_v31 = vmul.f32 %v4612_v61, %v5291_v46  ;;  %v4620_v18 = vpop.eup %4619  ;;  %v1355_v54 = vadd.f32 %v1317_v44, %v1279_v6  ;;  %v3527_v61 = vld [vmem:[%s7549_s12 + $0x38] sm:$0xff]  ;;  %v1536_v6 = vld [vmem:[%s7543_s6 + $0x90] sm:$0xff]  ;;  %v1534_v44 = vld [vmem:[%s7543_s6 + $0x80] sm:$0xff] }
 0x273   : > { %1463 = vmatpush.msrb.mxu2 %v1369_v43  ;;  %v1273_v42 = vmul.f32 %v4620_v18, %v5291_v46  ;;  %v859_v43 = vld [vmem:[%s7545_s8 + $0x18] sm:$0xff] }
 0x274   : > { %1421 = vmatmul.f32.gmra.mxu2 %v5055_v16  ;;  %737 = vperm.xlu0 %4546, %v707_v53   ;;  %v1283_v16 = vmul.f32 %v4610_v32, %v5291_v46  ;;  %4621 = vtanh.f32 %v1193_v17  ;;  %v1357_v8 = vadd.f32 %v1319_v5, %v1281_v31  ;;  %v3525_v31 = vld [vmem:[%s7549_s12 + $0x28] sm:$0xff]  ;;  %v3750_v18 = vld [vmem:[%s7551_s14 + $0x18] sm:$0xff] }
 0x275   : > { %1464 = vmatpush.msrb.mxu2 %v1367_v57  ;;  %4623 = vtanh.f32 %v1191_v58  ;;  %v1349_v25 = vadd.f32 %v1311_v21, %v1273_v42  ;;  %v858_v57 = vld [vmem:[%s7545_s8 + $0x10] sm:$0xff]  ;;  %v3521_v42 = vld [vmem:[%s7549_s12 + $0x8] sm:$0xff] }
 0x276   : > { %v1359_v28 = vadd.f32 %v1321_v47, %v1283_v16  ;;  %v1546_v16 = vld [vmem:[%s7543_s6 + $0xe0] sm:$0xff]  ;;  %v3749_v58 = vld [vmem:[%s7551_s14 + $0x10] sm:$0xff] }
 0x277   : > { %1465 = vmatpush.msrb.mxu2 %v1365_v59  ;;  %v3520_v59 = vld [vmem:[%s7549_s12] sm:$0xff]  ;;  %v1520_v21 = vld [vmem:[%s7543_s6 + $0x10] sm:$0xff] }
 0x278   : > { %3550 = vperm.xlu2 %4548, %v3524_v56   ;;  %v1542_v47 = vld [vmem:[%s7543_s6 + $0xc0] sm:$0xff]  ;;  %v1529_v56 = vld [vmem:[%s7543_s6 + $0x58] sm:$0xff] }
 0x279   : > { %1466 = vmatpush.msrb.mxu2 %v1363_v63  ;;  %v5533_v38 = vpop.f32.mrf.mxu2  ;;  %v708_v63 = vld [vmem:[%s7547_s10 + $0x30] sm:$0xff] }
 0x27a   : > { %4137 = vmatmul.msk.f32.gmra.mxu3 %vm1382_vm3, %v5052_v15  ;;  %v1315_v15 = vld [vmem:[%s7542_s5 + $0x48] sm:$0xff]  ;;  %v4622_v12 = vpop.eup %4621  ;;  %7582 = vst [vmem:[#allocation15_spill] sm:$0xff] %v5533_v38 }
 0x27b   : > { %1467 = vmatpush.msrb.mxu2 %v1361_v3  ;;  %v1353_v51 = vadd.f32 %v1315_v15, %v1277_v9  ;;  %v4624_v39 = vpop.eup %4623  ;;  %v1271_v23 = vmul.f32 %v4622_v12, %v5291_v46  ;;  %v1540_v3 = vld [vmem:[%s7543_s6 + $0xb0] sm:$0xff]  ;;  %v3523_v9 = vld [vmem:[%s7549_s12 + $0x18] sm:$0xff]  ;;  %v1530_v15 = vld [vmem:[%s7543_s6 + $0x60] sm:$0xff] }
 0x27c   : > { %1424 = vmatmul.f32.gmra.mxu2 %v5045_v10  ;;  %896 = vperm.xlu0 %4546, %v862_v27   ;;  %v1275_v10 = vmul.f32 %v4618_v7, %v5291_v46  ;;  %v1269_v48 = vmul.f32 %v4624_v39, %v5291_v46  ;;  %v5505_v46 = vpop.f32.mrf.mxu3  ;;  %v1538_v27 = vld [vmem:[%s7543_s6 + $0xa0] sm:$0xff]  ;;  %v3752_v7 = vld [vmem:[%s7551_s14 + $0x28] sm:$0xff] }
 0x27d   : > { %1468 = vmatpush.msrb.mxu2 %v1359_v28  ;;  %v1347_v26 = vadd.f32 %v1309_v37, %v1271_v23  ;;  %v1526_v12 = vld [vmem:[%s7543_s6 + $0x40] sm:$0xff]  ;;  %v3748_v23 = vld [vmem:[%s7551_s14 + $0x8] sm:$0xff] }
 0x27e   : > { %v1351_v11 = vadd.f32 %v1313_v13, %v1275_v10  ;;  %v1345_v29 = vadd.f32 %v1307_v0, %v1269_v48  ;;  %v1522_v39 = vld [vmem:[%s7543_s6 + $0x20] sm:$0xff]  ;;  %v1547_v37 = vld [vmem:[%s7543_s6 + $0xe8] sm:$0xff]  ;;  %v1545_v48 = vld [vmem:[%s7543_s6 + $0xd8] sm:$0xff] }
 0x27f   : > { %1469 = vmatpush.msrb.mxu2 %v1357_v8  ;;  %v1532_v8 = vld [vmem:[%s7543_s6 + $0x70] sm:$0xff]  ;;  %v1543_v0 = vld [vmem:[%s7543_s6 + $0xc8] sm:$0xff] }
 0x280   : > { %3540 = vperm.xlu2 %4548, %v3522_v50   ;;  %v1525_v50 = vld [vmem:[%s7543_s6 + $0x38] sm:$0xff] }
 0x281   : > { %1470 = vmatpush.msrb.mxu2 %v1355_v54  ;;  %v5547_v36 = vpop.f32.mrf.mxu2  ;;  %v1528_v54 = vld [vmem:[%s7543_s6 + $0x50] sm:$0xff] }
 0x282   : > { %4138 = vmatmul.msk.f32.gmra.mxu3 %vm1382_vm3, %v4701_v22  ;;  %7584 = vst [vmem:[#allocation17_spill] sm:$0xff] %v5547_v36 }
 0x283   : > { %1471 = vmatpush.msrb.mxu2 %v1353_v51  ;;  %v1524_v51 = vld [vmem:[%s7543_s6 + $0x30] sm:$0xff] }
 0x284   : > { %1427 = vmatmul.f32.gmra.mxu2 %v4702_v24  ;;  %732 = vperm.xlu0 %4546, %v706_v14   ;;  %v5518_v49 = vpop.f32.mrf.mxu3  ;;  %v3753_v14 = vld [vmem:[%s7551_s14 + $0x30] sm:$0xff] }
 0x285   : > { %1472 = vmatpush.msrb.mxu2 %v1351_v11 }
 0x287   : > { %1473 = vmatpush.msrb.mxu2 %v1349_v25 }
 0x288   : > { %3530 = vperm.xlu2 %4548, %v3520_v59   ;;  %v1523_v59 = vld [vmem:[%s7543_s6 + $0x28] sm:$0xff] }
 0x289   : > { %1474 = vmatpush.msrb.mxu2 %v1347_v26  ;;  %v5560_v34 = vpop.f32.mrf.mxu2  ;;  %v3751_v26 = vld [vmem:[%s7551_s14 + $0x20] sm:$0xff] }
 0x28a   : > { %4140 = vmatmul.msk.f32.vlgmr.msrb.gmra.mxu3 %vm1382_vm3, %v4703_v20  ;;  %7586 = vst [vmem:[#allocation19_spill] sm:$0xff] %v5560_v34 }
 0x28b   : > { %1475 = vmatpush.msrb.mxu2 %v1345_v29  ;;  %v1541_v29 = vld [vmem:[%s7543_s6 + $0xb8] sm:$0xff] }
 0x28c   : > { %1476 = vmatmul.f32.vlgmr.msrb.gmra.mxu2 %v4704_v40  ;;  %891 = vperm.xlu0 %4546, %v861_v30   ;;  %v5531_v53 = vpop.f32.mrf.mxu3  ;;  %v1539_v30 = vld [vmem:[%s7543_s6 + $0xa8] sm:$0xff] }
 0x28d   : > { %7581 = vst [vmem:[#allocation14_spill] sm:$0xff] %v5531_v53  ;;  %1574 = vmatpush.msra.mxu2 %v1548_v60 }
 0x28f   : > { %1575 = vmatpush.msra.mxu2 %v1546_v16  ;;  %v1521_v16 = vld [vmem:[%s7543_s6 + $0x18] sm:$0xff] }
 0x290   : > { %3767 = vperm.xlu2 %4548, %v3749_v58   ;;  %v1550_v58 = vld [vmem:[%s7543_s6 + $0x100] sm:$0xff] }
 0x291   : > { %1576 = vmatpush.msra.mxu2 %v1544_v1  ;;  %v5591_v28 = vpop.f32.mrf.mxu2 }
 0x292   : > { %4141 = vmatmul.msk.f32.gmra.mxu3 %vm1382_vm3, %v4705_v45  ;;  %7588 = vst [vmem:[#allocation21_spill] sm:$0xff] %v5591_v28  ;;  %v1535_v45 = vld [vmem:[%s7543_s6 + $0x88] sm:$0xff] }
 0x293   : > { %1577 = vmatpush.msra.mxu2 %v1542_v47  ;;  %v1519_v47 = vld [vmem:[%s7543_s6 + $0x8] sm:$0xff] }
 0x294   : > { %1479 = vmatmul.f32.gmra.mxu2 %v4706_v35  ;;  %886 = vperm.xlu0 %4546, %v860_v19   ;;  %v5542_v32 = vpop.f32.mrf.mxu3  ;;  %v1537_v19 = vld [vmem:[%s7543_s6 + $0x98] sm:$0xff] }
 0x295   : > { %7583 = vst [vmem:[#allocation16_spill] sm:$0xff] %v5542_v32  ;;  %1578 = vmatpush.msra.mxu2 %v1540_v3  ;;  %v3754_v35 = vld [vmem:[%s7551_s14 + $0x38] sm:$0xff] }
 0x297   : > { %1579 = vmatpush.msra.mxu2 %v1538_v27 }
 0x298   : > { %3782 = vperm.xlu2 %4548, %v3752_v7  }
 0x299   : > { %1580 = vmatpush.msra.mxu2 %v1536_v6  ;;  %v5622_v13 = vpop.f32.mrf.mxu2 }
 0x29a   : > { %4142 = vmatmul.msk.f32.gmra.mxu3 %vm1382_vm3, %v4707_v33 }
 0x29b   : > { %1581 = vmatpush.msra.mxu2 %v1534_v44 }
 0x29c   : > { %1482 = vmatmul.f32.gmra.mxu2 %v4708_v55  ;;  %881 = vperm.xlu0 %4546, %v859_v43   ;;  %v5558_v17 = vpop.f32.mrf.mxu3  ;;  %v1531_v43 = vld [vmem:[%s7543_s6 + $0x68] sm:$0xff] }
 0x29d   : > { %7585 = vst [vmem:[#allocation18_spill] sm:$0xff] %v5558_v17  ;;  %1582 = vmatpush.msra.mxu2 %v1532_v8 }
 0x29f   : > { %1583 = vmatpush.msra.mxu2 %v1530_v15 }
 0x2a1   : > { %1584 = vmatpush.msra.mxu2 %v1528_v54  ;;  %v5653_v25 = vpop.f32.mrf.mxu2  ;;  %v5742_v54 = vld [vmem:[%s7544_s7 + $0x40] sm:$0xff] }
 0x2a2   : > { %4143 = vmatmul.msk.f32.gmra.mxu3 %vm1382_vm3, %v4701_v22  ;;  %v1518_v22 = vld [vmem:[%s7543_s6] sm:$0xff]  ;;  %7591 = vst [vmem:[#allocation24_spill] sm:$0xff] %v5653_v25 }
 0x2a3   : > { %1585 = vmatpush.msra.mxu2 %v1526_v12 }
 0x2a4   : > { %1485 = vmatmul.f32.gmra.mxu2 %v4702_v24  ;;  %876 = vperm.xlu0 %4546, %v858_v57   ;;  %v5589_v5 = vpop.f32.mrf.mxu3  ;;  %v1549_v24 = vld [vmem:[%s7543_s6 + $0xf8] sm:$0xff]  ;;  %v1527_v57 = vld [vmem:[%s7543_s6 + $0x48] sm:$0xff] }
 0x2a5   : > { %7587 = vst [vmem:[#allocation20_spill] sm:$0xff] %v5589_v5  ;;  %1586 = vmatpush.msra.mxu2 %v1524_v51  ;;  %v4225_v51 = vld [vmem:[%s7543_s6 + $0x358] sm:$0xff] }
 0x2a7   : > { %1587 = vmatpush.msra.mxu2 %v1522_v39 }
 0x2a9   : > { %1588 = vmatpush.msra.mxu2 %v1520_v21  ;;  %v5672_v40 = vpop.f32.mrf.mxu2  ;;  %v1551_v21 = vld [vmem:[%s7543_s6 + $0x108] sm:$0xff] }
 0x2aa   : > { %7593 = vst [vmem:[#allocation26_spill] sm:$0xff] %v5672_v40 }
 0x2ab   : > { %1589 = vmatpush.msra.mxu2 %v1518_v22  ;;  %v4221_v22 = vld [vmem:[%s7543_s6 + $0x338] sm:$0xff] }
 0x2ac   : > { %871 = vperm.xlu0 %4546, %v857_v62   ;;  %v5617_v10 = vpop.f32.mrf.mxu3  ;;  %v1554_v62 = vld [vmem:[%s7543_s6 + $0x120] sm:$0x3f] }
 0x2ad   : > { %7589 = vst [vmem:[#allocation22_spill] sm:$0xff] %v5617_v10  ;;  %1632 = vmatpush.msrb.mxu2 %v1549_v24  ;;  %4144 = vmatpush.msk.msra.mxu3 %vm1395_vm2, %v1554_v62  ;;  %v585_v62 = vpop.permute.xlu1 %584 }
 0x2af   : > { %1633 = vmatpush.msrb.mxu2 %v1547_v37  ;;  %v5774_v37 = vld [vmem:[%s7544_s7 + $0x48] sm:$0xff] }
 0x2b1   : > { %1634 = vmatpush.msrb.mxu2 %v1545_v48  ;;  %v5691_v55 = vpop.f32.mrf.mxu2 }
 0x2b2   : > { %7595 = vst [vmem:[#allocation28_spill] sm:$0xff] %v5691_v55 }
 0x2b3   : > { %1635 = vmatpush.msrb.mxu2 %v1543_v0  ;;  %v4217_v0 = vld [vmem:[%s7543_s6 + $0x318] sm:$0xff] }
 0x2b4   : > { %3565 = vperm.xlu0 %4546, %v3527_v61   ;;  %v5642_v11 = vpop.f32.mrf.mxu3 }
 0x2b5   : > { %7590 = vst [vmem:[#allocation23_spill] sm:$0xff] %v5642_v11  ;;  %1636 = vmatpush.msrb.mxu2 %v1541_v29  ;;  %v4215_v29 = vld [vmem:[%s7543_s6 + $0x308] sm:$0xff] }
 0x2b7   : > { %1637 = vmatpush.msrb.mxu2 %v1539_v30  ;;  %v4213_v30 = vld [vmem:[%s7543_s6 + $0x2f8] sm:$0xff] }
 0x2b8   : > { %742 = vperm.xlu1 %4547, %v708_v63   ;;  %v1552_v63 = vld [vmem:[%s7543_s6 + $0x110] sm:$0xff] }
 0x2b9   : > { %1638 = vmatpush.msrb.mxu2 %v1537_v19  ;;  %1617 = vmatpush.msra.mxu3 %v1552_v63  ;;  %v4211_v19 = vld [vmem:[%s7543_s6 + $0x2e8] sm:$0xff] }
 0x2bb   : > { %1639 = vmatpush.msrb.mxu2 %v1535_v45  ;;  %1618 = vmatpush.msra.mxu3 %v1550_v58 }
 0x2bc   : > { %3555 = vperm.xlu0 %4546, %v3525_v31   ;;  %v5670_v20 = vpop.f32.mrf.mxu3 }
 0x2bd   : > { %7592 = vst [vmem:[#allocation25_spill] sm:$0xff] %v5670_v20  ;;  %1640 = vmatpush.msrb.mxu2 %v1533_v41 }
 0x2bf   : > { %1641 = vmatpush.msrb.mxu2 %v1531_v43  ;;  %v4209_v43 = vld [vmem:[%s7543_s6 + $0x2d8] sm:$0xff] }
 0x2c0   : > { %3757 = vperm.xlu1 %4547, %v3747_v4  }
 0x2c1   : > { %1642 = vmatpush.msrb.mxu2 %v1529_v56 }
 0x2c3   : > { %1643 = vmatpush.msrb.mxu2 %v1527_v57  ;;  %v4207_v57 = vld [vmem:[%s7543_s6 + $0x2c8] sm:$0xff] }
 0x2c4   : > { %3545 = vperm.xlu0 %4546, %v3523_v9   ;;  %v5689_v33 = vpop.f32.mrf.mxu3 }
 0x2c5   : > { %7594 = vst [vmem:[#allocation27_spill] sm:$0xff] %v5689_v33  ;;  %1644 = vmatpush.msrb.mxu2 %v1525_v50  ;;  %v4205_v50 = vld [vmem:[%s7543_s6 + $0x2b8] sm:$0xff] }
 0x2c7   : > { %1645 = vmatpush.msrb.mxu2 %v1523_v59  ;;  %v4203_v59 = vld [vmem:[%s7543_s6 + $0x2a8] sm:$0xff] }
 0x2c8   : > { %3772 = vperm.xlu1 %4547, %v3750_v18   ;;  %v1555_v18 = vld [vmem:[%s7543_s6 + $0x128] sm:$0x3f] }
 0x2c9   : > { %1646 = vmatpush.msrb.mxu2 %v1521_v16  ;;  %4149 = vmatpush.msk.msrb.mxu3 %vm1395_vm2, %v1555_v18  ;;  %v4201_v16 = vld [vmem:[%s7543_s6 + $0x298] sm:$0xff] }
 0x2cb   : > { %1647 = vmatpush.msrb.mxu2 %v1519_v47  ;;  %v4199_v47 = vld [vmem:[%s7543_s6 + $0x288] sm:$0xff] }
 0x2cc   : > { %3535 = vperm.xlu0 %4546, %v3521_v42   ;;  %v1553_v42 = vld [vmem:[%s7543_s6 + $0x118] sm:$0xff] }
 0x2cd   : > { %1675 = vmatpush.msrb.mxu3 %v1553_v42 }
 0x2cf   : > { %1676 = vmatpush.msrb.mxu3 %v1551_v21 }
 0x2d0   : > { %3787 = vperm.xlu1 %4547, %v3753_v14   ;;  %v4223_v14 = vld [vmem:[%s7543_s6 + $0x348] sm:$0xff] }
 0x2d4   : > { %3762 = vperm.xlu0 %4546, %v3748_v23   ;;  %v4219_v23 = vld [vmem:[%s7543_s6 + $0x328] sm:$0xff] }
 0x2dc   : > { %3777 = vperm.xlu0 %4546, %v3751_v26  }
 0x2e4   : > { %3792 = vperm.xlu0 %4546, %v3754_v35   ;;  %v4172_v35 = vld [vmem:[%s7544_s7 + $0x50] sm:$0xff] }
 0x2ed   : > { %v1448_v60 = vpop.f32.mrf.mxu3 }
 0x2ef   : > { %v1419_v61 = vpop.f32.mrf.mxu2 }
 0x2f0   : > { %v5715_v1 = vadd.f32 %v1448_v60, %v1419_v61  ;;  %v4173_v61 = vld [vmem:[%s7544_s7 + $0x58] sm:$0xff] }
 0x2f2   : > { %1590 = vmatmul.f32.vlgmr.msra.gmra.mxu2 %v5715_v1 }
 0x2f5   : > { %v1451_v3 = vpop.f32.mrf.mxu3 }
 0x2f7   : > { %v1422_v31 = vpop.f32.mrf.mxu2 }
 0x2f8   : > { %v5724_v4 = vadd.f32 %v1451_v3, %v1422_v31  ;;  %v4197_v3 = vld [vmem:[%s7543_s6 + $0x278] sm:$0xff]  ;;  %v4195_v31 = vld [vmem:[%s7543_s6 + $0x268] sm:$0xff] }
 0x2fa   : > { %1593 = vmatmul.f32.gmra.mxu2 %v5724_v4 }
 0x2fd   : > { %v1454_v27 = vpop.f32.mrf.mxu3 }
 0x2ff   : > { %v1425_v6 = vpop.f32.mrf.mxu2 }
 0x300   : > { %v5727_v7 = vadd.f32 %v1454_v27, %v1425_v6  ;;  %v580_v27 = vpop.permute.xlu1 %579  ;;  %v651_v6 = vadd.f32 %v5520_v52, %v585_v62  ;;  %v4229_v52 = vld [vmem:[%s7543_s6 + $0x378] sm:$0xff] }
 0x301   : > { %v648_v18 = vadd.f32 %v5507_v2, %v580_v27  ;;  %v692_v2 = vadd.f32 %v5518_v49, %v585_v62  ;;  %v4176_v49 = vld [vmem:[%s7544_s7 + $0x70] sm:$0xff] }
 0x302   : > { %1596 = vmatmul.f32.gmra.mxu2 %v5727_v7 }
 0x305   : > { %v1457_v44 = vpop.f32.mrf.mxu3 }
 0x307   : > { %v1428_v8 = vpop.f32.mrf.mxu2 }
 0x308   : > { %v5730_v9 = vadd.f32 %v1457_v44, %v1428_v8  ;;  %v4174_v44 = vld [vmem:[%s7544_s7 + $0x60] sm:$0xff]  ;;  %v4231_v8 = vld [vmem:[%s7543_s6 + $0x388] sm:$0x3f] }
 0x30a   : > { %1599 = vmatmul.f32.gmra.mxu2 %v5730_v9  ;;  %1865 = vmatpush.msra.mxu0 %v5730_v9 }
 0x30c   : > { %1866 = vmatpush.msra.mxu0 %v5727_v7 }
 0x30d   : > { %v1506_v15 = vpop.f32.mrf.mxu3 }
 0x30e   : > { %1867 = vmatpush.msra.mxu0 %v5724_v4 }
 0x30f   : > { %v1477_v12 = vpop.f32.mrf.mxu2 }
 0x310   : > { %v5751_v39 = vadd.f32 %v1506_v15, %v1477_v12  ;;  %1868 = vmatpush.msra.mxu0 %v5715_v1  ;;  %v4227_v15 = vld [vmem:[%s7543_s6 + $0x368] sm:$0xff]  ;;  %v689_v12 = vadd.f32 %v5505_v46, %v580_v27  ;;  %v4177_v46 = vld [vmem:[%s7544_s7 + $0x78] sm:$0xff] }
 0x311   : > { %4178 = vmatmul.msk.f32.vlgmr.msra.gmra.mxu0 %vm587_vm0, %v5742_v54 }
 0x312   : > { %2054 = vmatpush.msrb.mxu0 %v4225_v51  ;;  %4145 = vmatmul.msk.f32.vlgmr.msra.gmra.mxu3 %vm1382_vm3, %v5751_v39  ;;  %v2259_v51 = vpop.trf.xlu1 }
 0x313   : > { %1648 = vmatmul.f32.vlgmr.msrb.gmra.mxu2 %v5715_v1 }
 0x314   : > { %2055 = vmatpush.msrb.mxu0 %v4223_v14 }
 0x315   : > { %v1509_v24 = vpop.f32.mrf.mxu3 }
 0x316   : > { %2056 = vmatpush.msrb.mxu0 %v4221_v22 }
 0x317   : > { %v1480_v48 = vpop.f32.mrf.mxu2 }
 0x318   : > { %v5779_v26 = vadd.f32 %v1509_v24, %v1480_v48  ;;  %2057 = vmatpush.msrb.mxu0 %v4219_v23 }
 0x319   : > { %4179 = vmatmul.msk.f32.gmra.mxu0 %vm587_vm0, %v5774_v37 }
 0x31a   : > { %2058 = vmatpush.msrb.mxu0 %v4217_v0  ;;  %4146 = vmatmul.msk.f32.gmra.mxu3 %vm1382_vm3, %v5779_v26  ;;  %v2260_v42 = vpop.trf.xlu1 }
 0x31b   : > { %1651 = vmatmul.f32.gmra.mxu2 %v5724_v4 }
 0x31c   : > { %2059 = vmatpush.msrb.mxu0 %v4215_v29 }
 0x31d   : > { %v1512_v45 = vpop.f32.mrf.mxu3 }
 0x31e   : > { %2060 = vmatpush.msrb.mxu0 %v4213_v30 }
 0x31f   : > { %v1483_v41 = vpop.f32.mrf.mxu2 }
 0x320   : > { %v5801_v56 = vadd.f32 %v1512_v45, %v1483_v41  ;;  %2061 = vmatpush.msrb.mxu0 %v4211_v19 }
 0x321   : > { %4180 = vmatmul.msk.f32.gmra.mxu0 %vm587_vm0, %v4172_v35 }
 0x322   : > { %2062 = vmatpush.msrb.mxu0 %v4209_v43  ;;  %4147 = vmatmul.msk.f32.gmra.mxu3 %vm1382_vm3, %v5801_v56  ;;  %v2261_v14 = vpop.trf.xlu1 }
 0x323   : > { %1654 = vmatmul.f32.gmra.mxu2 %v5727_v7 }
 0x324   : > { %2063 = vmatpush.msrb.mxu0 %v4207_v57 }
 0x325   : > { %v1515_v60 = vpop.f32.mrf.mxu3 }
 0x326   : > { %2064 = vmatpush.msrb.mxu0 %v4205_v50 }
 0x327   : > { %v1486_v63 = vpop.f32.mrf.mxu2 }
 0x328   : > { %v5822_v58 = vadd.f32 %v1515_v60, %v1486_v63  ;;  %2065 = vmatpush.msrb.mxu0 %v4203_v59 }
 0x329   : > { %4181 = vmatmul.msk.f32.gmra.mxu0 %vm587_vm0, %v4173_v61 }
 0x32a   : > { %2066 = vmatpush.msrb.mxu0 %v4201_v16  ;;  %4148 = vmatmul.msk.f32.gmra.mxu3 %vm1382_vm3, %v5822_v58  ;;  %v2262_v21 = vpop.trf.xlu1 }
 0x32b   : > { %1657 = vmatmul.f32.gmra.mxu2 %v5730_v9  ;;  %1906 = vmatpush.msra.mxu1 %v5822_v58 }
 0x32c   : > { %2067 = vmatpush.msrb.mxu0 %v4199_v47 }
 0x32d   : > { %1907 = vmatpush.msra.mxu1 %v5801_v56 }
 0x32e   : > { %2068 = vmatpush.msrb.mxu0 %v4197_v3 }
 0x32f   : > { %1908 = vmatpush.msra.mxu1 %v5779_v26 }
 0x330   : > { %2069 = vmatpush.msrb.mxu0 %v4195_v31  ;;  %v5936_v31 = vld [vmem:[%s7544_s7] sm:$0xff] }
 0x331   : > { %1909 = vmatpush.msra.mxu1 %v5751_v39  ;;  %4182 = vmatmul.msk.f32.gmra.mxu0 %vm587_vm0, %v4174_v44 }
 0x332   : > { %2378 = vmatpush.msra.mxu0 %v651_v6  ;;  %4186 = vmatmul.msk.f32.vlgmr.msra.gmra.mxu1 %vm587_vm0, %v5742_v54  ;;  %v4175_v54 = vld [vmem:[%s7544_s7 + $0x68] sm:$0xff]  ;;  %v2263_v22 = vpop.trf.xlu1 }
 0x333   : > { %4237 = vmatpush.msk.msrb.mxu1 %vm1395_vm2, %v4231_v8  ;;  %4150 = vmatmul.msk.f32.vlgmr.msrb.gmra.mxu3 %vm1382_vm3, %v5751_v39 }
 0x334   : > { %2379 = vmatpush.msra.mxu0 %v648_v18  ;;  %v4224_v18 = vld [vmem:[%s7543_s6 + $0x350] sm:$0xff] }
 0x335   : > { %2097 = vmatpush.msrb.mxu1 %v4229_v52  ;;  %v4222_v52 = vld [vmem:[%s7543_s6 + $0x340] sm:$0xff] }
 0x337   : > { %2098 = vmatpush.msrb.mxu1 %v4227_v15 }
 0x339   : > { %2452 = vmatpush.msra.mxu1 %v692_v2  ;;  %4183 = vmatmul.msk.f32.gmra.mxu0 %vm587_vm0, %v4175_v54  ;;  %v4220_v2 = vld [vmem:[%s7543_s6 + $0x330] sm:$0xff] }
 0x33a   : > { %4187 = vmatmul.msk.f32.gmra.mxu1 %vm587_vm0, %v5774_v37  ;;  %v2264_v23 = vpop.trf.xlu1 }
 0x33b   : > { %2453 = vmatpush.msra.mxu1 %v689_v12  ;;  %4151 = vmatmul.msk.f32.gmra.mxu3 %vm1382_vm3, %v5779_v26 }
 0x341   : > { %4184 = vmatmul.msk.f32.gmra.mxu0 %vm587_vm0, %v4176_v49 }
 0x342   : > { %4188 = vmatmul.msk.f32.gmra.mxu1 %vm587_vm0, %v4172_v35  ;;  %v2265_v37 = vpop.trf.xlu1 }
 0x343   : > { %4152 = vmatmul.msk.f32.gmra.mxu3 %vm1382_vm3, %v5801_v56 }
 0x349   : > { %4185 = vmatmul.msk.f32.gmra.mxu0 %vm587_vm0, %v4177_v46 }
 0x34a   : > { %4189 = vmatmul.msk.f32.gmra.mxu1 %vm587_vm0, %v4173_v61  ;;  %v5907_v29 = vpop.trf.xlu1 }
 0x34b   : > { %4153 = vmatmul.msk.f32.gmra.mxu3 %vm1382_vm3, %v5822_v58 }
 0x351   : > { %2070 = vmatmul.f32.vlgmr.msrb.gmra.mxu0 %v5715_v1 }
 0x352   : > { %4190 = vmatmul.msk.f32.gmra.mxu1 %vm587_vm0, %v4174_v44  ;;  %v5914_v35 = vpop.trf.xlu1 }
 0x359   : > { %2073 = vmatmul.f32.gmra.mxu0 %v5724_v4 }
 0x35a   : > { %4191 = vmatmul.msk.f32.gmra.mxu1 %vm587_vm0, %v4175_v54  ;;  %v5922_v50 = vpop.trf.xlu1  ;;  %v5963_v54 = vld [vmem:[%s7544_s7 + $0x8] sm:$0xff] }
 0x361   : > { %2076 = vmatmul.f32.gmra.mxu0 %v5727_v7 }
 0x362   : > { %4192 = vmatmul.msk.f32.gmra.mxu1 %vm587_vm0, %v4176_v49  ;;  %v5940_v6 = vpop.trf.xlu1  ;;  %v4218_v49 = vld [vmem:[%s7543_s6 + $0x320] sm:$0xff] }
 0x369   : > { %2079 = vmatmul.f32.gmra.mxu0 %v5730_v9 }
 0x36a   : > { %4193 = vmatmul.msk.f32.gmra.mxu1 %vm587_vm0, %v4177_v46 }
 0x371   : > { %4266 = vmatmul.msk.f32.vlgmr.msra.gmra.mxu0 %vm984_vm1, %v2259_v51 }
 0x372   : > { %4238 = vmatmul.msk.f32.vlgmr.msrb.gmra.mxu1 %vm1382_vm3, %v5751_v39 }
 0x375   : > { %v1591_v24 = vpop.f32.mrf.mxu2 }
 0x379   : > { %4267 = vmatmul.msk.f32.gmra.mxu0 %vm984_vm1, %v2260_v42 }
 0x37a   : > { %4239 = vmatmul.msk.f32.gmra.mxu1 %vm1382_vm3, %v5779_v26 }
 0x37d   : > { %v1594_v48 = vpop.f32.mrf.mxu2 }
 0x381   : > { %4268 = vmatmul.msk.f32.gmra.mxu0 %vm984_vm1, %v2261_v14 }
 0x382   : > { %4240 = vmatmul.msk.f32.gmra.mxu1 %vm1382_vm3, %v5801_v56 }
 0x385   : > { %v1597_v19 = vpop.f32.mrf.mxu2 }
 0x389   : > { %4269 = vmatmul.msk.f32.gmra.mxu0 %vm984_vm1, %v2262_v21 }
 0x38a   : > { %4241 = vmatmul.msk.f32.gmra.mxu1 %vm1382_vm3, %v5822_v58 }
 0x38d   : > { %v1600_v57 = vpop.f32.mrf.mxu2 }
 0x38e   : > { %v5909_v30 = vpop.f32.mrf.mxu0 }
 0x38f   : > { %7596 = vst [vmem:[#allocation29_spill] sm:$0xff] %v5909_v30 }
 0x391   : > { %4270 = vmatmul.msk.f32.gmra.mxu0 %vm984_vm1, %v2263_v22 }
 0x392   : > { %4285 = vmatmul.msk.f32.vlgmr.msra.gmra.mxu1 %vm984_vm1, %v2259_v51  ;;  %v4216_v51 = vld [vmem:[%s7543_s6 + $0x310] sm:$0xff] }
 0x395   : > { %v1620_v0 = vpop.f32.mrf.mxu3 }
 0x396   : > { %v5917_v41 = vpop.f32.mrf.mxu0  ;;  %v5928_v63 = vpop.f32.mrf.mxu2  ;;  %v1621_v3 = vadd.f32 %v1620_v0, %v1591_v24  ;;  %v5991_v24 = vld [vmem:[%s7544_s7 + $0x10] sm:$0xff]  ;;  %v4210_v0 = vld [vmem:[%s7543_s6 + $0x2e0] sm:$0xff] }
 0x397   : > { %7597 = vst [vmem:[#allocation30_spill] sm:$0xff] %v5917_v41 }
 0x399   : > { %4271 = vmatmul.msk.f32.gmra.mxu0 %vm984_vm1, %v2264_v23 }
 0x39a   : > { %4286 = vmatmul.msk.f32.gmra.mxu1 %vm984_vm1, %v2260_v42  ;;  %v5975_v42 = vpop.trf.xlu1 }
 0x39d   : > { %v1623_v45 = vpop.f32.mrf.mxu3 }
 0x39e   : > { %v5924_v59 = vpop.f32.mrf.mxu0  ;;  %v1624_v47 = vadd.f32 %v1623_v45, %v1594_v48  ;;  %v1652_v15 = vpop.f32.mrf.mxu2  ;;  %v4206_v45 = vld [vmem:[%s7543_s6 + $0x2c0] sm:$0xff] }
 0x39f   : > { %7598 = vst [vmem:[#allocation31_spill] sm:$0xff] %v5924_v59 }
 0x3a1   : > { %4272 = vmatmul.msk.f32.gmra.mxu0 %vm984_vm1, %v2265_v37 }
 0x3a2   : > { %4287 = vmatmul.msk.f32.gmra.mxu1 %vm984_vm1, %v2261_v14  ;;  %v4214_v14 = vld [vmem:[%s7543_s6 + $0x300] sm:$0xff] }
 0x3a5   : > { %v1626_v43 = vpop.f32.mrf.mxu3 }
 0x3a6   : > { %v1627_v16 = vadd.f32 %v1626_v43, %v1597_v19  ;;  %v5944_v44 = vpop.f32.mrf.mxu0  ;;  %v6008_v43 = vpop.trf.xlu1 }
 0x3a7   : > { %7600 = vst [vmem:[#allocation33_spill] sm:$0xff] %v5944_v44  ;;  %v6231_v44 = vld [vmem:[%s7544_s7 + $0xb8] sm:$0xff] }
 0x3a9   : > { %4273 = vmatmul.msk.f32.gmra.mxu0 %vm984_vm1, %v5907_v29 }
 0x3aa   : > { %4288 = vmatmul.msk.f32.gmra.mxu1 %vm984_vm1, %v2262_v21 }
 0x3ad   : > { %v1629_v62 = vpop.f32.mrf.mxu3 }
 0x3ae   : > { %v1630_v60 = vadd.f32 %v1629_v62, %v1600_v57  ;;  %v5980_v21 = vpop.f32.mrf.mxu0  ;;  %v4204_v57 = vld [vmem:[%s7543_s6 + $0x2b0] sm:$0xff] }
 0x3af   : > { %v5926_v61 = vpop.f32.mrf.mxu1  ;;  %7603 = vst [vmem:[#allocation36_spill] sm:$0xff] %v5980_v21 }
 0x3b0   : > { %7599 = vst [vmem:[#allocation32_spill] sm:$0xff] %v5926_v61  ;;  %1734 = vmatpush.msra.mxu2 %v1630_v60  ;;  %v1693_v60 = vld [vmem:[%s7544_s7 + $0x18] sm:$0xff] }
 0x3b1   : > { %4274 = vmatmul.msk.f32.gmra.mxu0 %vm984_vm1, %v5914_v35 }
 0x3b2   : > { %1735 = vmatpush.msra.mxu2 %v1627_v16  ;;  %4289 = vmatmul.msk.f32.gmra.mxu1 %vm984_vm1, %v2263_v22  ;;  %v4212_v22 = vld [vmem:[%s7543_s6 + $0x2f0] sm:$0xff]  ;;  %v4202_v16 = vld [vmem:[%s7543_s6 + $0x2a0] sm:$0xff] }
 0x3b4   : > { %1736 = vmatpush.msra.mxu2 %v1624_v47 }
 0x3b6   : > { %v5938_v27 = vpop.f32.mrf.mxu3  ;;  %1737 = vmatpush.msra.mxu2 %v1621_v3  ;;  %v6015_v62 = vpop.f32.mrf.mxu0 }
 0x3b7   : > { %4154 = vmatmul.msk.f32.vlgmr.msra.gmra.mxu2 %vm587_vm0, %v5936_v31  ;;  %v5946_v8 = vpop.f32.mrf.mxu1  ;;  %7605 = vst [vmem:[#allocation38_spill] sm:$0xff] %v6015_v62 }
 0x3b8   : > { %7601 = vst [vmem:[#allocation34_spill] sm:$0xff] %v5946_v8  ;;  %1996 = vmatpush.msrb.mxu2 %v4224_v18 }
 0x3b9   : > { %4275 = vmatmul.msk.f32.gmra.mxu0 %vm984_vm1, %v5922_v50 }
 0x3ba   : > { %1997 = vmatpush.msrb.mxu2 %v4222_v52  ;;  %4290 = vmatmul.msk.f32.gmra.mxu1 %vm984_vm1, %v2264_v23  ;;  %v1655_v23 = vpop.f32.mrf.mxu2 }
 0x3bc   : > { %1998 = vmatpush.msrb.mxu2 %v4220_v2  ;;  %v4200_v2 = vld [vmem:[%s7543_s6 + $0x290] sm:$0xff] }
 0x3be   : > { %v1681_v12 = vpop.f32.mrf.mxu3  ;;  %1999 = vmatpush.msrb.mxu2 %v4218_v49  ;;  %v4198_v49 = vld [vmem:[%s7543_s6 + $0x280] sm:$0xff] }
 0x3bf   : > { %4155 = vmatmul.msk.f32.gmra.mxu2 %vm587_vm0, %v5963_v54  ;;  %v5970_v46 = vpop.f32.mrf.mxu1 }
 0x3c0   : > { %7602 = vst [vmem:[#allocation35_spill] sm:$0xff] %v5970_v46  ;;  %2000 = vmatpush.msrb.mxu2 %v4216_v51  ;;  %v1682_v51 = vadd.f32 %v1681_v12, %v1652_v15  ;;  %v4194_v15 = vld [vmem:[%s7543_s6 + $0x260] sm:$0xff]  ;;  %v6047_v12 = vpop.f32.mrf.mxu0 }
 0x3c1   : > { %4276 = vmatmul.msk.f32.gmra.mxu0 %vm984_vm1, %v5940_v6  ;;  %7607 = vst [vmem:[#allocation40_spill] sm:$0xff] %v6047_v12 }
 0x3c2   : > { %4291 = vmatmul.msk.f32.gmra.mxu1 %vm984_vm1, %v2265_v37  ;;  %2001 = vmatpush.msrb.mxu2 %v4214_v14  ;;  %v4208_v37 = vld [vmem:[%s7543_s6 + $0x2d0] sm:$0xff]  ;;  %v1658_v47 = vpop.f32.mrf.mxu2 }
 0x3c3   : > { %v4196_v14 = vld [vmem:[%s7543_s6 + $0x270] sm:$0xff] }
 0x3c4   : > { %2002 = vmatpush.msrb.mxu2 %v4212_v22  ;;  %v1694_v22 = vld [vmem:[%s7544_s7 + $0x20] sm:$0xff] }
 0x3c6   : > { %v1684_v48 = vpop.f32.mrf.mxu3  ;;  %2003 = vmatpush.msrb.mxu2 %v4210_v0 }
 0x3c7   : > { %4156 = vmatmul.msk.f32.gmra.mxu2 %vm587_vm0, %v5991_v24  ;;  %v5998_v19 = vpop.f32.mrf.mxu1 }
 0x3c8   : > { %7604 = vst [vmem:[#allocation37_spill] sm:$0xff] %v5998_v19  ;;  %2004 = vmatpush.msrb.mxu2 %v4208_v37  ;;  %v6061_v0 = vpop.f32.mrf.mxu0 }
 0x3c9   : > { %4277 = vmatmul.msk.f32.gmra.mxu0 %vm984_vm1, %v5975_v42  ;;  %7609 = vst [vmem:[#allocation42_spill] sm:$0xff] %v6061_v0 }
 0x3ca   : > { %4292 = vmatmul.msk.f32.gmra.mxu1 %vm984_vm1, %v5907_v29  ;;  %2005 = vmatpush.msrb.mxu2 %v4206_v45  ;;  %v1685_v29 = vadd.f32 %v1684_v48, %v1655_v23  ;;  %v2272_v23 = vpop.trf.xlu1  ;;  %v1679_v48 = vadd.f32 %v5938_v27, %v5928_v63  ;;  %v1695_v63 = vld [vmem:[%s7544_s7 + $0x28] sm:$0xff]  ;;  %v1696_v45 = vld [vmem:[%s7544_s7 + $0x30] sm:$0xff] }
 0x3cc   : > { %2006 = vmatpush.msrb.mxu2 %v4204_v57 }
 0x3ce   : > { %v1687_v3 = vpop.f32.mrf.mxu3  ;;  %2007 = vmatpush.msrb.mxu2 %v4202_v16  ;;  %v4226_v16 = vld [vmem:[%s7543_s6 + $0x360] sm:$0xff] }
 0x3cf   : > { %v1688_v18 = vadd.f32 %v1687_v3, %v1658_v47  ;;  %4157 = vmatmul.msk.f32.gmra.mxu2 %vm587_vm0, %v1693_v60  ;;  %v6024_v52 = vpop.f32.mrf.mxu1  ;;  %v2291_v3 = vpop.trf.xlu0 }
 0x3d0   : > { %7606 = vst [vmem:[#allocation39_spill] sm:$0xff] %v6024_v52  ;;  %2008 = vmatpush.msrb.mxu2 %v4200_v2  ;;  %v2071_v47 = vpop.f32.mrf.mxu0 }
 0x3d1   : > { %1775 = vmatpush.msra.mxu3 %v1688_v18  ;;  %4278 = vmatmul.msk.f32.gmra.mxu0 %vm984_vm1, %v6008_v43 }
 0x3d2   : > { %4293 = vmatmul.msk.f32.gmra.mxu1 %vm984_vm1, %v5914_v35  ;;  %2009 = vmatpush.msrb.mxu2 %v4198_v49  ;;  %v2273_v27 = vpop.trf.xlu1 }
 0x3d3   : > { %1776 = vmatpush.msra.mxu3 %v1685_v29 }
 0x3d4   : > { %2010 = vmatpush.msrb.mxu2 %v4196_v14 }
 0x3d5   : > { %1777 = vmatpush.msra.mxu3 %v1682_v51 }
 0x3d6   : > { %2011 = vmatpush.msrb.mxu2 %v4194_v15 }
 0x3d7   : > { %1778 = vmatpush.msra.mxu3 %v1679_v48  ;;  %4158 = vmatmul.msk.f32.gmra.mxu2 %vm587_vm0, %v1694_v22  ;;  %v6050_v35 = vpop.f32.mrf.mxu1  ;;  %v2292_v29 = vpop.trf.xlu0 }
 0x3d8   : > { %7608 = vst [vmem:[#allocation41_spill] sm:$0xff] %v6050_v35  ;;  %4162 = vmatmul.msk.f32.vlgmr.msra.gmra.mxu3 %vm587_vm0, %v5936_v31  ;;  %v4230_v31 = vld [vmem:[%s7543_s6 + $0x380] sm:$0x3f]  ;;  %v2074_v18 = vpop.f32.mrf.mxu0 }
 0x3d9   : > { %4279 = vmatmul.msk.f32.gmra.mxu0 %vm984_vm1, %v2272_v23  ;;  %4232 = vmatpush.msk.msrb.mxu3 %vm1395_vm2, %v4230_v31 }
 0x3da   : > { %4294 = vmatmul.msk.f32.gmra.mxu1 %vm984_vm1, %v5922_v50  ;;  %v4228_v50 = vld [vmem:[%s7543_s6 + $0x370] sm:$0xff]  ;;  %v2274_v57 = vpop.trf.xlu1 }
 0x3db   : > { %2039 = vmatpush.msrb.mxu3 %v4228_v50 }
 0x3dd   : > { %2040 = vmatpush.msrb.mxu3 %v4226_v16  ;;  %v6166_v16 = vld [vmem:[%s7544_s7 + $0x90] sm:$0xff] }
 0x3df   : > { %4159 = vmatmul.msk.f32.gmra.mxu2 %vm587_vm0, %v1695_v63  ;;  %v6063_v37 = vpop.f32.mrf.mxu1  ;;  %v2293_v49 = vpop.trf.xlu0 }
 0x3e0   : > { %7610 = vst [vmem:[#allocation43_spill] sm:$0xff] %v6063_v37  ;;  %4163 = vmatmul.msk.f32.gmra.mxu3 %vm587_vm0, %v5963_v54  ;;  %v2077_v2 = vpop.f32.mrf.mxu0 }
 0x3e1   : > { %4280 = vmatmul.msk.f32.gmra.mxu0 %vm984_vm1, %v2273_v27 }
 0x3e2   : > { %4295 = vmatmul.msk.f32.gmra.mxu1 %vm984_vm1, %v5940_v6  ;;  %v1697_v6 = vld [vmem:[%s7544_s7 + $0x38] sm:$0xff] }
 0x3e7   : > { %4160 = vmatmul.msk.f32.gmra.mxu2 %vm587_vm0, %v1696_v45  ;;  %v6081_v54 = vpop.f32.mrf.mxu1 }
 0x3e8   : > { %7611 = vst [vmem:[#allocation44_spill] sm:$0xff] %v6081_v54  ;;  %4164 = vmatmul.msk.f32.gmra.mxu3 %vm587_vm0, %v5991_v24 }
 0x3e9   : > { %4281 = vmatmul.msk.f32.gmra.mxu0 %vm984_vm1, %v2274_v57 }
 0x3ea   : > { %4296 = vmatmul.msk.f32.gmra.mxu1 %vm984_vm1, %v5975_v42 }
 0x3ef   : > { %4161 = vmatmul.msk.f32.gmra.mxu2 %vm587_vm0, %v1697_v6  ;;  %v2100_v24 = vpop.f32.mrf.mxu1 }
 0x3f0   : > { %4165 = vmatmul.msk.f32.gmra.mxu3 %vm587_vm0, %v1693_v60 }
 0x3f1   : > { %4282 = vmatmul.msk.f32.gmra.mxu0 %vm984_vm1, %v2291_v3 }
 0x3f2   : > { %4297 = vmatmul.msk.f32.gmra.mxu1 %vm984_vm1, %v6008_v43 }
 0x3f7   : > { %2012 = vmatmul.f32.vlgmr.msrb.gmra.mxu2 %v5715_v1  ;;  %v2103_v42 = vpop.f32.mrf.mxu1  ;;  %v2080_v1 = vpop.f32.mrf.mxu0 }
 0x3f8   : > { %4166 = vmatmul.msk.f32.gmra.mxu3 %vm587_vm0, %v1694_v22  ;;  %v2101_v22 = vadd.f32 %v2100_v24, %v2071_v47 }
 0x3f9   : > { %4283 = vmatmul.msk.f32.gmra.mxu0 %vm984_vm1, %v2292_v29 }
 0x3fa   : > { %4298 = vmatmul.msk.f32.gmra.mxu1 %vm984_vm1, %v2272_v23 }
 0x3ff   : > { %2015 = vmatmul.f32.gmra.mxu2 %v5724_v4  ;;  %v2106_v60 = vpop.f32.mrf.mxu1  ;;  %v2104_v4 = vadd.f32 %v2103_v42, %v2074_v18  ;;  %v6112_v23 = vpop.f32.mrf.mxu0  ;;  %v6190_v42 = vld [vmem:[%s7544_s7 + $0xa0] sm:$0xff] }
 0x400   : > { %4167 = vmatmul.msk.f32.gmra.mxu3 %vm587_vm0, %v1695_v63  ;;  %v2107_v14 = vadd.f32 %v2106_v60, %v2077_v2 }
 0x401   : > { %4284 = vmatmul.msk.f32.gmra.mxu0 %vm984_vm1, %v2293_v49 }
 0x402   : > { %4299 = vmatmul.msk.f32.gmra.mxu1 %vm984_vm1, %v2273_v27 }
 0x407   : > { %2018 = vmatmul.f32.gmra.mxu2 %v5727_v7  ;;  %v2109_v43 = vpop.f32.mrf.mxu1  ;;  %v6117_v7 = vpop.f32.mrf.mxu0 }
 0x408   : > { %4168 = vmatmul.msk.f32.gmra.mxu3 %vm587_vm0, %v1696_v45  ;;  %v2110_v51 = vadd.f32 %v2109_v43, %v2080_v1  ;;  %v6205_v43 = vld [vmem:[%s7544_s7 + $0xa8] sm:$0xff] }
 0x40a   : > { %2198 = vmatpush.msra.mxu3 %v2110_v51  ;;  %4300 = vmatmul.msk.f32.gmra.mxu1 %vm984_vm1, %v2274_v57 }
 0x40c   : > { %2199 = vmatpush.msra.mxu3 %v2107_v14 }
 0x40e   : > { %2200 = vmatpush.msra.mxu3 %v2104_v4 }
 0x40f   : > { %2021 = vmatmul.f32.gmra.mxu2 %v5730_v9  ;;  %v6122_v48 = vpop.f32.mrf.mxu1  ;;  %v6124_v9 = vpop.f32.mrf.mxu0 }
 0x410   : > { %4169 = vmatmul.msk.f32.gmra.mxu3 %vm587_vm0, %v1697_v6 }
 0x411   : > { %2201 = vmatpush.msra.mxu3 %v2101_v22  ;;  %v6218_v22 = vld [vmem:[%s7544_s7 + $0xb0] sm:$0xff] }
 0x412   : > { %4301 = vmatmul.msk.f32.gmra.mxu1 %vm984_vm1, %v2291_v3  ;;  %v6177_v3 = vld [vmem:[%s7544_s7 + $0x98] sm:$0xff] }
 0x417   : > { %v6129_v15 = vpop.f32.mrf.mxu1  ;;  %v6131_v63 = vpop.f32.mrf.mxu0 }
 0x418   : > { %4233 = vmatmul.msk.f32.vlgmr.msrb.gmra.mxu3 %vm1382_vm3, %v5751_v39 }
 0x41a   : > { %4302 = vmatmul.msk.f32.gmra.mxu1 %vm984_vm1, %v2292_v29 }
 0x41f   : > { %v6135_v39 = vpop.f32.mrf.mxu1  ;;  %v6137_v27 = vpop.f32.mrf.mxu0 }
 0x420   : > { %4234 = vmatmul.msk.f32.gmra.mxu3 %vm1382_vm3, %v5779_v26  ;;  %v6142_v26 = vld [vmem:[%s7544_s7 + $0x80] sm:$0xff] }
 0x422   : > { %4303 = vmatmul.msk.f32.gmra.mxu1 %vm984_vm1, %v2293_v49 }
 0x427   : > { %v6148_v31 = vpop.f32.mrf.mxu0 }
 0x428   : > { %4235 = vmatmul.msk.f32.gmra.mxu3 %vm1382_vm3, %v5801_v56  ;;  %v6146_v56 = vpop.f32.mrf.mxu1 }
 0x42f   : > { %v6159_v45 = vpop.f32.mrf.mxu0 }
 0x430   : > { %4236 = vmatmul.msk.f32.gmra.mxu3 %vm1382_vm3, %v5822_v58  ;;  %v6153_v58 = vld [vmem:[%s7544_s7 + $0x88] sm:$0xff]  ;;  %v6157_v50 = vpop.f32.mrf.mxu1 }
 0x437   : > { %v6172_v6 = vpop.f32.mrf.mxu0 }
 0x438   : > { %4258 = vmatmul.msk.f32.vlgmr.msra.gmra.mxu3 %vm587_vm0, %v6142_v26  ;;  %v6170_v47 = vpop.f32.mrf.mxu1 }
 0x43a   : > { %v6161_v57 = vpop.f32.mrf.mxu2 }
 0x43b   : > { %7612 = vst [vmem:[#allocation45_spill] sm:$0xff] %v6161_v57 }
 0x43f   : > { %v6185_v29 = vpop.f32.mrf.mxu0 }
 0x440   : > { %4259 = vmatmul.msk.f32.gmra.mxu3 %vm587_vm0, %v6153_v58  ;;  %v6183_v18 = vpop.f32.mrf.mxu1 }
 0x442   : > { %v6179_v24 = vpop.f32.mrf.mxu2 }
 0x443   : > { %7613 = vst [vmem:[#allocation46_spill] sm:$0xff] %v6179_v24 }
 0x447   : > { %v6200_v1 = vpop.f32.mrf.mxu0 }
 0x448   : > { %4260 = vmatmul.msk.f32.gmra.mxu3 %vm587_vm0, %v6166_v16  ;;  %v6198_v49 = vpop.f32.mrf.mxu1 }
 0x44a   : > { %v6194_v2 = vpop.f32.mrf.mxu2 }
 0x44b   : > { %7614 = vst [vmem:[#allocation47_spill] sm:$0xff] %v6194_v2 }
 0x44f   : > { %v2411_v30 = vpop.f32.mrf.mxu0 }
 0x450   : > { %4261 = vmatmul.msk.f32.gmra.mxu3 %vm587_vm0, %v6177_v3  ;;  %v6213_v4 = vpop.f32.mrf.mxu1 }
 0x452   : > { %v6209_v51 = vpop.f32.mrf.mxu2 }
 0x453   : > { %7616 = vst [vmem:[#allocation49_spill] sm:$0xff] %v6209_v51 }
 0x457   : > { %v2414_v24 = vpop.f32.mrf.mxu0 }
 0x458   : > { %4262 = vmatmul.msk.f32.gmra.mxu3 %vm587_vm0, %v6190_v42  ;;  %v6224_v59 = vpop.f32.mrf.mxu1  ;;  %v2534_v62 = vmul.f32 0.0625, %v2414_v24 }
 0x45a   : > { %v6226_v57 = vpop.f32.mrf.mxu2 }
 0x45b   : > { %v6196_v60 = vpop.f32.mrf.mxu3  ;;  %7619 = vst [vmem:[#allocation52_spill] sm:$0xff] %v6226_v57 }
 0x45c   : > { %7615 = vst [vmem:[#allocation48_spill] sm:$0xff] %v6196_v60 }
 0x45f   : > { %v2417_v36 = vpop.f32.mrf.mxu0 }
 0x460   : > { %4263 = vmatmul.msk.f32.gmra.mxu3 %vm587_vm0, %v6205_v43  ;;  %v6237_v51 = vpop.f32.mrf.mxu1 }
 0x462   : > { %v6239_v38 = vpop.f32.mrf.mxu2 }
 0x463   : > { %v6211_v14 = vpop.f32.mrf.mxu3  ;;  %7621 = vst [vmem:[#allocation54_spill] sm:$0xff] %v6239_v38 }
 0x464   : > { %7617 = vst [vmem:[#allocation50_spill] sm:$0xff] %v6211_v14 }
 0x467   : > { %v2420_v46 = vpop.f32.mrf.mxu0 }
 0x468   : > { %4264 = vmatmul.msk.f32.gmra.mxu3 %vm587_vm0, %v6218_v22  ;;  %v6243_v28 = vpop.f32.mrf.mxu1  ;;  %v2538_v0 = vmul.f32 0.0625, %v2420_v46  ;;  %v6263_v46 = vstv %s4304_s25  ;;  %s3977_s25 = scalar_lea.hbm %s7552_s15, %s4483_s17 }
 0x469   : > { %s3980_s0 = sshll.u32 %s3977_s25, 4  ;;  %s3981_s0 = int_to_ptr.hbm [resolvable:$true] %s3980_s0 }
 0x46a   : > { %v6245_v61 = vpop.f32.mrf.mxu2  ;;  %s4822_s20 = sshra.s32 %s3981_s0, 4  ;;  %s4823_s20 = int_to_ptr.hbm [resolvable:$true] %s4822_s20 }
 0x46b   : > { %v6222_v41 = vpop.f32.mrf.mxu3  ;;  %7623 = vst [vmem:[#allocation56_spill] sm:$0xff] %v6245_v61  ;;  %s4824_s24 = scalar_lea.hbm %s4823_s20, 128  ;;  %p4829_p3 = scmp.lt.s32.totalorder %s4823_s20, %s7552_s15 }
 0x46c   : > { %7618 = vst [vmem:[#allocation51_spill] sm:$0xff] %v6222_v41  ;;  %p4825_p0 = scmp.ne.s32.totalorder %s4823_s20, %s4824_s24  ;;  %p4830_p4 = scmp.lt.s32.totalorder %s4828_s30, %s4824_s24 }
 0x46e   : > { %p4826_p1 = pnand %p4825_p0, %p4998_p5  ;;  %p4831_p7 = por %p4830_p4, %p4829_p3 }
 0x46f   : > { %v2423_v41 = vpop.f32.mrf.mxu0 }
 0x470   : > { %4265 = vmatmul.msk.f32.gmra.mxu3 %vm587_vm0, %v6231_v44  ;;  %v6249_v60 = vpop.f32.mrf.mxu1  ;;  %p4827_p2 = pneg %p4826_p1 }
 0x472   : > { %v6251_v19 = vpop.f32.mrf.mxu2  ;;  %p4832_p8 = pnand %p4831_p7, %p4827_p2 }
 0x473   : > { %v6235_v2 = vpop.f32.mrf.mxu3  ;;  %7625 = vst [vmem:[#allocation58_spill] sm:$0xff] %v6251_v19 }
 0x474   : > { %7620 = vst [vmem:[#allocation53_spill] sm:$0xff] %v6235_v2 }
 0x477   : > { %v2426_v53 = vpop.f32.mrf.mxu0 }
 0x478   : > { %v6255_v52 = vpop.f32.mrf.mxu1  ;;  %v2542_v33 = vmul.f32 0.0625, %v2426_v53  ;;  %v2532_v53 = vmul.f32 0.0625, %v2411_v30 }
 0x47a   : > { %v2013_v35 = vpop.f32.mrf.mxu2  ;;  %4625 = vtanh.f32 %v2542_v33 }
 0x47b   : > { %v6241_v34 = vpop.f32.mrf.mxu3 }
 0x47c   : > { %7622 = vst [vmem:[#allocation55_spill] sm:$0xff] %v6241_v34 }
 0x47f   : > { %v2429_v17 = vpop.f32.mrf.mxu0 }
 0x480   : > { %v6259_v2 = vpop.f32.mrf.mxu1  ;;  %v4626_v40 = vpop.eup %4625  ;;  %v2544_v25 = vmul.f32 0.0625, %v2429_v17  ;;  %v4335_v17 = vld [vmem:[%s7542_s5 + $0x220] sm:$0xff] }
 0x481   : > { %v2620_v33 = vmul.f32 %v4626_v40, %v6263_v46 }
 0x482   : > { %v2016_v34 = vpop.f32.mrf.mxu2 }
 0x483   : > { %v6247_v8 = vpop.f32.mrf.mxu3 }
 0x484   : > { %7624 = vst [vmem:[#allocation57_spill] sm:$0xff] %v6247_v8 }
 0x487   : > { %v2432_v10 = vpop.f32.mrf.mxu0 }
 0x488   : > { %v6261_v37 = vpop.f32.mrf.mxu1  ;;  %v2546_v55 = vmul.f32 0.0625, %v2432_v10 }
 0x48a   : > { %v2019_v11 = vpop.f32.mrf.mxu2 }
 0x48b   : > { %v6253_v14 = vpop.f32.mrf.mxu3 }
 0x48c   : > { %7626 = vst [vmem:[#allocation59_spill] sm:$0xff] %v6253_v14  ;;  %v2540_v14 = vmul.f32 0.0625, %v2423_v41 }
 0x48e   : > { %4627 = vtanh.f32 %v2540_v14 }
 0x48f   : > { %v2435_v12 = vpop.f32.mrf.mxu0  ;;  %4629 = vtanh.f32 %v2538_v0 }
 0x490   : > { %v2503_v5 = vpop.f32.mrf.mxu1  ;;  %v2548_v61 = vmul.f32 0.0625, %v2435_v12 }
 0x492   : > { %v2022_v38 = vpop.f32.mrf.mxu2 }
 0x493   : > { %v6257_v54 = vpop.f32.mrf.mxu3 }
 0x494   : > { %7627 = vst [vmem:[#allocation60_spill] sm:$0xff] %v6257_v54  ;;  %v2536_v54 = vmul.f32 0.0625, %v2417_v36  ;;  %v4628_v57 = vpop.eup %4627 }
 0x495   : > { %v4630_v0 = vpop.eup %4629 }
 0x496   : > { %4631 = vtanh.f32 %v2536_v54  ;;  %v2530_v54 = vmul.f32 0.0625, %v6200_v1 }
 0x497   : > { %4633 = vtanh.f32 %v2548_v61 }
 0x498   : > { %v2506_v19 = vpop.f32.mrf.mxu1  ;;  %4635 = vtanh.f32 %v2546_v55  ;;  %v2528_v55 = vmul.f32 0.0625, %v6185_v29 }
 0x499   : > { %4637 = vtanh.f32 %v2534_v62  ;;  %v2547_v10 = vmul.f32 0.0625, %v2506_v19  ;;  %v4333_v19 = vld [vmem:[%s7542_s5 + $0x210] sm:$0xff]  ;;  %v2697_v62 = vadd.f32 %v4335_v17, %v2620_v33 }
 0x49a   : > { %4639 = vtanh.f32 %v2544_v25  ;;  %v4341_v25 = vld [vmem:[%s7542_s5 + $0x250] sm:$0x3f] }
 0x49b   : > { %v2042_v32 = vpop.f32.mrf.mxu3  ;;  %4641 = vtanh.f32 %v2532_v53  ;;  %v2524_v53 = vmul.f32 0.0625, %v6159_v45 }
 0x49c   : > { %v4632_v30 = vpop.eup %4631 }
 0x49d   : > { %v4634_v40 = vpop.eup %4633  ;;  %v2614_v29 = vmul.f32 %v4632_v30, %v6263_v46 }
 0x4a0   : > { %v2509_v12 = vpop.f32.mrf.mxu1 }
 0x4a3   : > { %v2045_v8 = vpop.f32.mrf.mxu3 }
 0x4a4   : > { %v2046_v61 = vadd.f32 %v2045_v8, %v2016_v34  ;;  %v2616_v34 = vmul.f32 %v4630_v0, %v6263_v46  ;;  %v4636_v8 = vpop.eup %4635  ;;  %v4339_v0 = vld [vmem:[%s7542_s5 + $0x240] sm:$0xff] }
 0x4a5   : > { %v2624_v33 = vmul.f32 %v4636_v8, %v6263_v46 }
 0x4a7   : > { %v2701_v30 = vadd.f32 %v4339_v0, %v2624_v33  ;;  %v2512_v0 = vmul.f32 0.0625, %v6112_v23  ;;  %v4317_v23 = vld [vmem:[%s7542_s5 + $0x190] sm:$0xff] }
 0x4ab   : > { %v2048_v20 = vpop.f32.mrf.mxu3 }
 0x4ac   : > { %v2049_v36 = vadd.f32 %v2048_v20, %v2019_v11  ;;  %v2618_v11 = vmul.f32 %v4628_v57, %v6263_v46  ;;  %v2545_v20 = vmul.f32 0.0625, %v2503_v5  ;;  %v2626_v5 = vmul.f32 %v4634_v40, %v6263_v46  ;;  %v4337_v40 = vld [vmem:[%s7542_s5 + $0x230] sm:$0xff] }
 0x4ad   : > { %v2526_v57 = vmul.f32 0.0625, %v6172_v6  ;;  %v4329_v6 = vld [vmem:[%s7542_s5 + $0x1f0] sm:$0xff] }
 0x4ae   : > { %v2695_v24 = vadd.f32 %v4333_v19, %v2618_v11  ;;  %v2703_v1 = vadd.f32 %v4341_v25, %v2626_v5  ;;  %v2691_v17 = vadd.f32 %v4329_v6, %v2614_v29  ;;  %v2520_v11 = vmul.f32 0.0625, %v6137_v27  ;;  %v4325_v27 = vld [vmem:[%s7542_s5 + $0x1d0] sm:$0xff]  ;;  %v6333_v6 = vld [vmem:[%s5031_s21 + $0x8] sm:$0xff] }
 0x4b0   : > { %4343 = vmatpush.msk.msrb.mxu3 %vm1395_vm2, %v2703_v1 }
 0x4b2   : > { %2754 = vmatpush.msrb.mxu3 %v2701_v30  ;;  %v2541_v30 = vmul.f32 0.0625, %v6259_v2  ;;  %v2539_v2 = vmul.f32 0.0625, %v6255_v52  ;;  %v2537_v52 = vmul.f32 0.0625, %v6249_v60  ;;  %v4309_v60 = vld [vmem:[%s7542_s5 + $0x150] sm:$0xff] }
 0x4b3   : > { %v2051_v21 = vpop.f32.mrf.mxu3 }
 0x4b4   : > { %v2052_v41 = vadd.f32 %v2051_v21, %v2022_v38  ;;  %v2549_v38 = vmul.f32 0.0625, %v2509_v12  ;;  %v2043_v21 = vadd.f32 %v2042_v32, %v2013_v35  ;;  %v4331_v32 = vld [vmem:[%s7542_s5 + $0x200] sm:$0xff]  ;;  %v4638_v35 = vpop.eup %4637  ;;  %v2522_v12 = vmul.f32 0.0625, %v6148_v31 }
 0x4b5   : > { %v4640_v14 = vpop.eup %4639  ;;  %v2612_v45 = vmul.f32 %v4638_v35, %v6263_v46 }
 0x4b6   : > { %2157 = vmatpush.msra.mxu2 %v2052_v41  ;;  %4643 = vtanh.f32 %v2549_v38  ;;  %v4642_v41 = vpop.eup %4641 }
 0x4b7   : > { %4645 = vtanh.f32 %v2547_v10 }
 0x4b8   : > { %2158 = vmatpush.msra.mxu2 %v2049_v36  ;;  %4647 = vtanh.f32 %v2530_v54  ;;  %v2693_v36 = vadd.f32 %v4331_v32, %v2616_v34  ;;  %v2518_v34 = vmul.f32 0.0625, %v6131_v63  ;;  %v4340_v32 = vld [vmem:[%s7542_s5 + $0x248] sm:$0xff]  ;;  %v2516_v63 = vmul.f32 0.0625, %v6124_v9  ;;  %v4338_v9 = vld [vmem:[%s7542_s5 + $0x238] sm:$0xff] }
 0x4b9   : > { %4649 = vtanh.f32 %v2545_v20  ;;  %v4327_v20 = vld [vmem:[%s7542_s5 + $0x1e0] sm:$0xff] }
 0x4ba   : > { %2159 = vmatpush.msra.mxu2 %v2046_v61  ;;  %4651 = vtanh.f32 %v2528_v55  ;;  %v2622_v61 = vmul.f32 %v4640_v14, %v6263_v46  ;;  %v2689_v8 = vadd.f32 %v4327_v20, %v2612_v45 }
 0x4bb   : > { %4653 = vtanh.f32 %v2526_v57 }
 0x4bc   : > { %2160 = vmatpush.msra.mxu2 %v2043_v21  ;;  %v4644_v10 = vpop.eup %4643  ;;  %4655 = vtanh.f32 %v2524_v53  ;;  %v2610_v21 = vmul.f32 %v4642_v41, %v6263_v46  ;;  %v2699_v25 = vadd.f32 %v4337_v40, %v2622_v61  ;;  %v2514_v41 = vmul.f32 0.0625, %v6117_v7  ;;  %v4319_v7 = vld [vmem:[%s7542_s5 + $0x1a0] sm:$0xff] }
 0x4bd   : > { %4250 = vmatmul.msk.f32.vlgmr.msra.gmra.mxu2 %vm587_vm0, %v6142_v26  ;;  %v4342_v26 = vld [vmem:[%s7542_s5 + $0x258] sm:$0x3f]  ;;  %v4646_v54 = vpop.eup %4645  ;;  %v2627_v38 = vmul.f32 %v4644_v10, %v6263_v46  ;;  %4657 = vtanh.f32 %v2522_v12  ;;  %v2543_v10 = vmul.f32 0.0625, %v6261_v37  ;;  %v4710_v37 = vld [vmem:[%s7543_s6 + $0x120] sm:$0x3f] }
 0x4be   : > { %2711 = vmatpush.msrb.mxu2 %v2697_v62  ;;  %v4648_v31 = vpop.eup %4647  ;;  %v2625_v5 = vmul.f32 %v4646_v54, %v6263_v46  ;;  %2755 = vmatpush.msrb.mxu3 %v2699_v25  ;;  %4659 = vtanh.f32 %v2520_v11  ;;  %v2687_v14 = vadd.f32 %v4325_v27, %v2610_v21  ;;  %v4711_v11 = vld [vmem:[%s7543_s6 + $0x110] sm:$0xff]  ;;  %v4315_v40 = vld [vmem:[%s7542_s5 + $0x180] sm:$0xff] }
 0x4bf   : > { %v4650_v55 = vpop.eup %4649  ;;  %v2704_v19 = vadd.f32 %v4342_v26, %v2627_v38  ;;  %v2608_v57 = vmul.f32 %v4648_v31, %v6263_v46  ;;  %4344 = vmatmul.msk.f32.vlgmr.msrb.gmra.mxu3 %vm1382_vm3, %v6333_v6  ;;  %4661 = vtanh.f32 %v2518_v34 }
 0x4c0   : > { %2712 = vmatpush.msrb.mxu2 %v2695_v24  ;;  %v4652_v62 = vpop.eup %4651  ;;  %v4323_v24 = vld [vmem:[%s7542_s5 + $0x1c0] sm:$0xff]  ;;  %v2702_v29 = vadd.f32 %v4340_v32, %v2625_v5  ;;  %v2623_v1 = vmul.f32 %v4650_v55, %v6263_v46  ;;  %4663 = vtanh.f32 %v2516_v63  ;;  %v2535_v32 = vmul.f32 0.0625, %v6243_v28 }
 0x4c1   : > { %v4654_v35 = vpop.eup %4653  ;;  %4348 = vmatpush.msk.msra.mxu3 %vm1395_vm2, %v2704_v19  ;;  %v2606_v53 = vmul.f32 %v4652_v62, %v6263_v46  ;;  %v2685_v12 = vadd.f32 %v4323_v24, %v2608_v57  ;;  %4665 = vtanh.f32 %v2514_v41  ;;  %v6368_v19 = vld [vmem:[%s5031_s21 + $0x18] sm:$0xff]  ;;  %v4713_v62 = vld [vmem:[%s7543_s6 + $0x100] sm:$0xff] }
 0x4c2   : > { %2713 = vmatpush.msrb.mxu2 %v2693_v36  ;;  %v4321_v36 = vld [vmem:[%s7542_s5 + $0x1b0] sm:$0xff]  ;;  %v2700_v33 = vadd.f32 %v4338_v9, %v2623_v1  ;;  %v2604_v45 = vmul.f32 %v4654_v35, %v6263_v46  ;;  %4667 = vtanh.f32 %v2543_v10 }
 0x4c3   : > { %2812 = vmatpush.msra.mxu3 %v2702_v29  ;;  %v2683_v54 = vadd.f32 %v4321_v36, %v2606_v53  ;;  %4669 = vtanh.f32 %v2512_v0  ;;  %v2533_v29 = vmul.f32 0.0625, %v6237_v51  ;;  %v4307_v53 = vld [vmem:[%s7542_s5 + $0x140] sm:$0xff]  ;;  %v4336_v36 = vld [vmem:[%s7542_s5 + $0x228] sm:$0xff] }
 0x4c4   : > { %2714 = vmatpush.msrb.mxu2 %v2691_v17  ;;  %v2681_v61 = vadd.f32 %v4319_v7, %v2604_v45  ;;  %4671 = vtanh.f32 %v2541_v30  ;;  %v2527_v7 = vmul.f32 0.0625, %v6198_v49 }
 0x4c5   : > { %4251 = vmatmul.msk.f32.gmra.mxu2 %vm587_vm0, %v6153_v58  ;;  %v4656_v58 = vpop.eup %4655  ;;  %2813 = vmatpush.msra.mxu3 %v2700_v33  ;;  %4673 = vtanh.f32 %v2539_v2  ;;  %v6402_v33 = vld [vmem:[%s5031_s21 + $0x28] sm:$0xff] }
 0x4c6   : > { %2715 = vmatpush.msrb.mxu2 %v2689_v8  ;;  %v4658_v26 = vpop.eup %4657  ;;  %v2602_v17 = vmul.f32 %v4656_v58, %v6263_v46  ;;  %v4311_v8 = vld [vmem:[%s7542_s5 + $0x160] sm:$0xff]  ;;  %4675 = vtanh.f32 %v2537_v52  ;;  %v2531_v58 = vmul.f32 0.0625, %v6224_v59  ;;  %v2529_v59 = vmul.f32 0.0625, %v6213_v4 }
 0x4c7   : > { %4353 = vmatpush.msk.msrb.mxu3 %vm1395_vm2, %v4710_v37  ;;  %v4660_v38 = vpop.eup %4659  ;;  %v2600_v31 = vmul.f32 %v4658_v26, %v6263_v46  ;;  %4677 = vtanh.f32 %v2535_v32  ;;  %v2515_v32 = vmul.f32 0.0625, %v6129_v15 }
 0x4c8   : > { %2716 = vmatpush.msrb.mxu2 %v2687_v14  ;;  %v4662_v20 = vpop.eup %4661  ;;  %v2679_v55 = vadd.f32 %v4317_v23, %v2602_v17  ;;  %v2598_v21 = vmul.f32 %v4660_v38, %v6263_v46  ;;  %4345 = vmatmul.msk.f32.gmra.mxu3 %vm1382_vm3, %v6368_v19  ;;  %4679 = vtanh.f32 %v2533_v29  ;;  %v4334_v17 = vld [vmem:[%s7542_s5 + $0x218] sm:$0xff]  ;;  %v2525_v38 = vmul.f32 0.0625, %v6183_v18  ;;  %v4332_v23 = vld [vmem:[%s7542_s5 + $0x208] sm:$0xff] }
 0x4c9   : > { %2882 = vmatpush.msrb.mxu3 %v4711_v11  ;;  %v4664_v25 = vpop.eup %4663  ;;  %v2677_v34 = vadd.f32 %v4315_v40, %v2600_v31  ;;  %v2596_v27 = vmul.f32 %v4662_v20, %v6263_v46  ;;  %4681 = vtanh.f32 %v2531_v58  ;;  %v2523_v31 = vmul.f32 0.0625, %v6170_v47  ;;  %v4330_v18 = vld [vmem:[%s7542_s5 + $0x1f8] sm:$0xff] }
 0x4ca   : > { %2717 = vmatpush.msrb.mxu2 %v2685_v12  ;;  %v4666_v5 = vpop.eup %4665  ;;  %v2594_v63 = vmul.f32 %v4664_v25, %v6263_v46  ;;  %4683 = vtanh.f32 %v2529_v59  ;;  %v6428_v11 = vld [vmem:[%s5031_s21 + $0x38] sm:$0xff]  ;;  %v2521_v47 = vmul.f32 0.0625, %v6157_v50 }
 0x4cb   : > { %2883 = vmatpush.msrb.mxu3 %v4713_v62  ;;  %v4668_v57 = vpop.eup %4667  ;;  %v2673_v1 = vadd.f32 %v4311_v8, %v2596_v27  ;;  %v2592_v14 = vmul.f32 %v4666_v5, %v6263_v46  ;;  %4685 = vtanh.f32 %v2527_v7  ;;  %v4326_v62 = vld [vmem:[%s7542_s5 + $0x1d8] sm:$0xff]  ;;  %v2517_v27 = vmul.f32 0.0625, %v6135_v39  ;;  %v4324_v5 = vld [vmem:[%s7542_s5 + $0x1c8] sm:$0xff] }
 0x4cc   : > { %2718 = vmatpush.msrb.mxu2 %v2683_v54  ;;  %v4670_v24 = vpop.eup %4669  ;;  %v2621_v28 = vmul.f32 %v4668_v57, %v6263_v46  ;;  %v2671_v51 = vadd.f32 %v4309_v60, %v2594_v63  ;;  %4687 = vtanh.f32 %v2525_v38  ;;  %v4322_v39 = vld [vmem:[%s7542_s5 + $0x1b8] sm:$0xff]  ;;  %v4320_v60 = vld [vmem:[%s7542_s5 + $0x1a8] sm:$0xff] }
 0x4cd   : > { %4252 = vmatmul.msk.f32.gmra.mxu2 %vm587_vm0, %v6166_v16  ;;  %v4313_v16 = vld [vmem:[%s7542_s5 + $0x170] sm:$0xff]  ;;  %v4672_v9 = vpop.eup %4671  ;;  %v2590_v41 = vmul.f32 %v4670_v24, %v6263_v46  ;;  %v2669_v12 = vadd.f32 %v4307_v53, %v2592_v14  ;;  %4689 = vtanh.f32 %v2523_v31  ;;  %v4716_v24 = vld [vmem:[%s7543_s6 + $0x128] sm:$0x3f]  ;;  %v4723_v31 = vld [vmem:[%s7543_s6 + $0xc0] sm:$0xff] }
 0x4ce   : > { %2719 = vmatpush.msrb.mxu2 %v2681_v61  ;;  %v2675_v35 = vadd.f32 %v4313_v16, %v2598_v21  ;;  %v4674_v10 = vpop.eup %4673  ;;  %v2698_v45 = vadd.f32 %v4336_v36, %v2621_v28  ;;  %v2619_v26 = vmul.f32 %v4672_v9, %v6263_v46  ;;  %v2519_v16 = vmul.f32 0.0625, %v6146_v56  ;;  %v4718_v9 = vld [vmem:[%s7543_s6 + $0x108] sm:$0xff] }
 0x4cf   : > { %v4676_v0 = vpop.eup %4675  ;;  %v2617_v37 = vmul.f32 %v4674_v10, %v6263_v46  ;;  %4691 = vtanh.f32 %v2521_v47  ;;  %v4314_v10 = vld [vmem:[%s7542_s5 + $0x178] sm:$0xff]  ;;  %v4729_v47 = vld [vmem:[%s5031_s21 + $0x20] sm:$0xff] }
 0x4d0   : > { %2720 = vmatpush.msrb.mxu2 %v2679_v55  ;;  %4346 = vmatmul.msk.f32.gmra.mxu3 %vm1382_vm3, %v6402_v33  ;;  %v4678_v4 = vpop.eup %4677  ;;  %v2696_v49 = vadd.f32 %v4334_v17, %v2619_v26  ;;  %v2615_v30 = vmul.f32 %v4676_v0, %v6263_v46  ;;  %4693 = vtanh.f32 %v2519_v16  ;;  %v4312_v26 = vld [vmem:[%s7542_s5 + $0x168] sm:$0xff]  ;;  %v4734_v16 = vld [vmem:[%s5031_s21 + $0x30] sm:$0xff] }
 0x4d1   : > { %v4680_v61 = vpop.eup %4679  ;;  %v2694_v20 = vadd.f32 %v4332_v23, %v2617_v37  ;;  %v2613_v40 = vmul.f32 %v4678_v4, %v6263_v46  ;;  %4695 = vtanh.f32 %v2517_v27  ;;  %v4308_v37 = vld [vmem:[%s7542_s5 + $0x148] sm:$0xff]  ;;  %v4306_v23 = vld [vmem:[%s7542_s5 + $0x138] sm:$0xff] }
 0x4d2   : > { %2721 = vmatpush.msrb.mxu2 %v2677_v34  ;;  %v4682_v2 = vpop.eup %4681  ;;  %v2692_v55 = vadd.f32 %v4330_v18, %v2615_v30  ;;  %v2611_v21 = vmul.f32 %v4680_v61, %v6263_v46  ;;  %4697 = vtanh.f32 %v2515_v32  ;;  %v4719_v61 = vld [vmem:[%s5031_s21] sm:$0xff]  ;;  %v4724_v18 = vld [vmem:[%s5031_s21 + $0x10] sm:$0xff]  ;;  %v4739_v27 = vld [vmem:[%s7543_s6 + $0xf8] sm:$0xff]  ;;  %s3978_s21 = sshll.u32 %s7458_s16, 4  ;;  %s3979_s21 = int_to_ptr.vmem [resolvable:$true] %s3978_s21 }
 0x4d3   : > { %v4684_v25 = vpop.eup %4683  ;;  %v2609_v50 = vmul.f32 %v4682_v2, %v6263_v46  ;;  %v4728_v2 = vld [vmem:[%s7543_s6 + $0x80] sm:$0xff]  ;;  %v4743_v32 = vld [vmem:[%s7543_s6 + $0xb8] sm:$0xff] }
 0x4d4   : > { %2722 = vmatpush.msrb.mxu2 %v2675_v35  ;;  %v4686_v34 = vpop.eup %4685  ;;  %v2688_v8 = vadd.f32 %v4326_v62, %v2611_v21  ;;  %v2607_v56 = vmul.f32 %v4684_v25, %v6263_v46  ;;  %v4732_v21 = vld [vmem:[%s7543_s6 + $0x50] sm:$0xff]  ;;  %v4733_v25 = vld [vmem:[%s7543_s6 + $0x40] sm:$0xff] }
 0x4d5   : > { %4253 = vmatmul.msk.f32.gmra.mxu2 %vm587_vm0, %v6177_v3  ;;  %v4305_v3 = vld [vmem:[%s7542_s5 + $0x130] sm:$0xff]  ;;  %v4688_v57 = vpop.eup %4687  ;;  %v2686_v35 = vadd.f32 %v4324_v5, %v2609_v50  ;;  %v2605_v63 = vmul.f32 %v4686_v34, %v6263_v46  ;;  %v4738_v34 = vld [vmem:[%s7543_s6] sm:$0xff]  ;;  %v4740_v5 = vld [vmem:[%s7543_s6 + $0xe8] sm:$0xff] }
 0x4d6   : > { %2723 = vmatpush.msrb.mxu2 %v2673_v1  ;;  %v2667_v54 = vadd.f32 %v4305_v3, %v2590_v41  ;;  %v4690_v15 = vpop.eup %4689  ;;  %v2603_v29 = vmul.f32 %v4688_v57, %v6263_v46  ;;  %v4717_v1 = vld [vmem:[%s7543_s6 + $0x118] sm:$0xff]  ;;  %v4735_v62 = vld [vmem:[%s7543_s6 + $0x30] sm:$0xff]  ;;  %v4742_v57 = vld [vmem:[%s7543_s6 + $0xc8] sm:$0xff] }
 0x4d7   : > { %v4692_v14 = vpop.eup %4691  ;;  %v2682_v28 = vadd.f32 %v4320_v60, %v2605_v63  ;;  %v2601_v53 = vmul.f32 %v4690_v15, %v6263_v46  ;;  %v4737_v50 = vld [vmem:[%s7543_s6 + $0x10] sm:$0xff]  ;;  %v4747_v15 = vld [vmem:[%s7543_s6 + $0x78] sm:$0xff] }
 0x4d8   : > { %2724 = vmatpush.msrb.mxu2 %v2671_v51  ;;  %4347 = vmatmul.msk.f32.gmra.mxu3 %vm1382_vm3, %v6428_v11  ;;  %v4694_v58 = vpop.eup %4693  ;;  %v4316_v51 = vld [vmem:[%s7542_s5 + $0x188] sm:$0xff]  ;;  %v2599_v36 = vmul.f32 %v4692_v14, %v6263_v46  ;;  %v4749_v60 = vld [vmem:[%s7543_s6 + $0x58] sm:$0xff] }
 0x4d9   : > { %v4696_v3 = vpop.eup %4695  ;;  %v2678_v59 = vadd.f32 %v4316_v51, %v2601_v53  ;;  %v4752_v14 = vld [vmem:[%s7543_s6 + $0x28] sm:$0xff] }
 0x4da   : > { %2725 = vmatpush.msrb.mxu2 %v2669_v12  ;;  %v2597_v12 = vmul.f32 %v4694_v58, %v6263_v46  ;;  %v2676_v0 = vadd.f32 %v4314_v10, %v2599_v36 }
 0x4dc   : > { %2726 = vmatpush.msrb.mxu2 %v2667_v54  ;;  %v4310_v54 = vld [vmem:[%s7542_s5 + $0x158] sm:$0xff] }
 0x4dd   : > { %4254 = vmatmul.msk.f32.gmra.mxu2 %vm587_vm0, %v6190_v42  ;;  %v4328_v42 = vld [vmem:[%s7542_s5 + $0x1e8] sm:$0xff] }
 0x4de   : > { %2769 = vmatpush.msra.mxu2 %v2698_v45  ;;  %v2690_v52 = vadd.f32 %v4328_v42, %v2613_v40  ;;  %v4698_v45 = vpop.eup %4697  ;;  %v4727_v40 = vld [vmem:[%s7543_s6 + $0x90] sm:$0xff] }
 0x4df   : > { %v2593_v17 = vmul.f32 %v4698_v45, %v6263_v46  ;;  %v4730_v42 = vld [vmem:[%s7543_s6 + $0x70] sm:$0xff] }
 0x4e0   : > { %2770 = vmatpush.msra.mxu2 %v2696_v49  ;;  %4349 = vmatmul.msk.f32.vlgmr.msra.gmra.mxu3 %vm1382_vm3, %v6333_v6  ;;  %v2684_v6 = vadd.f32 %v4322_v39, %v2607_v56  ;;  %v4741_v56 = vld [vmem:[%s7543_s6 + $0xd8] sm:$0xff]  ;;  %v4744_v39 = vld [vmem:[%s7543_s6 + $0xa8] sm:$0xff] }
 0x4e1   : > { %4358 = vmatpush.msk.msra.mxu3 %vm1395_vm2, %v4716_v24  ;;  %v2670_v49 = vadd.f32 %v4308_v37, %v2593_v17  ;;  %v4746_v24 = vld [vmem:[%s7543_s6 + $0x88] sm:$0xff] }
 0x4e2   : > { %2771 = vmatpush.msra.mxu2 %v2694_v20  ;;  %v4726_v20 = vld [vmem:[%s7543_s6 + $0xa0] sm:$0xff] }
 0x4e3   : > { %2940 = vmatpush.msra.mxu3 %v4717_v1  ;;  %v4751_v1 = vld [vmem:[%s7543_s6 + $0x38] sm:$0xff] }
 0x4e4   : > { %2772 = vmatpush.msra.mxu2 %v2692_v55  ;;  %v4731_v55 = vld [vmem:[%s7543_s6 + $0x60] sm:$0xff] }
 0x4e5   : > { %4255 = vmatmul.msk.f32.gmra.mxu2 %vm587_vm0, %v6205_v43  ;;  %v2513_v43 = vmul.f32 0.0625, %v6122_v48  ;;  %v4318_v48 = vld [vmem:[%s7542_s5 + $0x198] sm:$0xff]  ;;  %2941 = vmatpush.msra.mxu3 %v4718_v9 }
 0x4e6   : > { %2773 = vmatpush.msra.mxu2 %v2690_v52  ;;  %v2680_v41 = vadd.f32 %v4318_v48, %v2603_v29  ;;  %v4736_v52 = vld [vmem:[%s7543_s6 + $0x20] sm:$0xff]  ;;  %v4753_v48 = vld [vmem:[%s7543_s6 + $0x18] sm:$0xff] }
 0x4e7   : > { %4699 = vtanh.f32 %v2513_v43  ;;  %v4748_v43 = vld [vmem:[%s7543_s6 + $0x68] sm:$0xff] }
 0x4e8   : > { %2774 = vmatpush.msra.mxu2 %v2688_v8  ;;  %4350 = vmatmul.msk.f32.gmra.mxu3 %vm1382_vm3, %v6368_v19  ;;  %v2674_v19 = vadd.f32 %v4312_v26, %v2597_v12  ;;  %v6567_v8 = vpop.f32.mrf.mxu3 }
 0x4ea   : > { %2775 = vmatpush.msra.mxu2 %v2686_v35  ;;  %v4745_v35 = vld [vmem:[%s7543_s6 + $0x98] sm:$0xff] }
 0x4ec   : > { %2776 = vmatpush.msra.mxu2 %v2684_v6  ;;  %v4750_v6 = vld [vmem:[%s7543_s6 + $0x48] sm:$0xff] }
 0x4ed   : > { %4256 = vmatmul.msk.f32.gmra.mxu2 %vm587_vm0, %v6218_v22  ;;  %v2595_v22 = vmul.f32 %v4696_v3, %v6263_v46  ;;  %v4700_v7 = vpop.eup %4699 }
 0x4ee   : > { %2777 = vmatpush.msra.mxu2 %v2682_v28  ;;  %v2591_v38 = vmul.f32 %v4700_v7, %v6263_v46  ;;  %v4721_v46 = vld [vmem:[%s7543_s6 + $0xe0] sm:$0xff]  ;;  %v4754_v28 = vld [vmem:[%s7543_s6 + $0x8] sm:$0xff] }
 0x4ef   : > { %v2672_v4 = vadd.f32 %v4310_v54, %v2595_v22 }
 0x4f0   : > { %2778 = vmatpush.msra.mxu2 %v2680_v41  ;;  %4351 = vmatmul.msk.f32.gmra.mxu3 %vm1382_vm3, %v6402_v33  ;;  %v2668_v30 = vadd.f32 %v4306_v23, %v2591_v38  ;;  %v4722_v33 = vld [vmem:[%s7543_s6 + $0xd0] sm:$0xff]  ;;  %v6584_v63 = vpop.f32.mrf.mxu3 }
 0x4f2   : > { %2779 = vmatpush.msra.mxu2 %v2678_v59 }
 0x4f4   : > { %2780 = vmatpush.msra.mxu2 %v2676_v0 }
 0x4f5   : > { %4257 = vmatmul.msk.f32.gmra.mxu2 %vm587_vm0, %v6231_v44  ;;  %v4720_v44 = vld [vmem:[%s7543_s6 + $0xf0] sm:$0xff] }
 0x4f6   : > { %2781 = vmatpush.msra.mxu2 %v2674_v19 }
 0x4f8   : > { %2782 = vmatpush.msra.mxu2 %v2672_v4  ;;  %4352 = vmatmul.msk.f32.gmra.mxu3 %vm1382_vm3, %v6428_v11  ;;  %v4725_v11 = vld [vmem:[%s7543_s6 + $0xb0] sm:$0xff]  ;;  %v6601_v29 = vpop.f32.mrf.mxu3 }
 0x4fa   : > { %2783 = vmatpush.msra.mxu2 %v2670_v49 }
 0x4fc   : > { %2784 = vmatpush.msra.mxu2 %v2668_v30 }
 0x4fd   : > { %2727 = vmatmul.f32.vlgmr.msrb.gmra.mxu2 %v4719_v61 }
 0x4fe   : > { %2839 = vmatpush.msrb.mxu2 %v4720_v44 }
 0x500   : > { %2840 = vmatpush.msrb.mxu2 %v4721_v46  ;;  %v6617_v9 = vpop.f32.mrf.mxu3 }
 0x502   : > { %2841 = vmatpush.msrb.mxu2 %v4722_v33 }
 0x504   : > { %2842 = vmatpush.msrb.mxu2 %v4723_v31 }
 0x505   : > { %2730 = vmatmul.f32.gmra.mxu2 %v4724_v18 }
 0x506   : > { %2843 = vmatpush.msrb.mxu2 %v4725_v11  ;;  %v4756_v11 = vld [vmem:[%s7543_s6 + $0x348] sm:$0xff] }
 0x508   : > { %2844 = vmatpush.msrb.mxu2 %v4726_v20  ;;  %v6621_v51 = vpop.f32.mrf.mxu3 }
 0x50a   : > { %2845 = vmatpush.msrb.mxu2 %v4727_v40  ;;  %v4757_v40 = vld [vmem:[%s7543_s6 + $0x338] sm:$0xff] }
 0x50c   : > { %2846 = vmatpush.msrb.mxu2 %v4728_v2 }
 0x50d   : > { %2733 = vmatmul.f32.gmra.mxu2 %v4729_v47 }
 0x50e   : > { %2847 = vmatpush.msrb.mxu2 %v4730_v42 }
 0x510   : > { %2848 = vmatpush.msrb.mxu2 %v4731_v55  ;;  %v6625_v36 = vpop.f32.mrf.mxu3  ;;  %v4759_v55 = vld [vmem:[%s7543_s6 + $0x318] sm:$0xff] }
 0x512   : > { %2849 = vmatpush.msrb.mxu2 %v4732_v21  ;;  %v4760_v21 = vld [vmem:[%s7543_s6 + $0x308] sm:$0xff] }
 0x514   : > { %2850 = vmatpush.msrb.mxu2 %v4733_v25 }
 0x515   : > { %2736 = vmatmul.f32.gmra.mxu2 %v4734_v16 }
 0x516   : > { %2851 = vmatpush.msrb.mxu2 %v4735_v62 }
 0x518   : > { %2852 = vmatpush.msrb.mxu2 %v4736_v52  ;;  %v6629_v10 = vpop.f32.mrf.mxu3  ;;  %v4762_v52 = vld [vmem:[%s7543_s6 + $0x2e8] sm:$0xff] }
 0x51a   : > { %2853 = vmatpush.msrb.mxu2 %v4737_v50  ;;  %v4763_v50 = vld [vmem:[%s7543_s6 + $0x2d8] sm:$0xff] }
 0x51c   : > { %2854 = vmatpush.msrb.mxu2 %v4738_v34 }
 0x51d   : > { %2785 = vmatmul.f32.vlgmr.msra.gmra.mxu2 %v4719_v61 }
 0x51e   : > { %2897 = vmatpush.msra.mxu2 %v4739_v27  ;;  %v4764_v27 = vld [vmem:[%s7543_s6 + $0x2c8] sm:$0xff] }
 0x520   : > { %2898 = vmatpush.msra.mxu2 %v4740_v5  ;;  %v6633_v12 = vpop.f32.mrf.mxu3 }
 0x522   : > { %2899 = vmatpush.msra.mxu2 %v4741_v56  ;;  %v4765_v56 = vld [vmem:[%s7543_s6 + $0x2b8] sm:$0xff] }
 0x524   : > { %2900 = vmatpush.msra.mxu2 %v4742_v57 }
 0x525   : > { %2788 = vmatmul.f32.gmra.mxu2 %v4724_v18  ;;  %v4755_v18 = vld [vmem:[%s7543_s6 + $0x358] sm:$0xff] }
 0x526   : > { %2901 = vmatpush.msra.mxu2 %v4743_v32  ;;  %v4766_v32 = vld [vmem:[%s7543_s6 + $0x2a8] sm:$0xff] }
 0x528   : > { %2902 = vmatpush.msra.mxu2 %v4744_v39  ;;  %v4767_v39 = vld [vmem:[%s7543_s6 + $0x298] sm:$0xff] }
 0x52a   : > { %2903 = vmatpush.msra.mxu2 %v4745_v35  ;;  %v4768_v35 = vld [vmem:[%s7543_s6 + $0x288] sm:$0xff] }
 0x52c   : > { %2904 = vmatpush.msra.mxu2 %v4746_v24  ;;  %v4387_v24 = vld [vmem:[%s7544_s7 + $0x100] sm:$0xff] }
 0x52d   : > { %2791 = vmatmul.f32.gmra.mxu2 %v4729_v47  ;;  %v4758_v47 = vld [vmem:[%s7543_s6 + $0x328] sm:$0xff] }
 0x52e   : > { %2905 = vmatpush.msra.mxu2 %v4747_v15  ;;  %v4769_v15 = vld [vmem:[%s7543_s6 + $0x278] sm:$0xff] }
 0x530   : > { %2906 = vmatpush.msra.mxu2 %v4748_v43  ;;  %v4770_v43 = vld [vmem:[%s7543_s6 + $0x268] sm:$0xff] }
 0x532   : > { %2907 = vmatpush.msra.mxu2 %v4749_v60  ;;  %v4771_v60 = vld [vmem:[%s7543_s6 + $0x388] sm:$0x3f] }
 0x534   : > { %2908 = vmatpush.msra.mxu2 %v4750_v6  ;;  %v4772_v6 = vld [vmem:[%s7543_s6 + $0x378] sm:$0xff] }
 0x535   : > { %2794 = vmatmul.f32.gmra.mxu2 %v4734_v16  ;;  %v4761_v16 = vld [vmem:[%s7543_s6 + $0x2f8] sm:$0xff] }
 0x536   : > { %2909 = vmatpush.msra.mxu2 %v4751_v1  ;;  %v4388_v1 = vld [vmem:[%s7544_s7 + $0x108] sm:$0xff] }
 0x538   : > { %2910 = vmatpush.msra.mxu2 %v4752_v14  ;;  %v4773_v14 = vld [vmem:[%s7543_s6 + $0x368] sm:$0xff] }
 0x53a   : > { %2911 = vmatpush.msra.mxu2 %v4753_v48  ;;  %v4389_v48 = vld [vmem:[%s7544_s7 + $0x110] sm:$0xff] }
 0x53c   : > { %2912 = vmatpush.msra.mxu2 %v4754_v28  ;;  %v4390_v28 = vld [vmem:[%s7544_s7 + $0x118] sm:$0xff] }
 0x540   : > { %v6615_v53 = vpop.f32.mrf.mxu2 }
 0x541   : > { %7628 = vst [vmem:[#allocation61_spill] sm:$0xff] %v6615_v53 }
 0x542   : > { %v2757_v0 = vpop.f32.mrf.mxu3 }
 0x548   : > { %v6619_v58 = vpop.f32.mrf.mxu2 }
 0x549   : > { %7629 = vst [vmem:[#allocation62_spill] sm:$0xff] %v6619_v58 }
 0x54b   : > { %v2760_v7 = vpop.f32.mrf.mxu3 }
 0x550   : > { %v6623_v41 = vpop.f32.mrf.mxu2 }
 0x551   : > { %7630 = vst [vmem:[#allocation63_spill] sm:$0xff] %v6623_v41 }
 0x553   : > { %v2763_v17 = vpop.f32.mrf.mxu3 }
 0x558   : > { %v6627_v3 = vpop.f32.mrf.mxu2 }
 0x55b   : > { %v2766_v38 = vpop.f32.mrf.mxu3 }
 0x560   : > { %v6631_v59 = vpop.f32.mrf.mxu2 }
 0x563   : > { %v2815_v61 = vpop.f32.mrf.mxu3 }
 0x568   : > { %v6635_v45 = vpop.f32.mrf.mxu2 }
 0x56b   : > { %v2818_v31 = vpop.f32.mrf.mxu3 }
 0x570   : > { %v6637_v26 = vpop.f32.mrf.mxu2 }
 0x573   : > { %v2821_v42 = vpop.f32.mrf.mxu3 }
 0x578   : > { %v6639_v22 = vpop.f32.mrf.mxu2 }
 0x57b   : > { %v2824_v34 = vpop.f32.mrf.mxu3 }
 0x580   : > { %v2728_v54 = vpop.f32.mrf.mxu2 }
 0x581   : > { %v6641_v19 = vadd.f32 %v2757_v0, %v2728_v54  ;;  %v4391_v0 = vld [vmem:[%s7544_s7 + $0x120] sm:$0xff]  ;;  %v4393_v54 = vld [vmem:[%s7544_s7 + $0x130] sm:$0xff] }
 0x583   : > { %2855 = vmatmul.f32.vlgmr.msrb.gmra.mxu2 %v6641_v19 }
 0x588   : > { %v2731_v37 = vpop.f32.mrf.mxu2 }
 0x589   : > { %v6644_v4 = vadd.f32 %v2760_v7, %v2731_v37  ;;  %v4392_v7 = vld [vmem:[%s7544_s7 + $0x128] sm:$0xff] }
 0x58b   : > { %2858 = vmatmul.f32.gmra.mxu2 %v6644_v4 }
 0x590   : > { %v2734_v23 = vpop.f32.mrf.mxu2 }
 0x591   : > { %v6647_v49 = vadd.f32 %v2763_v17, %v2734_v23  ;;  %v4394_v17 = vld [vmem:[%s7544_s7 + $0x138] sm:$0xff] }
 0x593   : > { %2861 = vmatmul.f32.gmra.mxu2 %v6647_v49 }
 0x598   : > { %v2737_v30 = vpop.f32.mrf.mxu2 }
 0x599   : > { %v6650_v44 = vadd.f32 %v2766_v38, %v2737_v30 }
 0x59b   : > { %2864 = vmatmul.f32.gmra.mxu2 %v6650_v44 }
 0x59c   : > { %3131 = vmatpush.msrb.mxu2 %v6650_v44 }
 0x59e   : > { %3132 = vmatpush.msrb.mxu2 %v6647_v49 }
 0x5a0   : > { %3133 = vmatpush.msrb.mxu2 %v6644_v4  ;;  %v2786_v46 = vpop.f32.mrf.mxu2 }
 0x5a1   : > { %v6656_v33 = vadd.f32 %v2815_v61, %v2786_v46 }
 0x5a2   : > { %3134 = vmatpush.msrb.mxu2 %v6641_v19 }
 0x5a3   : > { %4354 = vmatmul.msk.f32.vlgmr.msrb.gmra.mxu3 %vm1382_vm3, %v6656_v33  ;;  %2913 = vmatmul.f32.vlgmr.msra.gmra.mxu2 %v6641_v19 }
 0x5a4   : > { %3275 = vmatpush.msra.mxu2 %v4755_v18 }
 0x5a6   : > { %3276 = vmatpush.msra.mxu2 %v4756_v11 }
 0x5a8   : > { %v2789_v20 = vpop.f32.mrf.mxu2  ;;  %3277 = vmatpush.msra.mxu2 %v4757_v40 }
 0x5a9   : > { %v6671_v2 = vadd.f32 %v2818_v31, %v2789_v20 }
 0x5aa   : > { %3278 = vmatpush.msra.mxu2 %v4758_v47 }
 0x5ab   : > { %4355 = vmatmul.msk.f32.gmra.mxu3 %vm1382_vm3, %v6671_v2  ;;  %2916 = vmatmul.f32.gmra.mxu2 %v6644_v4 }
 0x5ac   : > { %3279 = vmatpush.msra.mxu2 %v4759_v55 }
 0x5ae   : > { %3280 = vmatpush.msra.mxu2 %v4760_v21 }
 0x5b0   : > { %v2792_v25 = vpop.f32.mrf.mxu2  ;;  %3281 = vmatpush.msra.mxu2 %v4761_v16 }
 0x5b1   : > { %v6688_v62 = vadd.f32 %v2821_v42, %v2792_v25  ;;  %v4363_v25 = vld [vmem:[%s7544_s7 + $0xc0] sm:$0xff] }
 0x5b2   : > { %3282 = vmatpush.msra.mxu2 %v4762_v52 }
 0x5b3   : > { %4356 = vmatmul.msk.f32.gmra.mxu3 %vm1382_vm3, %v6688_v62  ;;  %2919 = vmatmul.f32.gmra.mxu2 %v6647_v49 }
 0x5b4   : > { %3283 = vmatpush.msra.mxu2 %v4763_v50  ;;  %v4774_v50 = vld [vmem:[%s7543_s6 + $0x350] sm:$0xff] }
 0x5b6   : > { %3284 = vmatpush.msra.mxu2 %v4764_v27  ;;  %v4364_v27 = vld [vmem:[%s7544_s7 + $0xc8] sm:$0xff] }
 0x5b8   : > { %v2795_v5 = vpop.f32.mrf.mxu2  ;;  %3285 = vmatpush.msra.mxu2 %v4765_v56 }
 0x5b9   : > { %v6705_v57 = vadd.f32 %v2824_v34, %v2795_v5  ;;  %v4775_v34 = vld [vmem:[%s7543_s6 + $0x340] sm:$0xff]  ;;  %v4776_v5 = vld [vmem:[%s7543_s6 + $0x330] sm:$0xff] }
 0x5ba   : > { %3286 = vmatpush.msra.mxu2 %v4766_v32  ;;  %v4777_v32 = vld [vmem:[%s7543_s6 + $0x320] sm:$0xff] }
 0x5bb   : > { %4357 = vmatmul.msk.f32.gmra.mxu3 %vm1382_vm3, %v6705_v57  ;;  %2922 = vmatmul.f32.gmra.mxu2 %v6650_v44 }
 0x5bc   : > { %3172 = vmatpush.msrb.mxu3 %v6705_v57  ;;  %3287 = vmatpush.msra.mxu2 %v4767_v39 }
 0x5be   : > { %3173 = vmatpush.msrb.mxu3 %v6688_v62  ;;  %3288 = vmatpush.msra.mxu2 %v4768_v35  ;;  %v4778_v35 = vld [vmem:[%s7543_s6 + $0x310] sm:$0xff] }
 0x5c0   : > { %3174 = vmatpush.msrb.mxu3 %v6671_v2  ;;  %3289 = vmatpush.msra.mxu2 %v4769_v15  ;;  %v4365_v15 = vld [vmem:[%s7544_s7 + $0xd0] sm:$0xff] }
 0x5c2   : > { %3175 = vmatpush.msrb.mxu3 %v6656_v33  ;;  %3290 = vmatpush.msra.mxu2 %v4770_v43  ;;  %v4780_v43 = vld [vmem:[%s7543_s6 + $0x2f0] sm:$0xff] }
 0x5c3   : > { %4359 = vmatmul.msk.f32.vlgmr.msra.gmra.mxu3 %vm1382_vm3, %v6656_v33  ;;  %4395 = vmatmul.msk.f32.vlgmr.msrb.gmra.mxu2 %vm587_vm0, %v4387_v24 }
 0x5c4   : > { %4416 = vmatpush.msk.msra.mxu3 %vm1395_vm2, %v4771_v60 }
 0x5c6   : > { %3318 = vmatpush.msra.mxu3 %v4772_v6  ;;  %v4781_v6 = vld [vmem:[%s7543_s6 + $0x2e0] sm:$0xff] }
 0x5c8   : > { %3319 = vmatpush.msra.mxu3 %v4773_v14 }
 0x5cb   : > { %4360 = vmatmul.msk.f32.gmra.mxu3 %vm1382_vm3, %v6671_v2  ;;  %4396 = vmatmul.msk.f32.gmra.mxu2 %vm587_vm0, %v4388_v1 }
 0x5d3   : > { %4361 = vmatmul.msk.f32.gmra.mxu3 %vm1382_vm3, %v6688_v62  ;;  %4397 = vmatmul.msk.f32.gmra.mxu2 %vm587_vm0, %v4389_v48 }
 0x5db   : > { %4362 = vmatmul.msk.f32.gmra.mxu3 %vm1382_vm3, %v6705_v57  ;;  %4398 = vmatmul.msk.f32.gmra.mxu2 %vm587_vm0, %v4390_v28 }
 0x5e3   : > { %4399 = vmatmul.msk.f32.gmra.mxu2 %vm587_vm0, %v4391_v0  ;;  %4403 = vmatmul.msk.f32.vlgmr.msrb.gmra.mxu3 %vm587_vm0, %v4387_v24  ;;  %v4779_v24 = vld [vmem:[%s7543_s6 + $0x300] sm:$0xff] }
 0x5eb   : > { %4400 = vmatmul.msk.f32.gmra.mxu2 %vm587_vm0, %v4392_v7  ;;  %4404 = vmatmul.msk.f32.gmra.mxu3 %vm587_vm0, %v4388_v1  ;;  %v4782_v1 = vld [vmem:[%s7543_s6 + $0x2d0] sm:$0xff] }
 0x5f3   : > { %4401 = vmatmul.msk.f32.gmra.mxu2 %vm587_vm0, %v4393_v54  ;;  %4405 = vmatmul.msk.f32.gmra.mxu3 %vm587_vm0, %v4389_v48  ;;  %v4783_v48 = vld [vmem:[%s7543_s6 + $0x2c0] sm:$0xff] }
 0x5fb   : > { %4402 = vmatmul.msk.f32.gmra.mxu2 %vm587_vm0, %v4394_v17  ;;  %4406 = vmatmul.msk.f32.gmra.mxu3 %vm587_vm0, %v4390_v28  ;;  %v4366_v28 = vld [vmem:[%s7544_s7 + $0xd8] sm:$0xff] }
 0x603   : > { %4407 = vmatmul.msk.f32.gmra.mxu3 %vm587_vm0, %v4391_v0  ;;  %3291 = vmatmul.f32.vlgmr.msra.gmra.mxu2 %v6641_v19  ;;  %v4784_v0 = vld [vmem:[%s7543_s6 + $0x2b0] sm:$0xff] }
 0x606   : > { %v2856_v37 = vpop.f32.mrf.mxu2 }
 0x60b   : > { %4408 = vmatmul.msk.f32.gmra.mxu3 %vm587_vm0, %v4392_v7  ;;  %3294 = vmatmul.f32.gmra.mxu2 %v6644_v4 }
 0x60e   : > { %v2859_v38 = vpop.f32.mrf.mxu2 }
 0x613   : > { %4409 = vmatmul.msk.f32.gmra.mxu3 %vm587_vm0, %v4393_v54  ;;  %3297 = vmatmul.f32.gmra.mxu2 %v6647_v49 }
 0x616   : > { %v2862_v23 = vpop.f32.mrf.mxu2 }
 0x61b   : > { %4410 = vmatmul.msk.f32.gmra.mxu3 %vm587_vm0, %v4394_v17  ;;  %3300 = vmatmul.f32.gmra.mxu2 %v6650_v44  ;;  %v4785_v17 = vld [vmem:[%s7543_s6 + $0x2a0] sm:$0xff] }
 0x61e   : > { %v2865_v30 = vpop.f32.mrf.mxu2 }
 0x623   : > { %4417 = vmatmul.msk.f32.vlgmr.msra.gmra.mxu3 %vm1382_vm3, %v6656_v33 }
 0x626   : > { %v2885_v61 = vpop.f32.mrf.mxu3  ;;  %v6793_v46 = vpop.f32.mrf.mxu2 }
 0x627   : > { %v2886_v21 = vadd.f32 %v2885_v61, %v2856_v37 }
 0x62b   : > { %4418 = vmatmul.msk.f32.gmra.mxu3 %vm1382_vm3, %v6671_v2 }
 0x62e   : > { %v2888_v31 = vpop.f32.mrf.mxu3  ;;  %v2917_v18 = vpop.f32.mrf.mxu2 }
 0x62f   : > { %v2889_v55 = vadd.f32 %v2888_v31, %v2859_v38  ;;  %v4786_v38 = vld [vmem:[%s7543_s6 + $0x290] sm:$0xff] }
 0x633   : > { %4419 = vmatmul.msk.f32.gmra.mxu3 %vm1382_vm3, %v6688_v62 }
 0x636   : > { %v2891_v11 = vpop.f32.mrf.mxu3  ;;  %v2920_v20 = vpop.f32.mrf.mxu2 }
 0x637   : > { %v2892_v42 = vadd.f32 %v2891_v11, %v2862_v23  ;;  %v4367_v11 = vld [vmem:[%s7544_s7 + $0xe0] sm:$0xff] }
 0x63b   : > { %4420 = vmatmul.msk.f32.gmra.mxu3 %vm1382_vm3, %v6705_v57 }
 0x63e   : > { %v2894_v40 = vpop.f32.mrf.mxu3  ;;  %v2923_v16 = vpop.f32.mrf.mxu2 }
 0x63f   : > { %v2895_v47 = vadd.f32 %v2894_v40, %v2865_v30  ;;  %v4787_v30 = vld [vmem:[%s7543_s6 + $0x280] sm:$0xff] }
 0x640   : > { %v4789_v40 = vld [vmem:[%s7543_s6 + $0x260] sm:$0xff] }
 0x641   : > { %3000 = vmatpush.msrb.mxu0 %v2895_v47  ;;  %v4791_v47 = vld [vmem:[%s7543_s6 + $0x370] sm:$0xff] }
 0x643   : > { %3001 = vmatpush.msrb.mxu0 %v2892_v42  ;;  %v4368_v42 = vld [vmem:[%s7544_s7 + $0xe8] sm:$0xff] }
 0x645   : > { %3002 = vmatpush.msrb.mxu0 %v2889_v55  ;;  %v4792_v55 = vld [vmem:[%s7543_s6 + $0x360] sm:$0xff] }
 0x646   : > { %v2943_v52 = vpop.f32.mrf.mxu3  ;;  %v6820_v39 = vpop.f32.mrf.mxu2 }
 0x647   : > { %3003 = vmatpush.msrb.mxu0 %v2886_v21  ;;  %7631 = vst [vmem:[#allocation64_spill] sm:$0xff] %v6820_v39  ;;  %v2944_v31 = vadd.f32 %v2943_v52, %v6793_v46  ;;  %v4790_v46 = vld [vmem:[%s7543_s6 + $0x380] sm:$0x3f] }
 0x648   : > { %4371 = vmatmul.msk.f32.vlgmr.msrb.gmra.mxu0 %vm587_vm0, %v4363_v25 }
 0x649   : > { %3217 = vmatpush.msra.mxu0 %v4774_v50 }
 0x64b   : > { %3218 = vmatpush.msra.mxu0 %v4775_v34  ;;  %v4370_v34 = vld [vmem:[%s7544_s7 + $0xf8] sm:$0xff] }
 0x64d   : > { %3219 = vmatpush.msra.mxu0 %v4776_v5 }
 0x64e   : > { %v2946_v56 = vpop.f32.mrf.mxu3  ;;  %v6842_v14 = vpop.f32.mrf.mxu2 }
 0x64f   : > { %3220 = vmatpush.msra.mxu0 %v4777_v32  ;;  %7632 = vst [vmem:[#allocation65_spill] sm:$0xff] %v6842_v14  ;;  %v2947_v23 = vadd.f32 %v2946_v56, %v2917_v18 }
 0x650   : > { %4372 = vmatmul.msk.f32.gmra.mxu0 %vm587_vm0, %v4364_v27 }
 0x651   : > { %3221 = vmatpush.msra.mxu0 %v4778_v35 }
 0x653   : > { %3222 = vmatpush.msra.mxu0 %v4779_v24 }
 0x655   : > { %3223 = vmatpush.msra.mxu0 %v4780_v43  ;;  %v6932_v43 = vpop.permute.xlu0 %747 }
 0x656   : > { %v2949_v60 = vpop.f32.mrf.mxu3  ;;  %v6863_v61 = vpop.f32.mrf.mxu2 }
 0x657   : > { %3224 = vmatpush.msra.mxu0 %v4781_v6  ;;  %v2950_v37 = vadd.f32 %v2949_v60, %v2920_v20  ;;  %7633 = vst [vmem:[#allocation66_spill] sm:$0xff] %v6863_v61  ;;  %v4788_v20 = vld [vmem:[%s7543_s6 + $0x270] sm:$0xff] }
 0x658   : > { %4373 = vmatmul.msk.f32.gmra.mxu0 %vm587_vm0, %v4365_v15 }
 0x659   : > { %3225 = vmatpush.msra.mxu0 %v4782_v1 }
 0x65b   : > { %3226 = vmatpush.msra.mxu0 %v4783_v48 }
 0x65d   : > { %3227 = vmatpush.msra.mxu0 %v4784_v0  ;;  %v6938_v1 = vpop.permute.xlu0 %901 }
 0x65e   : > { %v2952_v7 = vpop.f32.mrf.mxu3  ;;  %v6892_v21 = vpop.f32.mrf.mxu2 }
 0x65f   : > { %v2953_v54 = vadd.f32 %v2952_v7, %v2923_v16  ;;  %3228 = vmatpush.msra.mxu0 %v4785_v17  ;;  %7634 = vst [vmem:[#allocation67_spill] sm:$0xff] %v6892_v21  ;;  %v4369_v16 = vld [vmem:[%s7544_s7 + $0xf0] sm:$0xff] }
 0x660   : > { %4374 = vmatmul.msk.f32.gmra.mxu0 %vm587_vm0, %v4366_v28 }
 0x661   : > { %3041 = vmatpush.msrb.mxu1 %v2953_v54  ;;  %3229 = vmatpush.msra.mxu0 %v4786_v38 }
 0x663   : > { %3042 = vmatpush.msrb.mxu1 %v2950_v37  ;;  %3230 = vmatpush.msra.mxu0 %v4787_v30  ;;  %v6968_v30 = vld [vmem:[%s7544_s7 + $0x148] sm:$0xff] }
 0x665   : > { %3043 = vmatpush.msrb.mxu1 %v2947_v23  ;;  %3231 = vmatpush.msra.mxu0 %v4788_v20  ;;  %v6979_v20 = vld [vmem:[%s7544_s7 + $0x150] sm:$0xff] }
 0x666   : > { %v6872_v18 = vpop.f32.mrf.mxu3  ;;  %v6903_v50 = vpop.f32.mrf.mxu2 }
 0x667   : > { %3044 = vmatpush.msrb.mxu1 %v2944_v31  ;;  %3232 = vmatpush.msra.mxu0 %v4789_v40  ;;  %7635 = vst [vmem:[#allocation68_spill] sm:$0xff] %v6903_v50 }
 0x668   : > { %4375 = vmatmul.msk.f32.gmra.mxu0 %vm587_vm0, %v4367_v11  ;;  %4379 = vmatmul.msk.f32.vlgmr.msrb.gmra.mxu1 %vm587_vm0, %v4363_v25 }
 0x669   : > { %4411 = vmatpush.msk.msra.mxu1 %vm1395_vm2, %v4790_v46 }
 0x66b   : > { %3260 = vmatpush.msra.mxu1 %v4791_v47 }
 0x66d   : > { %3261 = vmatpush.msra.mxu1 %v4792_v55  ;;  %v6996_v55 = vld [vmem:[%s7544_s7 + $0x158] sm:$0xff] }
 0x66e   : > { %v6894_v25 = vpop.f32.mrf.mxu3 }
 0x670   : > { %4376 = vmatmul.msk.f32.gmra.mxu0 %vm587_vm0, %v4368_v42  ;;  %4380 = vmatmul.msk.f32.gmra.mxu1 %vm587_vm0, %v4364_v27  ;;  %v6914_v27 = vpop.f32.mrf.mxu2 }
 0x671   : > { %7636 = vst [vmem:[#allocation69_spill] sm:$0xff] %v6914_v27  ;;  %v7678_v27 = vld [vmem:[#allocation16_spill] sm:$0xff] }
 0x676   : > { %v6901_v52 = vpop.f32.mrf.mxu3 }
 0x678   : > { %4377 = vmatmul.msk.f32.gmra.mxu0 %vm587_vm0, %v4369_v16  ;;  %4381 = vmatmul.msk.f32.gmra.mxu1 %vm587_vm0, %v4365_v15  ;;  %v6920_v32 = vpop.f32.mrf.mxu2 }
 0x679   : > { %7637 = vst [vmem:[#allocation70_spill] sm:$0xff] %v6920_v32 }
 0x67e   : > { %v6910_v5 = vpop.f32.mrf.mxu3 }
 0x680   : > { %4378 = vmatmul.msk.f32.gmra.mxu0 %vm587_vm0, %v4370_v34  ;;  %4382 = vmatmul.msk.f32.gmra.mxu1 %vm587_vm0, %v4366_v28  ;;  %v6926_v24 = vpop.f32.mrf.mxu2 }
 0x681   : > { %7638 = vst [vmem:[#allocation71_spill] sm:$0xff] %v6926_v24 }
 0x686   : > { %v6916_v56 = vpop.f32.mrf.mxu3 }
 0x688   : > { %4383 = vmatmul.msk.f32.gmra.mxu1 %vm587_vm0, %v4367_v11  ;;  %3233 = vmatmul.f32.vlgmr.msra.gmra.mxu0 %v6641_v19  ;;  %v3292_v19 = vpop.f32.mrf.mxu2 }
 0x68e   : > { %v6922_v35 = vpop.f32.mrf.mxu3 }
 0x690   : > { %4384 = vmatmul.msk.f32.gmra.mxu1 %vm587_vm0, %v4368_v42  ;;  %3236 = vmatmul.f32.gmra.mxu0 %v6644_v4  ;;  %v3295_v4 = vpop.f32.mrf.mxu2 }
 0x696   : > { %v6928_v15 = vpop.f32.mrf.mxu3 }
 0x698   : > { %4385 = vmatmul.msk.f32.gmra.mxu1 %vm587_vm0, %v4369_v16  ;;  %3239 = vmatmul.f32.gmra.mxu0 %v6647_v49  ;;  %v6944_v49 = vpop.permute.xlu0 %737  ;;  %v3298_v28 = vpop.f32.mrf.mxu2  ;;  %v7644_v16 = vld [vmem:[#allocation52_spill] sm:$0xff] }
 0x69e   : > { %v6934_v60 = vpop.f32.mrf.mxu3 }
 0x6a0   : > { %4386 = vmatmul.msk.f32.gmra.mxu1 %vm587_vm0, %v4370_v34  ;;  %3242 = vmatmul.f32.gmra.mxu0 %v6650_v44  ;;  %v6948_v7 = vpop.permute.xlu0 %896  ;;  %v3301_v44 = vpop.f32.mrf.mxu2 }
 0x6a6   : > { %v3321_v6 = vpop.f32.mrf.mxu3 }
 0x6a7   : > { %v3322_v38 = vadd.f32 %v3321_v6, %v3292_v19  ;;  %v7645_v19 = vld [vmem:[#allocation24_spill] sm:$0xff] }
 0x6a8   : > { %4412 = vmatmul.msk.f32.vlgmr.msra.gmra.mxu1 %vm1382_vm3, %v6656_v33  ;;  %v7003_v6 = vadd.f32 %v7645_v19, %v6944_v49 }
 0x6aa   : > { %7646 = vst [vmem:[#allocation52_spill] sm:$0xff] %v7003_v6 }
 0x6ae   : > { %v3324_v48 = vpop.f32.mrf.mxu3 }
 0x6af   : > { %v3325_v37 = vadd.f32 %v3324_v48, %v3295_v4 }
 0x6b0   : > { %4413 = vmatmul.msk.f32.gmra.mxu1 %vm1382_vm3, %v6671_v2  ;;  %v6952_v2 = vpop.permute.xlu0 %732 }
 0x6b1   : > { %v6987_v46 = vadd.f32 %v5622_v13, %v6952_v2  ;;  %v7647_v13 = vld [vmem:[#allocation36_spill] sm:$0xff] }
 0x6b3   : > { %7642 = vst [vmem:[#allocation75_spill] sm:$0xff] %v6987_v46 }
 0x6b6   : > { %v3327_v0 = vpop.f32.mrf.mxu3 }
 0x6b7   : > { %v3328_v33 = vadd.f32 %v3327_v0, %v3298_v28  ;;  %v7008_v28 = vpop.permute.xlu1 %742 }
 0x6b8   : > { %4414 = vmatmul.msk.f32.gmra.mxu1 %vm1382_vm3, %v6688_v62  ;;  %v6959_v62 = vld [vmem:[%s7544_s7 + $0x140] sm:$0xff]  ;;  %v6970_v31 = vpop.permute.xlu0 %891 }
 0x6b9   : > { %v914_v48 = vadd.f32 %v6970_v31, %v7003_v6 }
 0x6be   : > { %v3330_v54 = vpop.f32.mrf.mxu3 }
 0x6bf   : > { %v3331_v17 = vadd.f32 %v3330_v54, %v3301_v44 }
 0x6c0   : > { %4415 = vmatmul.msk.f32.gmra.mxu1 %vm1382_vm3, %v6705_v57  ;;  %v6983_v40 = vpop.permute.xlu0 %886 }
 0x6c1   : > { %3419 = vmatpush.msrb.mxu1 %v3331_v17  ;;  %v912_v47 = vadd.f32 %v6983_v40, %v6987_v46  ;;  %v7016_v17 = vld [vmem:[%s7544_s7 + $0x160] sm:$0xff] }
 0x6c3   : > { %3420 = vmatpush.msrb.mxu1 %v3328_v33  ;;  %v1812_v34 = vadd.f32 %v7644_v16, %v912_v47  ;;  %v7648_v33 = vld [vmem:[#allocation54_spill] sm:$0xff] }
 0x6c4   : > { %v7650_v47 = vld [vmem:[#allocation26_spill] sm:$0xff] }
 0x6c5   : > { %v6954_v23 = vpop.f32.mrf.mxu0  ;;  %3421 = vmatpush.msrb.mxu1 %v3325_v37  ;;  %v1943_v4 = vadd.f32 %v7647_v13, %v1812_v34  ;;  %v1814_v37 = vadd.f32 %v7648_v33, %v914_v48  ;;  %v7023_v16 = vadd.f32 %v7650_v47, %v7008_v28  ;;  %v7036_v48 = vld [vmem:[%s7544_s7 + $0x168] sm:$0xff] }
 0x6c6   : > { %7639 = vst [vmem:[#allocation72_spill] sm:$0xff] %v6954_v23 }
 0x6c7   : > { %3422 = vmatpush.msrb.mxu1 %v3322_v38  ;;  %v2235_v0 = vadd.f32 %v6631_v59, %v1943_v4  ;;  %7651 = vst [vmem:[#allocation36_spill] sm:$0xff] %v7023_v16  ;;  %v7652_v59 = vld [vmem:[#allocation38_spill] sm:$0xff]  ;;  %v916_v19 = vadd.f32 %v6948_v7, %v7023_v16 }
 0x6c8   : > { %4437 = vmatmul.msk.f32.vlgmr.msrb.gmra.mxu1 %vm587_vm0, %v6959_v62  ;;  %v1945_v34 = vadd.f32 %v7652_v59, %v1814_v37  ;;  %v7655_v37 = vld [vmem:[#allocation28_spill] sm:$0xff] }
 0x6c9   : > { %v7045_v47 = vadd.f32 %v7655_v37, %v6932_v43 }
 0x6ca   : > { %v2237_v13 = vadd.f32 %v6635_v45, %v1945_v34  ;;  %v7657_v45 = vld [vmem:[#allocation40_spill] sm:$0xff] }
 0x6cb   : > { %7656 = vst [vmem:[#allocation26_spill] sm:$0xff] %v7045_v47  ;;  %v918_v34 = vadd.f32 %v6938_v1, %v7045_v47  ;;  %v7070_v47 = vld [vmem:[%s7544_s7 + $0x178] sm:$0xff] }
 0x6cd   : > { %v6963_v57 = vpop.f32.mrf.mxu0 }
 0x6ce   : > { %7640 = vst [vmem:[#allocation73_spill] sm:$0xff] %v6963_v57 }
 0x6d0   : > { %4438 = vmatmul.msk.f32.gmra.mxu1 %vm587_vm0, %v6968_v30 }
 0x6d5   : > { %v6974_v11 = vpop.f32.mrf.mxu0 }
 0x6d6   : > { %7641 = vst [vmem:[#allocation74_spill] sm:$0xff] %v6974_v11  ;;  %v7088_v11 = vpop.permute.xlu2 %727 }
 0x6d8   : > { %4439 = vmatmul.msk.f32.gmra.mxu1 %vm587_vm0, %v6979_v20 }
 0x6dd   : > { %v6991_v42 = vpop.f32.mrf.mxu0 }
 0x6de   : > { %7643 = vst [vmem:[#allocation76_spill] sm:$0xff] %v6991_v42  ;;  %v7684_v42 = vld [vmem:[#allocation39_spill] sm:$0xff] }
 0x6e0   : > { %4440 = vmatmul.msk.f32.gmra.mxu1 %vm587_vm0, %v6996_v55 }
 0x6e5   : > { %v3017_v44 = vpop.f32.mrf.mxu0  ;;  %v7011_v54 = vpop.f32.mrf.mxu1 }
 0x6e6   : > { %v7019_v38 = vadd.f32 %v3017_v44, %v2235_v0  ;;  %v7653_v0 = vld [vmem:[#allocation56_spill] sm:$0xff] }
 0x6e7   : > { %v1816_v44 = vadd.f32 %v7653_v0, %v916_v19  ;;  %v7056_v19 = vld [vmem:[%s7544_s7 + $0x170] sm:$0xff] }
 0x6e8   : > { %7649 = vst [vmem:[#allocation24_spill] sm:$0xff] %v7019_v38  ;;  %4441 = vmatmul.msk.f32.gmra.mxu1 %vm587_vm0, %v7016_v17 }
 0x6e9   : > { %v1947_v59 = vadd.f32 %v7657_v45, %v1816_v44  ;;  %v7659_v44 = vld [vmem:[#allocation42_spill] sm:$0xff] }
 0x6eb   : > { %v2239_v6 = vadd.f32 %v6637_v26, %v1947_v59 }
 0x6ed   : > { %v3020_v4 = vpop.f32.mrf.mxu0  ;;  %v7031_v46 = vpop.f32.mrf.mxu1 }
 0x6ee   : > { %v7039_v33 = vadd.f32 %v3020_v4, %v2237_v13  ;;  %v7658_v13 = vld [vmem:[#allocation58_spill] sm:$0xff] }
 0x6ef   : > { %v1818_v4 = vadd.f32 %v7658_v13, %v918_v34 }
 0x6f0   : > { %7654 = vst [vmem:[#allocation54_spill] sm:$0xff] %v7039_v33  ;;  %4442 = vmatmul.msk.f32.gmra.mxu1 %vm587_vm0, %v7036_v48 }
 0x6f1   : > { %v1949_v37 = vadd.f32 %v7659_v44, %v1818_v4 }
 0x6f3   : > { %v2241_v45 = vadd.f32 %v6639_v22, %v1949_v37 }
 0x6f5   : > { %v3023_v16 = vpop.f32.mrf.mxu0  ;;  %v7051_v39 = vpop.f32.mrf.mxu1 }
 0x6f6   : > { %v7059_v0 = vadd.f32 %v3023_v16, %v2239_v6 }
 0x6f8   : > { %4443 = vmatmul.msk.f32.gmra.mxu1 %vm587_vm0, %v7056_v19 }
 0x6fd   : > { %v3026_v26 = vpop.f32.mrf.mxu0  ;;  %v7065_v59 = vpop.f32.mrf.mxu1 }
 0x6fe   : > { %v7072_v14 = vadd.f32 %v3026_v26, %v2241_v45 }
 0x700   : > { %7660 = vst [vmem:[#allocation38_spill] sm:$0xff] %v7072_v14  ;;  %4444 = vmatmul.msk.f32.gmra.mxu1 %vm587_vm0, %v7070_v47  ;;  %v7670_v14 = vld [vmem:[#allocation20_spill] sm:$0xff] }
 0x705   : > { %v7076_v6 = vpop.f32.mrf.mxu1  ;;  %v3234_v13 = vpop.f32.mrf.mxu0 }
 0x70d   : > { %v7078_v16 = vpop.f32.mrf.mxu1  ;;  %v3237_v44 = vpop.f32.mrf.mxu0 }
 0x715   : > { %v7080_v34 = vpop.f32.mrf.mxu1  ;;  %v3240_v61 = vpop.f32.mrf.mxu0 }
 0x71d   : > { %v7082_v22 = vpop.f32.mrf.mxu1  ;;  %v3243_v21 = vpop.f32.mrf.mxu0 }
 0x725   : > { %v3263_v4 = vpop.f32.mrf.mxu1 }
 0x726   : > { %v3264_v50 = vadd.f32 %v3263_v4, %v3234_v13  ;;  %v7663_v4 = vld [vmem:[#allocation27_spill] sm:$0xff] }
 0x72d   : > { %v3266_v37 = vpop.f32.mrf.mxu1 }
 0x72e   : > { %v3267_v53 = vadd.f32 %v3266_v37, %v3237_v44  ;;  %v7122_v44 = vadd.f32 %v7663_v4, %v6932_v43  ;;  %v7669_v43 = vld [vmem:[#allocation59_spill] sm:$0xff] }
 0x730   : > { %7664 = vst [vmem:[#allocation28_spill] sm:$0xff] %v7122_v44 }
 0x735   : > { %v3269_v23 = vpop.f32.mrf.mxu1 }
 0x736   : > { %v3270_v57 = vadd.f32 %v3269_v23, %v3240_v61  ;;  %v7096_v61 = vpop.permute.xlu2 %722 }
 0x73d   : > { %v3272_v45 = vpop.f32.mrf.mxu1 }
 0x73e   : > { %v3273_v26 = vadd.f32 %v3272_v45, %v3243_v21  ;;  %v7106_v23 = vpop.permute.xlu2 %717 }
 0x740   : > { %3378 = vmatpush.msrb.mxu0 %v3273_v26  ;;  %v919_v26 = vadd.f32 %v6938_v1, %v7122_v44  ;;  %v7672_v1 = vld [vmem:[#allocation57_spill] sm:$0xff]  ;;  %v7673_v44 = vld [vmem:[#allocation60_spill] sm:$0xff] }
 0x742   : > { %3379 = vmatpush.msrb.mxu0 %v3270_v57 }
 0x744   : > { %3380 = vmatpush.msrb.mxu0 %v3267_v53 }
 0x745   : > { %v7084_v38 = vpop.f32.mrf.mxu1 }
 0x746   : > { %3381 = vmatpush.msrb.mxu0 %v3264_v50  ;;  %v7102_v50 = vpop.permute.xlu0 %881 }
 0x747   : > { %4429 = vmatmul.msk.f32.vlgmr.msrb.gmra.mxu0 %vm587_vm0, %v6959_v62 }
 0x74d   : > { %v7090_v58 = vpop.f32.mrf.mxu1 }
 0x74e   : > { %v7112_v57 = vpop.permute.xlu0 %876 }
 0x74f   : > { %4430 = vmatmul.msk.f32.gmra.mxu0 %vm587_vm0, %v6968_v30  ;;  %v7661_v30 = vld [vmem:[#allocation25_spill] sm:$0xff] }
 0x750   : > { %v7116_v13 = vadd.f32 %v7661_v30, %v7008_v28  ;;  %v7667_v28 = vld [vmem:[#allocation22_spill] sm:$0xff] }
 0x751   : > { %v7134_v30 = vadd.f32 %v7667_v28, %v6952_v2  ;;  %v1819_v2 = vadd.f32 %v7673_v44, %v919_v26  ;;  %v7674_v28 = vld [vmem:[#allocation18_spill] sm:$0xff] }
 0x752   : > { %7662 = vst [vmem:[#allocation56_spill] sm:$0xff] %v7116_v13  ;;  %v917_v45 = vadd.f32 %v6948_v7, %v7116_v13  ;;  %v7151_v13 = vadd.f32 %v7674_v28, %v7096_v61 }
 0x753   : > { %7668 = vst [vmem:[#allocation58_spill] sm:$0xff] %v7134_v30  ;;  %v913_v7 = vadd.f32 %v6983_v40, %v7134_v30  ;;  %v7161_v40 = vadd.f32 %v7678_v27, %v7106_v23  ;;  %v7681_v30 = vld [vmem:[#allocation41_spill] sm:$0xff] }
 0x754   : > { %v1817_v4 = vadd.f32 %v7669_v43, %v917_v45  ;;  %7675 = vst [vmem:[#allocation25_spill] sm:$0xff] %v7151_v13  ;;  %v909_v26 = vadd.f32 %v7112_v57, %v7151_v13 }
 0x755   : > { %v7094_v21 = vpop.f32.mrf.mxu1 }
 0x756   : > { %v7155_v45 = vpop.permute.xlu0 %871 }
 0x757   : > { %4431 = vmatmul.msk.f32.gmra.mxu0 %vm587_vm0, %v6979_v20  ;;  %v7118_v20 = vpop.permute.xlu2 %712  ;;  %v907_v27 = vadd.f32 %v7155_v45, %v7161_v40 }
 0x75d   : > { %v7100_v53 = vpop.f32.mrf.mxu1 }
 0x75f   : > { %4432 = vmatmul.msk.f32.gmra.mxu0 %vm587_vm0, %v6996_v55  ;;  %v7665_v55 = vld [vmem:[#allocation23_spill] sm:$0xff] }
 0x760   : > { %v7126_v37 = vadd.f32 %v7665_v55, %v6944_v49  ;;  %v7141_v49 = vadd.f32 %v7670_v14, %v7088_v11  ;;  %v7676_v14 = vld [vmem:[#allocation55_spill] sm:$0xff] }
 0x761   : > { %v1813_v43 = vadd.f32 %v7676_v14, %v913_v7  ;;  %v7683_v14 = vld [vmem:[#allocation51_spill] sm:$0xff] }
 0x762   : > { %7666 = vst [vmem:[#allocation40_spill] sm:$0xff] %v7126_v37  ;;  %v915_v24 = vadd.f32 %v6970_v31, %v7126_v37  ;;  %v911_v31 = vadd.f32 %v7102_v50, %v7141_v49  ;;  %v7677_v37 = vld [vmem:[#allocation43_spill] sm:$0xff]  ;;  %v1809_v41 = vadd.f32 %v7683_v14, %v909_v26 }
 0x763   : > { %7671 = vst [vmem:[#allocation42_spill] sm:$0xff] %v7141_v49  ;;  %v7170_v49 = vpop.permute.xlu2 %866  ;;  %v1944_v32 = vadd.f32 %v7684_v42, %v1813_v43  ;;  %v7688_v43 = vld [vmem:[#allocation35_spill] sm:$0xff] }
 0x764   : > { %v1815_v55 = vadd.f32 %v7672_v1, %v915_v24  ;;  %v7679_v24 = vld [vmem:[#allocation14_spill] sm:$0xff]  ;;  %v7680_v1 = vld [vmem:[#allocation53_spill] sm:$0xff] }
 0x765   : > { %v7108_v62 = vpop.f32.mrf.mxu1  ;;  %v7165_v44 = vadd.f32 %v7679_v24, %v7118_v20  ;;  %v1811_v28 = vadd.f32 %v7680_v1, %v911_v31  ;;  %v2236_v26 = vadd.f32 %v6621_v51, %v1944_v32 }
 0x766   : > { %v1946_v33 = vadd.f32 %v7681_v30, %v1815_v55 }
 0x767   : > { %4433 = vmatmul.msk.f32.gmra.mxu0 %vm587_vm0, %v7016_v17  ;;  %v905_v30 = vadd.f32 %v7170_v49, %v7165_v44 }
 0x768   : > { %v2238_v13 = vadd.f32 %v6625_v36, %v1946_v33  ;;  %v7687_v33 = vld [vmem:[#allocation48_spill] sm:$0xff] }
 0x76a   : > { %v3081_v42 = vadd.f32 %v7078_v16, %v2238_v13  ;;  %v7690_v13 = vld [vmem:[#allocation32_spill] sm:$0xff] }
 0x76c   : > { %v3212_v32 = vadd.f32 %v6922_v35, %v3081_v42 }
 0x76d   : > { %v3439_v17 = vpop.f32.mrf.mxu1 }
 0x76f   : > { %4434 = vmatmul.msk.f32.gmra.mxu0 %vm587_vm0, %v7036_v48  ;;  %v1948_v48 = vadd.f32 %v7677_v37, %v1817_v4  ;;  %v7682_v37 = vld [vmem:[#allocation44_spill] sm:$0xff] }
 0x770   : > { %v1950_v4 = vadd.f32 %v7682_v37, %v1819_v2  ;;  %v7686_v2 = vld [vmem:[#allocation37_spill] sm:$0xff]  ;;  %v3079_v37 = vadd.f32 %v7076_v6, %v2236_v26 }
 0x771   : > { %v2240_v7 = vadd.f32 %v6629_v10, %v1948_v48  ;;  %v7685_v10 = vld [vmem:[#allocation50_spill] sm:$0xff]  ;;  %v1942_v48 = vadd.f32 %v7686_v2, %v1811_v28 }
 0x772   : > { %v2242_v31 = vadd.f32 %v6633_v12, %v1950_v4  ;;  %v1807_v55 = vadd.f32 %v7685_v10, %v907_v27  ;;  %v1805_v12 = vadd.f32 %v7687_v33, %v905_v30  ;;  %v7689_v28 = vld [vmem:[#allocation34_spill] sm:$0xff]  ;;  %v7236_v33 = vld [vmem:[%s7548_s11 + $0x10] sm:$0xff] }
 0x773   : > { %v3083_v1 = vadd.f32 %v7080_v34, %v2240_v7  ;;  %v2234_v34 = vadd.f32 %v6617_v9, %v1942_v48  ;;  %v1940_v7 = vadd.f32 %v7688_v43, %v1809_v41  ;;  %v7257_v43 = vld [vmem:[%s7548_s11 + $0x28] sm:$0xff] }
 0x774   : > { %v3085_v36 = vadd.f32 %v7082_v22, %v2242_v31  ;;  %v1938_v27 = vadd.f32 %v7689_v28, %v1807_v55  ;;  %v1936_v14 = vadd.f32 %v7690_v13, %v1805_v12  ;;  %v3459_v31 = vadd.f32 %v3439_v17, %v3212_v32  ;;  %v7243_v12 = vld [vmem:[%s7548_s11 + $0x18] sm:$0xff] }
 0x775   : > { %v3442_v24 = vpop.f32.mrf.mxu1  ;;  %v3214_v4 = vadd.f32 %v6928_v15, %v3083_v1  ;;  %v2232_v51 = vadd.f32 %v6601_v29, %v1940_v7  ;;  %v3210_v15 = vadd.f32 %v6916_v56, %v3079_v37  ;;  %v7264_v7 = vld [vmem:[%s7548_s11 + $0x30] sm:$0xff] }
 0x776   : > { %v3216_v22 = vadd.f32 %v6934_v60, %v3085_v36  ;;  %v2230_v9 = vadd.f32 %v6584_v63, %v1938_v27  ;;  %vm3475_vm6 = vcmp.ge.f32.partialorder %v3459_v31, 0.0  ;;  %v7229_v36 = vld [vmem:[%s7548_s11 + $0x8] sm:$0xff] }
 0x777   : > { %4435 = vmatmul.msk.f32.gmra.mxu0 %vm587_vm0, %v7056_v19  ;;  %v3077_v19 = vadd.f32 %v7065_v59, %v2234_v34  ;;  %v3461_v16 = vadd.f32 %v3442_v24, %v3214_v4  ;;  %v3075_v6 = vadd.f32 %v7051_v39, %v2232_v51  ;;  %v2228_v59 = vadd.f32 %v6567_v8, %v1936_v14  ;;  %v7250_v34 = vld [vmem:[%s7548_s11 + $0x20] sm:$0xff]  ;;  %v7273_v4 = vld [vmem:[%s7548_s11 + $0x38] sm:$0xff]  ;;  %v7692_v14 = vld [vmem:[#allocation19_spill] sm:$0xff] }
 0x778   : > { %v3073_v29 = vadd.f32 %v7031_v46, %v2230_v9  ;;  %v3457_v60 = vadd.f32 %v7108_v62, %v3210_v15  ;;  %v3491_v8 = vmul.f32 0.1, %v3459_v31  ;;  %v7285_v9 = vadd.f32 %v7692_v14, %v7096_v61  ;;  %v7694_v15 = vld [vmem:[#allocation15_spill] sm:$0xff] }
 0x779   : > { %v3208_v35 = vadd.f32 %v6910_v5, %v3077_v19  ;;  %v3493_v24 = vmul.f32 0.1, %v3461_v16  ;;  %v3071_v39 = vadd.f32 %v7011_v54, %v2228_v59  ;;  %vm3477_vm5 = vcmp.ge.f32.partialorder %v3461_v16, 0.0 }
 0x77a   : > { %v3206_v56 = vadd.f32 %v6901_v52, %v3075_v6  ;;  %v3204_v5 = vadd.f32 %v6894_v25, %v3073_v29  ;;  %vm3473_vm7 = vcmp.ge.f32.partialorder %v3457_v60, 0.0  ;;  %v3507_v52 = vsel %vm3475_vm6, %v3459_v31, %v3491_v8  ;;  %v7700_v8 = vld [vmem:[#allocation31_spill] sm:$0xff] }
 0x77b   : > { %v3455_v17 = vadd.f32 %v7100_v53, %v3208_v35  ;;  %v3509_v62 = vsel %vm3477_vm5, %v3461_v16, %v3493_v24  ;;  %v3202_v10 = vadd.f32 %v6872_v18, %v3071_v39  ;;  %v7691_v16 = vld [vmem:[#allocation21_spill] sm:$0xff]  ;;  %v7293_v31 = vadd.f32 %v7694_v15, %v7118_v20  ;;  %v7696_v35 = vld [vmem:[#allocation47_spill] sm:$0xff] }
 0x77c   : > { %v3453_v46 = vadd.f32 %v7094_v21, %v3206_v56  ;;  %v3451_v54 = vadd.f32 %v7090_v58, %v3204_v5  ;;  %v7222_v58 = vld [vmem:[%s7548_s11] sm:$0xff]  ;;  %v7699_v20 = vld [vmem:[#allocation45_spill] sm:$0xff] }
 0x77d   : > { %v3445_v41 = vpop.f32.mrf.mxu1  ;;  %v3487_v55 = vmul.f32 0.1, %v3455_v17  ;;  %vm3471_vm8 = vcmp.ge.f32.partialorder %v3455_v17, 0.0  ;;  %v3449_v53 = vadd.f32 %v7084_v38, %v3202_v10  ;;  %v7704_v10 = vld [vmem:[#allocation63_spill] sm:$0xff] }
 0x77e   : > { %v3463_v1 = vadd.f32 %v3445_v41, %v3216_v22  ;;  %v3485_v2 = vmul.f32 0.1, %v3453_v46  ;;  %vm3469_vm9 = vcmp.ge.f32.partialorder %v3453_v46, 0.0  ;;  %v3483_v25 = vmul.f32 0.1, %v3451_v54  ;;  %v7693_v41 = vld [vmem:[#allocation17_spill] sm:$0xff] }
 0x77f   : > { %4436 = vmatmul.msk.f32.gmra.mxu0 %vm587_vm0, %v7070_v47  ;;  %v3489_v47 = vmul.f32 0.1, %v3457_v60  ;;  %v3503_v21 = vsel %vm3471_vm8, %v3455_v17, %v3487_v55  ;;  %vm3467_vm10 = vcmp.ge.f32.partialorder %v3451_v54, 0.0  ;;  %v3481_v26 = vmul.f32 0.1, %v3449_v53  ;;  %v7706_v55 = vld [vmem:[#allocation69_spill] sm:$0xff] }
 0x780   : > { %vm3479_vm4 = vcmp.ge.f32.partialorder %v3463_v1, 0.0  ;;  %v3495_v63 = vmul.f32 0.1, %v3463_v1  ;;  %v3501_v42 = vsel %vm3469_vm9, %v3453_v46, %v3485_v2  ;;  %vm3465_vm11 = vcmp.ge.f32.partialorder %v3449_v53, 0.0  ;;  %v7707_v2 = vld [vmem:[#allocation38_spill] sm:$0xff] }
 0x781   : > { %v3505_v48 = vsel %vm3473_vm7, %v3457_v60, %v3489_v47  ;;  %v3499_v18 = vsel %vm3467_vm10, %v3451_v54, %v3483_v25  ;;  %v3497_v38 = vsel %vm3465_vm11, %v3449_v53, %v3481_v26  ;;  %v7279_v22 = vadd.f32 %v7691_v16, %v7088_v11  ;;  %v7703_v47 = vld [vmem:[#allocation76_spill] sm:$0xff]  ;;  %v7710_v26 = vld [vmem:[#allocation62_spill] sm:$0xff] }
 0x782   : > { %v3511_v30 = vsel %vm3479_vm4, %v3463_v1, %v3495_v63  ;;  %v7289_v6 = vadd.f32 %v7693_v41, %v7106_v23  ;;  %v7695_v1 = vld [vmem:[#allocation49_spill] sm:$0xff]  ;;  %v908_v11 = vadd.f32 %v7112_v57, %v7285_v9  ;;  %v904_v60 = vadd.f32 %v7170_v49, %v7293_v31  ;;  %v7697_v23 = vld [vmem:[#allocation46_spill] sm:$0xff]  ;;  %v7712_v16 = vld [vmem:[#allocation24_spill] sm:$0xff] }
 0x783   : > { %3642 = vmatpush.msrb.mxu3 %v3511_v30  ;;  %v910_v13 = vadd.f32 %v7102_v50, %v7279_v22  ;;  %v7698_v63 = vld [vmem:[#allocation33_spill] sm:$0xff]  ;;  %v7701_v57 = vld [vmem:[#allocation70_spill] sm:$0xff] }
 0x784   : > { %v906_v50 = vadd.f32 %v7155_v45, %v7289_v6  ;;  %v1808_v61 = vadd.f32 %v7696_v35, %v908_v11  ;;  %v1804_v56 = vadd.f32 %v7699_v20, %v904_v60  ;;  %v3213_v5 = vadd.f32 %v7701_v57, %v7059_v0  ;;  %v7702_v45 = vld [vmem:[#allocation30_spill] sm:$0xff]  ;;  %v7715_v11 = vld [vmem:[#allocation73_spill] sm:$0xff] }
 0x785   : > { %3643 = vmatpush.msrb.mxu3 %v3509_v62  ;;  %v1810_v59 = vadd.f32 %v7695_v1, %v910_v13  ;;  %v7705_v49 = vld [vmem:[#allocation54_spill] sm:$0xff]  ;;  %v7713_v13 = vld [vmem:[#allocation68_spill] sm:$0xff]  ;;  %v7714_v1 = vld [vmem:[#allocation61_spill] sm:$0xff] }
 0x786   : > { %v1806_v24 = vadd.f32 %v7697_v23, %v906_v50  ;;  %v1939_v30 = vadd.f32 %v7700_v8, %v1808_v61  ;;  %v3209_v14 = vadd.f32 %v7713_v13, %v7712_v16  ;;  %v7721_v13 = vld [vmem:[#allocation56_spill] sm:$0xff] }
 0x787   : > { %3644 = vmatpush.msrb.mxu3 %v3507_v52  ;;  %v1941_v39 = vadd.f32 %v7698_v63, %v1810_v59  ;;  %v3211_v52 = vadd.f32 %v7706_v55, %v7705_v49 }
 0x788   : > { %v1937_v46 = vadd.f32 %v7702_v45, %v1806_v24  ;;  %v2231_v54 = vadd.f32 %v7704_v10, %v1939_v30  ;;  %v7717_v24 = vld [vmem:[#allocation72_spill] sm:$0xff] }
 0x789   : > { %3645 = vmatpush.msrb.mxu3 %v3505_v48  ;;  %v2233_v17 = vadd.f32 %v6627_v3, %v1941_v39  ;;  %v7708_v48 = vld [vmem:[#allocation71_spill] sm:$0xff]  ;;  %v7718_v39 = vld [vmem:[#allocation66_spill] sm:$0xff] }
 0x78a   : > { %v3215_v25 = vadd.f32 %v7708_v48, %v7707_v2 }
 0x78b   : > { %3646 = vmatpush.msrb.mxu3 %v3503_v21  ;;  %v3076_v62 = vadd.f32 %v7703_v47, %v2233_v17  ;;  %v7709_v21 = vld [vmem:[#allocation29_spill] sm:$0xff] }
 0x78c   : > { %v1935_v3 = vadd.f32 %v7709_v21, %v1804_v56 }
 0x78d   : > { %3647 = vmatpush.msrb.mxu3 %v3501_v42  ;;  %v2229_v42 = vadd.f32 %v7710_v26, %v1937_v46 }
 0x78e   : > { %v2227_v59 = vadd.f32 %v7714_v1, %v1935_v3  ;;  %v7340_v3 = vpop.permute.xlu0 %3565 }
 0x78f   : > { %3648 = vmatpush.msrb.mxu3 %v3499_v18  ;;  %v3072_v50 = vadd.f32 %v7715_v11, %v2229_v42 }
 0x790   : > { %v3070_v63 = vadd.f32 %v7717_v24, %v2227_v59  ;;  %v7723_v59 = vld [vmem:[#allocation28_spill] sm:$0xff]  ;;  %v7725_v24 = vld [vmem:[#allocation42_spill] sm:$0xff] }
 0x791   : > { %3649 = vmatpush.msrb.mxu3 %v3497_v38  ;;  %v7711_v38 = vld [vmem:[#allocation74_spill] sm:$0xff] }
 0x792   : > { %4453 = vmatmul.msk.f32.vlgmr.msrb.gmra.mxu3 %vm3568_vm12, %v7222_v58  ;;  %v3074_v0 = vadd.f32 %v7711_v38, %v2231_v54 }
 0x794   : > { %v3205_v20 = vadd.f32 %v7718_v39, %v3074_v0 }
 0x796   : > { %v7346_v42 = vpop.permute.xlu0 %3555 }
 0x79a   : > { %4454 = vmatmul.msk.f32.gmra.mxu3 %vm3568_vm12, %v7229_v36 }
 0x7a2   : > { %4455 = vmatmul.msk.f32.gmra.mxu3 %vm3568_vm12, %v7236_v33 }
 0x7aa   : > { %4456 = vmatmul.msk.f32.gmra.mxu3 %vm3568_vm12, %v7243_v12 }
 0x7b2   : > { %4457 = vmatmul.msk.f32.gmra.mxu3 %vm3568_vm12, %v7250_v34 }
 0x7ba   : > { %4458 = vmatmul.msk.f32.gmra.mxu3 %vm3568_vm12, %v7257_v43 }
 0x7c2   : > { %4459 = vmatmul.msk.f32.gmra.mxu3 %vm3568_vm12, %v7264_v7 }
 0x7c4   : > { %v7268_v37 = vpop.f32.mrf.mxu0 }
 0x7ca   : > { %4460 = vmatmul.msk.f32.gmra.mxu3 %vm3568_vm12, %v7273_v4 }
 0x7cc   : > { %v3386_v28 = vpop.f32.mrf.mxu0 }
 0x7d4   : > { %v3389_v27 = vpop.f32.mrf.mxu0 }
 0x7d5   : > { %v3452_v57 = vadd.f32 %v3389_v27, %v3205_v20 }
 0x7d7   : > { %v3484_v54 = vmul.f32 0.1, %v3452_v57  ;;  %vm3468_vm2 = vcmp.ge.f32.partialorder %v3452_v57, 0.0 }
 0x7dc   : > { %v3392_v19 = vpop.f32.mrf.mxu0 }
 0x7e4   : > { %v3395_v51 = vpop.f32.mrf.mxu0 }
 0x7e5   : > { %v3456_v61 = vadd.f32 %v3395_v51, %v3209_v14  ;;  %v7720_v51 = vld [vmem:[#allocation64_spill] sm:$0xff] }
 0x7e6   : > { %v3201_v46 = vadd.f32 %v7720_v51, %v3070_v63 }
 0x7e7   : > { %vm3472_vm0 = vcmp.ge.f32.partialorder %v3456_v61, 0.0 }
 0x7ec   : > { %v3398_v32 = vpop.f32.mrf.mxu0 }
 0x7ed   : > { %v3458_v41 = vadd.f32 %v3398_v32, %v3211_v52  ;;  %v7719_v32 = vld [vmem:[#allocation65_spill] sm:$0xff] }
 0x7ee   : > { %v3203_v30 = vadd.f32 %v7719_v32, %v3072_v50  ;;  %v7724_v50 = vld [vmem:[#allocation58_spill] sm:$0xff] }
 0x7ef   : > { %v3490_v17 = vmul.f32 0.1, %v3458_v41  ;;  %vm3474_vm15 = vcmp.ge.f32.partialorder %v3458_v41, 0.0 }
 0x7f0   : > { %v3450_v47 = vadd.f32 %v3386_v28, %v3203_v30 }
 0x7f1   : > { %v3506_v10 = vsel %vm3474_vm15, %v3458_v41, %v3490_v17 }
 0x7f2   : > { %v3482_v55 = vmul.f32 0.1, %v3450_v47  ;;  %vm3466_vm4 = vcmp.ge.f32.partialorder %v3450_v47, 0.0 }
 0x7f4   : > { %v3401_v29 = vpop.f32.mrf.mxu0  ;;  %v3498_v2 = vsel %vm3466_vm4, %v3450_v47, %v3482_v55 }
 0x7f5   : > { %v3460_v53 = vadd.f32 %v3401_v29, %v3213_v5  ;;  %v7716_v29 = vld [vmem:[#allocation67_spill] sm:$0xff]  ;;  %v3488_v5 = vmul.f32 0.1, %v3456_v61 }
 0x7f6   : > { %v3207_v35 = vadd.f32 %v7716_v29, %v3076_v62 }
 0x7f7   : > { %v3492_v60 = vmul.f32 0.1, %v3460_v53  ;;  %vm3476_vm14 = vcmp.ge.f32.partialorder %v3460_v53, 0.0  ;;  %v3504_v49 = vsel %vm3472_vm0, %v3456_v61, %v3488_v5 }
 0x7f8   : > { %v3454_v56 = vadd.f32 %v3392_v19, %v3207_v35  ;;  %v3448_v19 = vadd.f32 %v7268_v37, %v3201_v46 }
 0x7f9   : > { %v3508_v45 = vsel %vm3476_vm14, %v3460_v53, %v3492_v60  ;;  %v3500_v53 = vsel %vm3468_vm2, %v3452_v57, %v3484_v54 }
 0x7fa   : > { %v3486_v62 = vmul.f32 0.1, %v3454_v56  ;;  %vm3470_vm1 = vcmp.ge.f32.partialorder %v3454_v56, 0.0  ;;  %v3480_v27 = vmul.f32 0.1, %v3448_v19  ;;  %vm3464_vm5 = vcmp.ge.f32.partialorder %v3448_v19, 0.0 }
 0x7fc   : > { %v3404_v18 = vpop.f32.mrf.mxu0  ;;  %v3502_v52 = vsel %vm3470_vm1, %v3454_v56, %v3486_v62  ;;  %v3496_v28 = vsel %vm3464_vm5, %v3448_v19, %v3480_v27  ;;  %v7395_v27 = vld [vmem:[%s7550_s13 + $0x10] sm:$0xff] }
 0x7fd   : > { %v3462_v15 = vadd.f32 %v3404_v18, %v3215_v25  ;;  %v7352_v18 = vpop.permute.xlu0 %3545 }
 0x7ff   : > { %vm3478_vm13 = vcmp.ge.f32.partialorder %v3462_v15, 0.0  ;;  %v3494_v23 = vmul.f32 0.1, %v3462_v15 }
 0x801   : > { %v3510_v8 = vsel %vm3478_vm13, %v3462_v15, %v3494_v23  ;;  %v7722_v15 = vld [vmem:[#allocation40_spill] sm:$0xff] }
 0x802   : > { %3601 = vmatpush.msrb.mxu2 %v3510_v8  ;;  %v7726_v8 = vld [vmem:[#allocation25_spill] sm:$0xff] }
 0x804   : > { %3602 = vmatpush.msrb.mxu2 %v3508_v45 }
 0x805   : > { %v7368_v60 = vpop.permute.xlu0 %3535 }
 0x806   : > { %3603 = vmatpush.msrb.mxu2 %v3506_v10 }
 0x808   : > { %3604 = vmatpush.msrb.mxu2 %v3504_v49 }
 0x80a   : > { %3605 = vmatpush.msrb.mxu2 %v3502_v52  ;;  %v7388_v52 = vld [vmem:[%s7550_s13 + $0x8] sm:$0xff] }
 0x80c   : > { %3606 = vmatpush.msrb.mxu2 %v3500_v53  ;;  %v7402_v53 = vld [vmem:[%s7550_s13 + $0x18] sm:$0xff] }
 0x80e   : > { %3607 = vmatpush.msrb.mxu2 %v3498_v2  ;;  %v7409_v2 = vld [vmem:[%s7550_s13 + $0x20] sm:$0xff] }
 0x810   : > { %3608 = vmatpush.msrb.mxu2 %v3496_v28  ;;  %v7416_v28 = vld [vmem:[%s7550_s13 + $0x28] sm:$0xff] }
 0x811   : > { %4445 = vmatmul.msk.f32.vlgmr.msrb.gmra.mxu2 %vm3568_vm12, %v7222_v58  ;;  %v7342_v58 = vpop.permute.xlu2 %3560 }
 0x815   : > { %v3651_v37 = vpop.f32.mrf.mxu3 }
 0x819   : > { %4446 = vmatmul.msk.f32.gmra.mxu2 %vm3568_vm12, %v7229_v36 }
 0x81d   : > { %v3654_v48 = vpop.f32.mrf.mxu3 }
 0x81e   : > { %v3655_v23 = vadd.f32 %v3654_v48, %v7368_v60 }
 0x820   : > { %v3678_v5 = vadd.f32 %v3655_v23, %v7161_v40  ;;  %v7381_v40 = vld [vmem:[%s7550_s13] sm:$0xff] }
 0x821   : > { %4447 = vmatmul.msk.f32.gmra.mxu2 %vm3568_vm12, %v7236_v33  ;;  %v7348_v33 = vpop.permute.xlu2 %3550 }
 0x822   : > { %v3710_v19 = vmul.f32 0.1, %v3678_v5  ;;  %vm3694_vm13 = vcmp.ge.f32.partialorder %v3678_v5, 0.0 }
 0x824   : > { %v3726_v55 = vsel %vm3694_vm13, %v3678_v5, %v3710_v19  ;;  %v7451_v5 = vpop.permute.xlu1 %3757 }
 0x825   : > { %v3657_v25 = vpop.f32.mrf.mxu3 }
 0x829   : > { %4448 = vmatmul.msk.f32.gmra.mxu2 %vm3568_vm12, %v7243_v12  ;;  %v7357_v38 = vpop.permute.xlu2 %3540 }
 0x82d   : > { %v3660_v21 = vpop.f32.mrf.mxu3 }
 0x831   : > { %4449 = vmatmul.msk.f32.gmra.mxu2 %vm3568_vm12, %v7250_v34  ;;  %v7372_v56 = vpop.permute.xlu2 %3530 }
 0x832   : > { %v3652_v17 = vadd.f32 %v3651_v37, %v7372_v56  ;;  %v7423_v37 = vld [vmem:[%s7550_s13 + $0x30] sm:$0xff] }
 0x834   : > { %v3676_v46 = vadd.f32 %v3652_v17, %v7165_v44 }
 0x835   : > { %v3663_v26 = vpop.f32.mrf.mxu3 }
 0x836   : > { %v3664_v16 = vadd.f32 %v3663_v26, %v7348_v33  ;;  %v3708_v49 = vmul.f32 0.1, %v3676_v46  ;;  %vm3692_vm14 = vcmp.ge.f32.partialorder %v3676_v46, 0.0 }
 0x838   : > { %v3684_v29 = vadd.f32 %v3664_v16, %v7724_v50  ;;  %v3724_v44 = vsel %vm3692_vm14, %v3676_v46, %v3708_v49 }
 0x839   : > { %4450 = vmatmul.msk.f32.gmra.mxu2 %vm3568_vm12, %v7257_v43 }
 0x83a   : > { %v3716_v57 = vmul.f32 0.1, %v3684_v29  ;;  %vm3700_vm9 = vcmp.ge.f32.partialorder %v3684_v29, 0.0 }
 0x83c   : > { %v3732_v47 = vsel %vm3700_vm9, %v3684_v29, %v3716_v57 }
 0x83d   : > { %v3666_v36 = vpop.f32.mrf.mxu3 }
 0x83e   : > { %v3667_v43 = vadd.f32 %v3666_v36, %v7346_v42 }
 0x840   : > { %v3686_v1 = vadd.f32 %v3667_v43, %v7722_v15 }
 0x841   : > { %4451 = vmatmul.msk.f32.gmra.mxu2 %vm3568_vm12, %v7264_v7  ;;  %v3661_v7 = vadd.f32 %v3660_v21, %v7352_v18 }
 0x842   : > { %v3718_v20 = vmul.f32 0.1, %v3686_v1  ;;  %vm3702_vm8 = vcmp.ge.f32.partialorder %v3686_v1, 0.0 }
 0x843   : > { %v3682_v63 = vadd.f32 %v3661_v7, %v7725_v24 }
 0x844   : > { %v3734_v45 = vsel %vm3702_vm8, %v3686_v1, %v3718_v20 }
 0x845   : > { %v3669_v12 = vpop.f32.mrf.mxu3  ;;  %v3714_v51 = vmul.f32 0.1, %v3682_v63  ;;  %vm3698_vm10 = vcmp.ge.f32.partialorder %v3682_v63, 0.0 }
 0x846   : > { %v3670_v34 = vadd.f32 %v3669_v12, %v7342_v58 }
 0x847   : > { %v3730_v10 = vsel %vm3698_vm10, %v3682_v63, %v3714_v51 }
 0x848   : > { %v3688_v14 = vadd.f32 %v3670_v34, %v7721_v13 }
 0x849   : > { %4452 = vmatmul.msk.f32.gmra.mxu2 %vm3568_vm12, %v7273_v4  ;;  %v3658_v4 = vadd.f32 %v3657_v25, %v7357_v38  ;;  %v7430_v25 = vld [vmem:[%s7550_s13 + $0x38] sm:$0xff] }
 0x84a   : > { %v3720_v61 = vmul.f32 0.1, %v3688_v14  ;;  %vm3704_vm7 = vcmp.ge.f32.partialorder %v3688_v14, 0.0 }
 0x84b   : > { %v3680_v32 = vadd.f32 %v3658_v4, %v7726_v8  ;;  %v7729_v4 = vld [vmem:[#allocation26_spill] sm:$0xff] }
 0x84c   : > { %v3736_v30 = vsel %vm3704_vm7, %v3688_v14, %v3720_v61 }
 0x84d   : > { %v3672_v0 = vpop.f32.mrf.mxu3  ;;  %v3712_v62 = vmul.f32 0.1, %v3680_v32  ;;  %vm3696_vm11 = vcmp.ge.f32.partialorder %v3680_v32, 0.0 }
 0x84e   : > { %v3673_v41 = vadd.f32 %v3672_v0, %v7340_v3 }
 0x84f   : > { %v3728_v54 = vsel %vm3696_vm11, %v3680_v32, %v3712_v62  ;;  %v7462_v62 = vpop.permute.xlu0 %3762 }
 0x850   : > { %v3690_v11 = vadd.f32 %v3673_v41, %v7723_v59  ;;  %v7727_v41 = vld [vmem:[#allocation36_spill] sm:$0xff] }
 0x851   : > { %v7728_v59 = vld [vmem:[#allocation52_spill] sm:$0xff] }
 0x852   : > { %v3722_v35 = vmul.f32 0.1, %v3690_v11  ;;  %vm3706_vm6 = vcmp.ge.f32.partialorder %v3690_v11, 0.0 }
 0x854   : > { %v3738_v39 = vsel %vm3706_vm6, %v3690_v11, %v3722_v35  ;;  %v7730_v35 = vld [vmem:[#allocation75_spill] sm:$0xff] }
 0x855   : > { %3868 = vmatpush.msra.mxu1 %v3738_v39 }
 0x857   : > { %3869 = vmatpush.msra.mxu1 %v3736_v30 }
 0x859   : > { %3870 = vmatpush.msra.mxu1 %v3734_v45 }
 0x85b   : > { %3871 = vmatpush.msra.mxu1 %v3732_v47 }
 0x85d   : > { %3872 = vmatpush.msra.mxu1 %v3730_v10 }
 0x85f   : > { %3873 = vmatpush.msra.mxu1 %v3728_v54 }
 0x861   : > { %3874 = vmatpush.msra.mxu1 %v3726_v55  ;;  %v3768_v55 = vpop.permute.xlu2 %3767 }
 0x863   : > { %3875 = vmatpush.msra.mxu1 %v3724_v44 }
 0x864   : > { %4469 = vmatmul.msk.f32.vlgmr.msra.gmra.mxu1 %vm3568_vm12, %v7381_v40 }
 0x86c   : > { %4470 = vmatmul.msk.f32.gmra.mxu1 %vm3568_vm12, %v7388_v52 }
 0x874   : > { %4471 = vmatmul.msk.f32.gmra.mxu1 %vm3568_vm12, %v7395_v27 }
 0x87c   : > { %4472 = vmatmul.msk.f32.gmra.mxu1 %vm3568_vm12, %v7402_v53 }
 0x884   : > { %4473 = vmatmul.msk.f32.gmra.mxu1 %vm3568_vm12, %v7409_v2 }
 0x88c   : > { %4474 = vmatmul.msk.f32.gmra.mxu1 %vm3568_vm12, %v7416_v28 }
 0x894   : > { %v3610_v48 = vpop.f32.mrf.mxu2  ;;  %4475 = vmatmul.msk.f32.gmra.mxu1 %vm3568_vm12, %v7423_v37 }
 0x89c   : > { %v3613_v21 = vpop.f32.mrf.mxu2  ;;  %4476 = vmatmul.msk.f32.gmra.mxu1 %vm3568_vm12, %v7430_v25 }
 0x8a4   : > { %v3616_v26 = vpop.f32.mrf.mxu2 }
 0x8a5   : > { %v3617_v29 = vadd.f32 %v3616_v26, %v7357_v38  ;;  %v3773_v26 = vpop.permute.xlu1 %3772 }
 0x8a7   : > { %v3679_v63 = vadd.f32 %v3617_v29, %v7285_v9 }
 0x8a9   : > { %v3711_v32 = vmul.f32 0.1, %v3679_v63  ;;  %vm3695_vm5 = vcmp.ge.f32.partialorder %v3679_v63, 0.0 }
 0x8ab   : > { %v3727_v30 = vsel %vm3695_vm5, %v3679_v63, %v3711_v32 }
 0x8ac   : > { %v3619_v36 = vpop.f32.mrf.mxu2 }
 0x8ad   : > { %v3620_v1 = vadd.f32 %v3619_v36, %v7352_v18  ;;  %v3611_v18 = vadd.f32 %v3610_v48, %v7372_v56 }
 0x8af   : > { %v3681_v23 = vadd.f32 %v3620_v1, %v7279_v22  ;;  %v3675_v22 = vadd.f32 %v3611_v18, %v7293_v31  ;;  %v3788_v1 = vpop.permute.xlu1 %3787 }
 0x8b1   : > { %v3713_v8 = vmul.f32 0.1, %v3681_v23  ;;  %vm3697_vm4 = vcmp.ge.f32.partialorder %v3681_v23, 0.0  ;;  %v3707_v57 = vmul.f32 0.1, %v3675_v22  ;;  %vm3691_vm7 = vcmp.ge.f32.partialorder %v3675_v22, 0.0 }
 0x8b3   : > { %v3729_v56 = vsel %vm3697_vm4, %v3681_v23, %v3713_v8  ;;  %v3723_v45 = vsel %vm3691_vm7, %v3675_v22, %v3707_v57 }
 0x8b4   : > { %v3622_v12 = vpop.f32.mrf.mxu2 }
 0x8b5   : > { %v3623_v14 = vadd.f32 %v3622_v12, %v7348_v33  ;;  %v3614_v33 = vadd.f32 %v3613_v21, %v7368_v60 }
 0x8b7   : > { %v3683_v61 = vadd.f32 %v3623_v14, %v7730_v35  ;;  %v3677_v20 = vadd.f32 %v3614_v33, %v7289_v6  ;;  %v3783_v14 = vpop.permute.xlu2 %3782 }
 0x8b9   : > { %v3715_v38 = vmul.f32 0.1, %v3683_v61  ;;  %vm3699_vm2 = vcmp.ge.f32.partialorder %v3683_v61, 0.0  ;;  %v3709_v9 = vmul.f32 0.1, %v3677_v20  ;;  %vm3693_vm6 = vcmp.ge.f32.partialorder %v3677_v20, 0.0 }
 0x8bb   : > { %v3731_v60 = vsel %vm3699_vm2, %v3683_v61, %v3715_v38  ;;  %v3725_v6 = vsel %vm3693_vm6, %v3677_v20, %v3709_v9 }
 0x8bc   : > { %v3625_v34 = vpop.f32.mrf.mxu2 }
 0x8bd   : > { %v3626_v16 = vadd.f32 %v3625_v34, %v7346_v42 }
 0x8bf   : > { %v3685_v11 = vadd.f32 %v3626_v16, %v7728_v59 }
 0x8c1   : > { %vm3701_vm1 = vcmp.ge.f32.partialorder %v3685_v11, 0.0 }
 0x8c4   : > { %v3628_v43 = vpop.f32.mrf.mxu2 }
 0x8c5   : > { %v3629_v0 = vadd.f32 %v3628_v43, %v7342_v58  ;;  %v3778_v43 = vpop.permute.xlu0 %3777 }
 0x8c7   : > { %v3687_v7 = vadd.f32 %v3629_v0, %v7727_v41 }
 0x8c9   : > { %v3719_v42 = vmul.f32 0.1, %v3687_v7  ;;  %vm3703_vm0 = vcmp.ge.f32.partialorder %v3687_v7, 0.0 }
 0x8cb   : > { %v3735_v39 = vsel %vm3703_vm0, %v3687_v7, %v3719_v42 }
 0x8cc   : > { %v3631_v13 = vpop.f32.mrf.mxu2 }
 0x8cd   : > { %v3632_v15 = vadd.f32 %v3631_v13, %v7340_v3  ;;  %v3717_v3 = vmul.f32 0.1, %v3685_v11 }
 0x8cf   : > { %v3689_v50 = vadd.f32 %v3632_v15, %v7729_v4  ;;  %v3733_v17 = vsel %vm3701_vm1, %v3685_v11, %v3717_v3 }
 0x8d1   : > { %v3721_v58 = vmul.f32 0.1, %v3689_v50  ;;  %vm3705_vm15 = vcmp.ge.f32.partialorder %v3689_v50, 0.0 }
 0x8d3   : > { %v3737_v24 = vsel %vm3705_vm15, %v3689_v50, %v3721_v58  ;;  %v3793_v50 = vpop.permute.xlu0 %3792 }
 0x8d4   : > { %3827 = vmatpush.msra.mxu0 %v3737_v24 }
 0x8d6   : > { %3828 = vmatpush.msra.mxu0 %v3735_v39 }
 0x8d8   : > { %3829 = vmatpush.msra.mxu0 %v3733_v17 }
 0x8da   : > { %3830 = vmatpush.msra.mxu0 %v3731_v60 }
 0x8dc   : > { %3831 = vmatpush.msra.mxu0 %v3729_v56 }
 0x8de   : > { %3832 = vmatpush.msra.mxu0 %v3727_v30 }
 0x8e0   : > { %3833 = vmatpush.msra.mxu0 %v3725_v6 }
 0x8e1   : > { %v3877_v31 = vpop.f32.mrf.mxu1 }
 0x8e2   : > { %v3878_v51 = vadd.f32 %v3877_v31, %v7451_v5  ;;  %3834 = vmatpush.msra.mxu0 %v3723_v45 }
 0x8e3   : > { %4461 = vmatmul.msk.f32.vlgmr.msra.gmra.mxu0 %vm3568_vm12, %v7381_v40 }
 0x8e4   : > { %vm3902_vm8 = vcmp.ge.f32.partialorder %v3878_v51, 0.0  ;;  %v3918_v46 = vmul.f32 0.1, %v3878_v51 }
 0x8e6   : > { %v3934_v47 = vsel %vm3902_vm8, %v3878_v51, %v3918_v46 }
 0x8e7   : > { %3950 = vst.msk [vmem:[%s7458_s16 + $0x8] sm:$0xff] %vm1382_vm3, %v3934_v47 }
 0x8e9   : > { %v3880_v10 = vpop.f32.mrf.mxu1 }
 0x8ea   : > { %v3881_v19 = vadd.f32 %v3880_v10, %v7462_v62 }
 0x8eb   : > { %4462 = vmatmul.msk.f32.gmra.mxu0 %vm3568_vm12, %v7388_v52 }
 0x8ec   : > { %vm3904_vm9 = vcmp.ge.f32.partialorder %v3881_v19, 0.0  ;;  %v3920_v54 = vmul.f32 0.1, %v3881_v19 }
 0x8ee   : > { %v3936_v49 = vsel %vm3904_vm9, %v3881_v19, %v3920_v54 }
 0x8ef   : > { %3952 = vst.msk [vmem:[%s7458_s16 + $0x18] sm:$0xff] %vm1382_vm3, %v3936_v49 }
 0x8f1   : > { %v3883_v40 = vpop.f32.mrf.mxu1 }
 0x8f2   : > { %v3884_v44 = vadd.f32 %v3883_v40, %v3768_v55 }
 0x8f3   : > { %4463 = vmatmul.msk.f32.gmra.mxu0 %vm3568_vm12, %v7395_v27 }
 0x8f4   : > { %vm3906_vm10 = vcmp.ge.f32.partialorder %v3884_v44, 0.0  ;;  %v3922_v48 = vmul.f32 0.1, %v3884_v44 }
 0x8f6   : > { %v3938_v21 = vsel %vm3906_vm10, %v3884_v44, %v3922_v48 }
 0x8f7   : > { %3954 = vst.msk [vmem:[%s7458_s16 + $0x28] sm:$0xff] %vm1382_vm3, %v3938_v21 }
 0x8f9   : > { %v3886_v52 = vpop.f32.mrf.mxu1 }
 0x8fa   : > { %v3887_v36 = vadd.f32 %v3886_v52, %v3773_v26 }
 0x8fb   : > { %4464 = vmatmul.msk.f32.gmra.mxu0 %vm3568_vm12, %v7402_v53 }
 0x8fc   : > { %vm3908_vm11 = vcmp.ge.f32.partialorder %v3887_v36, 0.0  ;;  %v3924_v12 = vmul.f32 0.1, %v3887_v36 }
 0x8fe   : > { %v3940_v34 = vsel %vm3908_vm11, %v3887_v36, %v3924_v12 }
 0x8ff   : > { %3956 = vst.msk [vmem:[%s7458_s16 + $0x38] sm:$0xff] %vm1382_vm3, %v3940_v34 }
 0x901   : > { %v3889_v27 = vpop.f32.mrf.mxu1 }
 0x902   : > { %v3890_v0 = vadd.f32 %v3889_v27, %v3778_v43 }
 0x903   : > { %4465 = vmatmul.msk.f32.gmra.mxu0 %vm3568_vm12, %v7409_v2 }
 0x904   : > { %vm3910_vm13 = vcmp.ge.f32.partialorder %v3890_v0, 0.0  ;;  %v3926_v16 = vmul.f32 0.1, %v3890_v0 }
 0x906   : > { %v3942_v13 = vsel %vm3910_vm13, %v3890_v0, %v3926_v16 }
 0x907   : > { %3958 = vst.msk [vmem:[%s7458_s16 + $0x48] sm:$0xff] %vm1382_vm3, %v3942_v13 }
 0x909   : > { %v3892_v53 = vpop.f32.mrf.mxu1 }
 0x90a   : > { %v3893_v41 = vadd.f32 %v3892_v53, %v3783_v14 }
 0x90b   : > { %4466 = vmatmul.msk.f32.gmra.mxu0 %vm3568_vm12, %v7416_v28 }
 0x90c   : > { %vm3912_vm14 = vcmp.ge.f32.partialorder %v3893_v41, 0.0  ;;  %v3928_v7 = vmul.f32 0.1, %v3893_v41 }
 0x90e   : > { %v3944_v15 = vsel %vm3912_vm14, %v3893_v41, %v3928_v7 }
 0x90f   : > { %3960 = vst.msk [vmem:[%s7458_s16 + $0x58] sm:$0xff] %vm1382_vm3, %v3944_v15 }
 0x911   : > { %v3895_v2 = vpop.f32.mrf.mxu1 }
 0x912   : > { %v3896_v59 = vadd.f32 %v3895_v2, %v3788_v1 }
 0x913   : > { %4467 = vmatmul.msk.f32.gmra.mxu0 %vm3568_vm12, %v7423_v37 }
 0x914   : > { %vm3914_vm15 = vcmp.ge.f32.partialorder %v3896_v59, 0.0  ;;  %v3930_v11 = vmul.f32 0.1, %v3896_v59 }
 0x916   : > { %v3946_v4 = vsel %vm3914_vm15, %v3896_v59, %v3930_v11 }
 0x917   : > { %3962 = vst.msk [vmem:[%s7458_s16 + $0x68] sm:$0xff] %vm1382_vm3, %v3946_v4 }
 0x919   : > { %v3898_v28 = vpop.f32.mrf.mxu1 }
 0x91a   : > { %v3899_v29 = vadd.f32 %v3898_v28, %v3793_v50 }
 0x91b   : > { %4468 = vmatmul.msk.f32.gmra.mxu0 %vm3568_vm12, %v7430_v25 }
 0x91c   : > { %vm3916_vm0 = vcmp.ge.f32.partialorder %v3899_v29, 0.0  ;;  %v3932_v35 = vmul.f32 0.1, %v3899_v29 }
 0x91e   : > { %v3948_v61 = vsel %vm3916_vm0, %v3899_v29, %v3932_v35 }
 0x91f   : > { %3964 = vst.msk [vmem:[%s7458_s16 + $0x78] sm:$0xff] %vm1382_vm3, %v3948_v61 }
 0x960   : > { %v3836_v58 = vpop.f32.mrf.mxu0 }
 0x961   : > { %v3837_v37 = vadd.f32 %v3836_v58, %v7451_v5 }
 0x963   : > { %vm3901_vm1 = vcmp.ge.f32.partialorder %v3837_v37, 0.0  ;;  %v3917_v42 = vmul.f32 0.1, %v3837_v37 }
 0x965   : > { %v3933_v33 = vsel %vm3901_vm1, %v3837_v37, %v3917_v42 }
 0x966   : > { %3949 = vst [vmem:[%s7458_s16] sm:$0xff] %v3933_v33 }
 0x968   : > { %v3839_v23 = vpop.f32.mrf.mxu0 }
 0x969   : > { %v3840_v24 = vadd.f32 %v3839_v23, %v7462_v62 }
 0x96b   : > { %vm3903_vm2 = vcmp.ge.f32.partialorder %v3840_v24, 0.0  ;;  %v3919_v25 = vmul.f32 0.1, %v3840_v24 }
 0x96d   : > { %v3935_v3 = vsel %vm3903_vm2, %v3840_v24, %v3919_v25 }
 0x96e   : > { %3951 = vst [vmem:[%s7458_s16 + $0x10] sm:$0xff] %v3935_v3 }
 0x970   : > { %v3842_v18 = vpop.f32.mrf.mxu0 }
 0x971   : > { %v3843_v63 = vadd.f32 %v3842_v18, %v3768_v55 }
 0x973   : > { %vm3905_vm3 = vcmp.ge.f32.partialorder %v3843_v63, 0.0  ;;  %v3921_v39 = vmul.f32 0.1, %v3843_v63 }
 0x975   : > { %v3937_v38 = vsel %vm3905_vm3, %v3843_v63, %v3921_v39 }
 0x976   : > { %3953 = vst [vmem:[%s7458_s16 + $0x20] sm:$0xff] %v3937_v38 }
 0x978   : > { %v3845_v20 = vpop.f32.mrf.mxu0 }
 0x979   : > { %v3846_v17 = vadd.f32 %v3845_v20, %v3773_v26 }
 0x97b   : > { %vm3907_vm12 = vcmp.ge.f32.partialorder %v3846_v17, 0.0  ;;  %v3923_v8 = vmul.f32 0.1, %v3846_v17 }
 0x97d   : > { %v3939_v22 = vsel %vm3907_vm12, %v3846_v17, %v3923_v8 }
 0x97e   : > { %3955 = vst [vmem:[%s7458_s16 + $0x30] sm:$0xff] %v3939_v22 }
 0x980   : > { %v3848_v60 = vpop.f32.mrf.mxu0 }
 0x981   : > { %v3849_v32 = vadd.f32 %v3848_v60, %v3778_v43 }
 0x983   : > { %vm3909_vm4 = vcmp.ge.f32.partialorder %v3849_v32, 0.0  ;;  %v3925_v56 = vmul.f32 0.1, %v3849_v32 }
 0x985   : > { %v3941_v9 = vsel %vm3909_vm4, %v3849_v32, %v3925_v56 }
 0x986   : > { %3957 = vst [vmem:[%s7458_s16 + $0x40] sm:$0xff] %v3941_v9 }
 0x988   : > { %v3851_v30 = vpop.f32.mrf.mxu0 }
 0x989   : > { %v3852_v57 = vadd.f32 %v3851_v30, %v3783_v14 }
 0x98b   : > { %vm3911_vm5 = vcmp.ge.f32.partialorder %v3852_v57, 0.0  ;;  %v3927_v6 = vmul.f32 0.1, %v3852_v57 }
 0x98d   : > { %v3943_v5 = vsel %vm3911_vm5, %v3852_v57, %v3927_v6 }
 0x98e   : > { %3959 = vst [vmem:[%s7458_s16 + $0x50] sm:$0xff] %v3943_v5 }
 0x990   : > { %v3854_v31 = vpop.f32.mrf.mxu0 }
 0x991   : > { %v3855_v45 = vadd.f32 %v3854_v31, %v3788_v1 }
 0x993   : > { %vm3913_vm6 = vcmp.ge.f32.partialorder %v3855_v45, 0.0  ;;  %v3929_v51 = vmul.f32 0.1, %v3855_v45 }
 0x995   : > { %v3945_v46 = vsel %vm3913_vm6, %v3855_v45, %v3929_v51 }
 0x996   : > { %3961 = vst [vmem:[%s7458_s16 + $0x60] sm:$0xff] %v3945_v46 }
 0x998   : > { %v3857_v47 = vpop.f32.mrf.mxu0 }
 0x999   : > { %v3858_v62 = vadd.f32 %v3857_v47, %v3793_v50 }
 0x99b   : > { %vm3915_vm7 = vcmp.ge.f32.partialorder %v3858_v62, 0.0  ;;  %v3931_v10 = vmul.f32 0.1, %v3858_v62 }
 0x99d   : > { %v3947_v19 = vsel %vm3915_vm7, %v3858_v62, %v3931_v10 }
 0x99e   : > { %3963 = vst [vmem:[%s7458_s16 + $0x70] sm:$0xff] %v3947_v19 }
 0x99f   : > { %4835 = shalt.err (!%p4832_p8)
}
 0x9a0   : > { %s4878_s29 = smov 256   ;;  %s4879_s16 = smov 16  }
 0x9a1   : > { %4496 = dma.vmem_to_hbm [thread:$0]  (%p4998_p5), %s3979_s21, 2048, %s3981_s0, %s3966_s22, %s4878_s29, %s4878_s29, %s4879_s16  }
 0x9a2 PF: > { %s7731_s26 = sld [smem:[#allocation10_spill]] }
 0x9a3   : > { %s7732_s25 = sld [smem:[#allocation8_spill]] }
 0x9a8   : > { %p4508_p9 = scmp.ge.s32.totalorder %s7731_s26, 2 }
 0x9a9   : > { %s3995_s18 = sand.u32 1, %s7732_s25  }
 0x9aa   : > { %p4503_p10 = pnand %p4508_p9, %p5002_p6  ;;  %s3996_s27 = scalar_lea.sflag [#allocation3], %s3995_s18 }
 0x9ac   : > { %p4504_p11 = pneg %p4503_p10 }
 0x9ae   : > { %4857 = dma.done.wait (%p4504_p11), %s3996_s27, 2048  }
 0x9af   : > { %4859 = vsyncadd (%p4504_p11), %s3996_s27, 4294965248  ;;  %s7734_s21 = sld [smem:[#allocation11_spill]]  ;;  %s7737_s18 = smov %s4866_s19 }
 0x9b0   : > { %s7735_s20 = sld [smem:[#allocation9_spill]] }
 0x9b1   : > { %s7736_s24 = sld [smem:[#allocation12_spill]] }
 0x9b5   : > { %p26_p12 = scmp.ge.s32.totalorder %s7734_s21, 4  }
 0x9b6   : > { %s7738_s19 = smov %s7735_s20 }
 0x9b7   : > { %s7739_s20 = smov %s7736_s24  ;;  %28 = sbr.rel (!%p26_p12) target bundleno = 7 (0x7), region = 127 }
 0x9bc   :  { %4002 = vsyncpa [#allocation3], 1 }
 0x9bd   :  { %4004 = vsyncpa [#allocation3 + $0x1], 1 }
 0x9be   :  { %4005 = vsyncpa [#allocation4], 1 }
 0x9bf   :  { %4007 = vsyncpa [#allocation4 + $0x1], 1 }

</bundles_post_ra>
